<compile_context>
chip_gen: v5e
topology: v5e:2x2
jax: 0.10.0
libtpu: 0.0.40
codegen_flags: <defaults>
</compile_context>

<pallas_src>
import functools
import math

import jax
import jax.numpy as jnp
import numpy as np
from jax.experimental import pallas as pl
from jax.experimental.pallas import tpu as pltpu

NUM_HEADS = 2


# ----------------------------- in-kernel helpers -----------------------------

def _conv3x3(x, w_ref, b_ref, m_ref, W_img):
    """3x3 SAME conv + bias + ReLU on a flat (C, H*W) raster image.

    The 9 shifted taps are built with lane rolls (XLU) + precomputed boundary
    masks and stacked along the contraction axis, so the whole conv is a single
    (Cout, 9*C) x (9*C, N) matmul on the MXU.
    """
    C, N = x.shape
    masks = m_ref[...]                                   # (9, N) lane-dense
    pieces = []
    t = 0
    for dy in (-1, 0, 1):
        for dx in (-1, 0, 1):
            shift = (-(dy * W_img + dx)) % N             # out[:, r] = in[:, r + dy*W + dx]
            if dy == 0 and dx == 0:
                pieces.append(x)                         # center tap: no roll, mask == 1
            else:
                xs = pltpu.roll(x, shift, axis=1)
                pieces.append(xs * masks[t:t + 1, :])    # zero wrapped-around lanes
            t += 1
    xk = jnp.concatenate(pieces, axis=0)                 # (9*C, N)
    y = jnp.dot(w_ref[...], xk, preferred_element_type=jnp.float32) + b_ref[...]
    return jnp.maximum(y, 0.0)


def _maxpool2x2(x, W_img, sel_ref):
    """2x2 / stride-2 max pool of a flat (C, H*W) raster image.

    4-way max via lane rolls, then a 0/1 compaction matmul (N, N/4).  Roll
    wrap-around only lands on lanes the selector discards (even (i, j) picks)."""
    N = x.shape[1]
    m = x
    for s in (1, W_img, W_img + 1):
        m = jnp.maximum(m, pltpu.roll(x, (-s) % N, axis=1))
    return jnp.dot(m, sel_ref[...], preferred_element_type=jnp.float32)


def _layernorm_cols(x, g, b, eps=1e-5):
    """LayerNorm over the channel (sublane) axis of a (D, T) tile."""
    mu = jnp.mean(x, axis=0, keepdims=True)
    var = jnp.mean(jnp.square(x - mu), axis=0, keepdims=True)
    return (x - mu) * jax.lax.rsqrt(var + eps) * g + b


def _gelu(x):
    # TODO(synk): tanh-approx GELU; PyTorch nn.GELU default is the exact erf form.
    return 0.5 * x * (1.0 + jnp.tanh(0.7978845608028654 * (x + 0.044715 * x * x * x)))


def _transformer_block(x, ln1g, ln1b, ln2g, ln2b,
                       wqkv_ref, bqkv_ref, wo_ref, bo_ref,
                       w1_ref, b1_ref, w2_ref, b2_ref, num_heads):
    """Pre-norm transformer block on (D, T) tokens (D on sublanes, T on lanes)."""
    D, T = x.shape
    Dh = D // num_heads
    scale = 1.0 / math.sqrt(Dh)

    # --- multi-head self-attention: fused QKV + fused output projection ---
    h = _layernorm_cols(x, ln1g[...], ln1b[...])
    qkv = jnp.dot(wqkv_ref[...], h, preferred_element_type=jnp.float32) + bqkv_ref[...]  # (3D, T)
    head_outs = []
    for hd in range(num_heads):
        q = qkv[hd * Dh:(hd + 1) * Dh, :]
        k = qkv[D + hd * Dh:D + (hd + 1) * Dh, :]
        v = qkv[2 * D + hd * Dh:2 * D + (hd + 1) * Dh, :]
        s = jax.lax.dot_general(q, k, (((0,), (0,)), ((), ())),
                                preferred_element_type=jnp.float32) * scale      # (Tq, Tk)
        p = jnp.exp(s - jnp.max(s, axis=-1, keepdims=True))
        p = p / jnp.sum(p, axis=-1, keepdims=True)                               # exact softmax
        o = jax.lax.dot_general(v, p, (((1,), (1,)), ((), ())),
                                preferred_element_type=jnp.float32)              # (Dh, Tq)
        head_outs.append(o)
    o_all = jnp.concatenate(head_outs, axis=0)                                   # (D, T)
    attn = jnp.dot(wo_ref[...], o_all, preferred_element_type=jnp.float32) + bo_ref[...]
    x = x + attn

    # --- MLP ---
    h = _layernorm_cols(x, ln2g[...], ln2b[...])
    h = _gelu(jnp.dot(w1_ref[...], h, preferred_element_type=jnp.float32) + b1_ref[...])
    h = jnp.dot(w2_ref[...], h, preferred_element_type=jnp.float32) + b2_ref[...]
    return x + h


# --------------------------------- the kernel --------------------------------

def _unet_kernel(x_ref,
                 e1w, e1b, e2w, e2b, e3w, e3b,
                 ln1g, ln1b, ln2g, ln2b,
                 wqkv, bqkv, wo, bo,
                 w1, b1, w2, b2,
                 d3w, d3b, d2w, d2b, d1w, d1b,
                 hw_ref, hb_ref,
                 mk1, mk2, mk3,
                 s1, s2, s3, u3, u2, u1,
                 o_ref, *, H, W, num_heads):
    """Whole UnetTransformer forward for ONE image (grid axis = batch)."""
    x = x_ref[0]                                            # (Cin, H*W) lane-dense
    W2, W4 = W // 2, W // 4

    # ----- encoder -----
    skip1 = _conv3x3(x, e1w, e1b, mk1, W)                   # (8,  HW)
    p1 = _maxpool2x2(skip1, W, s1)                          # (8,  HW/4)
    skip2 = _conv3x3(p1, e2w, e2b, mk2, W2)                 # (16, HW/4)
    p2 = _maxpool2x2(skip2, W2, s2)                         # (16, HW/16)
    skip3 = _conv3x3(p2, e3w, e3b, mk3, W4)                 # (32, HW/16)
    p3 = _maxpool2x2(skip3, W4, s3)                         # (32, HW/64)

    # ----- transformer bottleneck (tokens = 2x2 spatial positions) -----
    t = _transformer_block(p3, ln1g, ln1b, ln2g, ln2b,
                           wqkv, bqkv, wo, bo,
                           w1, b1, w2, b2, num_heads)       # (32, HW/64)

    # ----- decoder (upsample = 0/1 matmul; skip-concat feeds the K-stacked conv) -----
    up3 = jnp.dot(t, u3[...], preferred_element_type=jnp.float32)        # (32, HW/16)
    d3 = _conv3x3(jnp.concatenate([up3, skip3], axis=0), d3w, d3b, mk3, W4)   # (32, HW/16)

    up2 = jnp.dot(d3, u2[...], preferred_element_type=jnp.float32)       # (32, HW/4)
    d2 = _conv3x3(jnp.concatenate([up2, skip2], axis=0), d2w, d2b, mk2, W2)   # (16, HW/4)

    up1 = jnp.dot(d2, u1[...], preferred_element_type=jnp.float32)       # (16, HW)
    d1 = _conv3x3(jnp.concatenate([up1, skip1], axis=0), d1w, d1b, mk1, W)    # (8, HW)

    # 1x1 head -> lane-dense (out_c, HW) store
    o_ref[0] = (jnp.dot(hw_ref[...], d1, preferred_element_type=jnp.float32)
                + hb_ref[...]).astype(o_ref.dtype)


# ------------------------------ host-side constants ---------------------------

def _tap_masks_np(H, W):
    """Lane-dense (9, H*W) validity masks for the 9 taps of a SAME 3x3 conv."""
    N = H * W
    r = np.arange(N)
    i, j = r // W, r % W
    m = np.zeros((9, N), np.float32)
    t = 0
    for dy in (-1, 0, 1):
        for dx in (-1, 0, 1):
            m[t] = ((i + dy >= 0) & (i + dy < H) & (j + dx >= 0) & (j + dx < W))
            t += 1
    return m


def _pool_select_np(H, W):
    """0/1 matrix (H*W, Ho*Wo) selecting the top-left lane of each 2x2 block."""
    Ho, Wo = H // 2, W // 2
    S = np.zeros((H * W, Ho * Wo), np.float32)
    q = np.arange(Ho * Wo)
    S[2 * (q // Wo) * W + 2 * (q % Wo), q] = 1.0
    return S


def _upsample_select_np(h, w):
    """0/1 matrix (h*w, 4*h*w) implementing nearest-neighbour 2x upsampling."""
    H2, W2 = 2 * h, 2 * w
    U = np.zeros((h * w, H2 * W2), np.float32)
    p = np.arange(H2 * W2)
    U[(p // W2 // 2) * w + (p % W2) // 2, p] = 1.0
    return U


def _const_spec(a):
    nd = a.ndim
    return pl.BlockSpec(a.shape, lambda b, _nd=nd: (0,) * _nd)


# ------------------------------ host-side wrapper -----------------------------

def unet_transformer_forward(x_nchw, params):
    """x_nchw: (B, Cin, H, W) like the PyTorch module.  Returns (B, 3, H, W)."""
    B, cin, H, W = x_nchw.shape
    HW = H * W
    out_c = params["head_w"].shape[0]

    # (C, H*W) layout: channels on sublanes, spatial on lanes -> no transpose needed.
    x = x_nchw.astype(jnp.float32).reshape(B, cin, HW)

    consts = [
        params["enc1_w"], params["enc1_b"], params["enc2_w"], params["enc2_b"],
        params["enc3_w"], params["enc3_b"],
        params["ln1_g"], params["ln1_b"], params["ln2_g"], params["ln2_b"],
        params["w_qkv"], params["b_qkv"], params["w_o"], params["b_o"],
        params["w1"], params["b1"], params["w2"], params["b2"],
        params["dec3_w"], params["dec3_b"], params["dec2_w"], params["dec2_b"],
        params["dec1_w"], params["dec1_b"],
        params["head_w"], params["head_b"],
        jnp.asarray(_tap_masks_np(H, W)),
        jnp.asarray(_tap_masks_np(H // 2, W // 2)),
        jnp.asarray(_tap_masks_np(H // 4, W // 4)),
        jnp.asarray(_pool_select_np(H, W)),
        jnp.asarray(_pool_select_np(H // 2, W // 2)),
        jnp.asarray(_pool_select_np(H // 4, W // 4)),
        jnp.asarray(_upsample_select_np(H // 8, W // 8)),
        jnp.asarray(_upsample_select_np(H // 4, W // 4)),
        jnp.asarray(_upsample_select_np(H // 2, W // 2)),
    ]

    out = pl.pallas_call(
        functools.partial(_unet_kernel, H=H, W=W, num_heads=NUM_HEADS),
        out_shape=jax.ShapeDtypeStruct((B, out_c, HW), jnp.float32),
        grid=(B,),
        in_specs=[pl.BlockSpec((1, cin, HW), lambda b: (b, 0, 0))]
                 + [_const_spec(a) for a in consts],
        out_specs=pl.BlockSpec((1, out_c, HW), lambda b: (b, 0, 0)),
        # "parallel" -> batch shards across the two TensorCores on v7x; serial
        # (but cheap, ~0.35us/step) on single-TC v5e/v6e.
        compiler_params=pltpu.CompilerParams(dimension_semantics=("parallel",)),
    )(x, *consts)

    return out.reshape(B, out_c, H, W)


# ------------------------------- parameter init --------------------------------

def init_params(key):
    def conv_w(k, cin, cout):
        # conv weight stored as (Cout, 9*Cin); tap index t = (dy+1)*3 + (dx+1),
        # within each tap the contraction rows are the Cin input channels
        # (decoder: upsampled-path channels first, then skip channels).
        w = jax.random.normal(k, (cout, 9, cin), jnp.float32) * math.sqrt(2.0 / (9 * cin))
        return w.reshape(cout, 9 * cin)

    def lin_w(k, cin, cout):
        return jax.random.normal(k, (cout, cin), jnp.float32) * math.sqrt(2.0 / cin)

    D, MLP = 32, 64
    ks = jax.random.split(key, 12)
    z = lambda *s: jnp.zeros(s, jnp.float32)
    return {
        "enc1_w": conv_w(ks[0], 4, 8),    "enc1_b": z(8, 1),
        "enc2_w": conv_w(ks[1], 8, 16),   "enc2_b": z(16, 1),
        "enc3_w": conv_w(ks[2], 16, 32),  "enc3_b": z(32, 1),
        "ln1_g": jnp.ones((D, 1), jnp.float32), "ln1_b": z(D, 1),
        "ln2_g": jnp.ones((D, 1), jnp.float32), "ln2_b": z(D, 1),
        # fused QKV projection: rows [0,D)=Q, [D,2D)=K, [2D,3D)=V, heads contiguous
        "w_qkv": jax.random.normal(ks[3], (3 * D, D), jnp.float32) * math.sqrt(2.0 / D),
        "b_qkv": z(3 * D, 1),
        "w_o": jax.random.normal(ks[4], (D, D), jnp.float32) * math.sqrt(2.0 / D),
        "b_o": z(D, 1),
        "w1": lin_w(ks[5], D, MLP), "b1": z(MLP, 1),
        "w2": lin_w(ks[6], MLP, D), "b2": z(D, 1),
        # decoder conv weights: per-tap input rows = [upsampled | skip]
        "dec3_w": conv_w(ks[7], 64, 32), "dec3_b": z(32, 1),
        "dec2_w": conv_w(ks[8], 48, 16), "dec2_b": z(16, 1),
        "dec1_w": conv_w(ks[9], 24, 8),  "dec1_b": z(8, 1),
        "head_w": lin_w(ks[10], 8, 3),   "head_b": z(3, 1),
    }


# ------------------------------------ main -------------------------------------

if __name__ == "__main__":
    key = jax.random.PRNGKey(0)
    k_in, k_par = jax.random.split(key)
    x = jax.random.normal(k_in, (2, 4, 16, 16), jnp.float32)  # NCHW, like PyTorch
    params = init_params(k_par)

    fwd = jax.jit(unet_transformer_forward)
    out = jax.block_until_ready(fwd(x, params))

    assert out.shape == (2, 3, 16, 16), out.shape
    assert bool(jnp.all(jnp.isfinite(out)))
    print("KERNEL_OK")
</pallas_src>

<mosaic_0001>
module attributes {stable_mosaic.version = 11 : i64} {
  func.func @_unet_kernel(%arg0: i32, %arg1: memref<1x4x256xf32, #tpu.memory_space<vmem>>, %arg2: memref<8x36xf32, #tpu.memory_space<vmem>>, %arg3: memref<8x1xf32, #tpu.memory_space<vmem>>, %arg4: memref<16x72xf32, #tpu.memory_space<vmem>>, %arg5: memref<16x1xf32, #tpu.memory_space<vmem>>, %arg6: memref<32x144xf32, #tpu.memory_space<vmem>>, %arg7: memref<32x1xf32, #tpu.memory_space<vmem>>, %arg8: memref<32x1xf32, #tpu.memory_space<vmem>>, %arg9: memref<32x1xf32, #tpu.memory_space<vmem>>, %arg10: memref<32x1xf32, #tpu.memory_space<vmem>>, %arg11: memref<32x1xf32, #tpu.memory_space<vmem>>, %arg12: memref<96x32xf32, #tpu.memory_space<vmem>>, %arg13: memref<96x1xf32, #tpu.memory_space<vmem>>, %arg14: memref<32x32xf32, #tpu.memory_space<vmem>>, %arg15: memref<32x1xf32, #tpu.memory_space<vmem>>, %arg16: memref<64x32xf32, #tpu.memory_space<vmem>>, %arg17: memref<64x1xf32, #tpu.memory_space<vmem>>, %arg18: memref<32x64xf32, #tpu.memory_space<vmem>>, %arg19: memref<32x1xf32, #tpu.memory_space<vmem>>, %arg20: memref<32x576xf32, #tpu.memory_space<vmem>>, %arg21: memref<32x1xf32, #tpu.memory_space<vmem>>, %arg22: memref<16x432xf32, #tpu.memory_space<vmem>>, %arg23: memref<16x1xf32, #tpu.memory_space<vmem>>, %arg24: memref<8x216xf32, #tpu.memory_space<vmem>>, %arg25: memref<8x1xf32, #tpu.memory_space<vmem>>, %arg26: memref<3x8xf32, #tpu.memory_space<vmem>>, %arg27: memref<3x1xf32, #tpu.memory_space<vmem>>, %arg28: memref<9x256xf32, #tpu.memory_space<vmem>>, %arg29: memref<9x64xf32, #tpu.memory_space<vmem>>, %arg30: memref<9x16xf32, #tpu.memory_space<vmem>>, %arg31: memref<256x64xf32, #tpu.memory_space<vmem>>, %arg32: memref<64x16xf32, #tpu.memory_space<vmem>>, %arg33: memref<16x4xf32, #tpu.memory_space<vmem>>, %arg34: memref<4x16xf32, #tpu.memory_space<vmem>>, %arg35: memref<16x64xf32, #tpu.memory_space<vmem>>, %arg36: memref<64x256xf32, #tpu.memory_space<vmem>>, %arg37: memref<1x3x256xf32, #tpu.memory_space<vmem>>) attributes {dimension_semantics = [#tpu.dimension_semantics<parallel>], iteration_bounds = array<i64: 2>, scalar_prefetch = 0 : i64, scratch_operands = 0 : i64, tpu.core_type = #tpu.core_type<tc>, window_params = [{transform_indices = @transform_0, window_bounds = array<i64: 1, 4, 256>}, {pipeline_mode = #tpu.pipeline_mode<synchronous>, transform_indices = @transform_1, window_bounds = array<i64: 8, 36>}, {pipeline_mode = #tpu.pipeline_mode<synchronous>, transform_indices = @transform_2, window_bounds = array<i64: 8, 1>}, {pipeline_mode = #tpu.pipeline_mode<synchronous>, transform_indices = @transform_3, window_bounds = array<i64: 16, 72>}, {pipeline_mode = #tpu.pipeline_mode<synchronous>, transform_indices = @transform_4, window_bounds = array<i64: 16, 1>}, {pipeline_mode = #tpu.pipeline_mode<synchronous>, transform_indices = @transform_5, window_bounds = array<i64: 32, 144>}, {pipeline_mode = #tpu.pipeline_mode<synchronous>, transform_indices = @transform_6, window_bounds = array<i64: 32, 1>}, {pipeline_mode = #tpu.pipeline_mode<synchronous>, transform_indices = @transform_7, window_bounds = array<i64: 32, 1>}, {pipeline_mode = #tpu.pipeline_mode<synchronous>, transform_indices = @transform_8, window_bounds = array<i64: 32, 1>}, {pipeline_mode = #tpu.pipeline_mode<synchronous>, transform_indices = @transform_9, window_bounds = array<i64: 32, 1>}, {pipeline_mode = #tpu.pipeline_mode<synchronous>, transform_indices = @transform_10, window_bounds = array<i64: 32, 1>}, {pipeline_mode = #tpu.pipeline_mode<synchronous>, transform_indices = @transform_11, window_bounds = array<i64: 96, 32>}, {pipeline_mode = #tpu.pipeline_mode<synchronous>, transform_indices = @transform_12, window_bounds = array<i64: 96, 1>}, {pipeline_mode = #tpu.pipeline_mode<synchronous>, transform_indices = @transform_13, window_bounds = array<i64: 32, 32>}, {pipeline_mode = #tpu.pipeline_mode<synchronous>, transform_indices = @transform_14, window_bounds = array<i64: 32, 1>}, {pipeline_mode = #tpu.pipeline_mode<synchronous>, transform_indices = @transform_15, window_bounds = array<i64: 64, 32>}, {pipeline_mode = #tpu.pipeline_mode<synchronous>, transform_indices = @transform_16, window_bounds = array<i64: 64, 1>}, {pipeline_mode = #tpu.pipeline_mode<synchronous>, transform_indices = @transform_17, window_bounds = array<i64: 32, 64>}, {pipeline_mode = #tpu.pipeline_mode<synchronous>, transform_indices = @transform_18, window_bounds = array<i64: 32, 1>}, {pipeline_mode = #tpu.pipeline_mode<synchronous>, transform_indices = @transform_19, window_bounds = array<i64: 32, 576>}, {pipeline_mode = #tpu.pipeline_mode<synchronous>, transform_indices = @transform_20, window_bounds = array<i64: 32, 1>}, {pipeline_mode = #tpu.pipeline_mode<synchronous>, transform_indices = @transform_21, window_bounds = array<i64: 16, 432>}, {pipeline_mode = #tpu.pipeline_mode<synchronous>, transform_indices = @transform_22, window_bounds = array<i64: 16, 1>}, {pipeline_mode = #tpu.pipeline_mode<synchronous>, transform_indices = @transform_23, window_bounds = array<i64: 8, 216>}, {pipeline_mode = #tpu.pipeline_mode<synchronous>, transform_indices = @transform_24, window_bounds = array<i64: 8, 1>}, {pipeline_mode = #tpu.pipeline_mode<synchronous>, transform_indices = @transform_25, window_bounds = array<i64: 3, 8>}, {pipeline_mode = #tpu.pipeline_mode<synchronous>, transform_indices = @transform_26, window_bounds = array<i64: 3, 1>}, {pipeline_mode = #tpu.pipeline_mode<synchronous>, transform_indices = @transform_27, window_bounds = array<i64: 9, 256>}, {pipeline_mode = #tpu.pipeline_mode<synchronous>, transform_indices = @transform_28, window_bounds = array<i64: 9, 64>}, {pipeline_mode = #tpu.pipeline_mode<synchronous>, transform_indices = @transform_29, window_bounds = array<i64: 9, 16>}, {pipeline_mode = #tpu.pipeline_mode<synchronous>, transform_indices = @transform_30, window_bounds = array<i64: 256, 64>}, {pipeline_mode = #tpu.pipeline_mode<synchronous>, transform_indices = @transform_31, window_bounds = array<i64: 64, 16>}, {pipeline_mode = #tpu.pipeline_mode<synchronous>, transform_indices = @transform_32, window_bounds = array<i64: 16, 4>}, {pipeline_mode = #tpu.pipeline_mode<synchronous>, transform_indices = @transform_33, window_bounds = array<i64: 4, 16>}, {pipeline_mode = #tpu.pipeline_mode<synchronous>, transform_indices = @transform_34, window_bounds = array<i64: 16, 64>}, {pipeline_mode = #tpu.pipeline_mode<synchronous>, transform_indices = @transform_35, window_bounds = array<i64: 64, 256>}, {transform_indices = @transform_36, window_bounds = array<i64: 1, 3, 256>}]} {
    %c0 = arith.constant 0 : index
    %c0_0 = arith.constant 0 : index
    %c0_1 = arith.constant 0 : index
    %0 = vector.load %arg1[%c0, %c0_0, %c0_1] : memref<1x4x256xf32, #tpu.memory_space<vmem>>, vector<1x4x256xf32>
    %1 = vector.shape_cast %0 : vector<1x4x256xf32> to vector<4x256xf32>
    %c0_2 = arith.constant 0 : index
    %c0_3 = arith.constant 0 : index
    %2 = vector.load %arg28[%c0_2, %c0_3] : memref<9x256xf32, #tpu.memory_space<vmem>>, vector<9x256xf32>
    %c17_i32 = arith.constant 17 : i32
    %3 = tpu.dynamic_rotate %1 by %c17_i32 dim 1 : vector<4x256xf32>, i32 -> vector<4x256xf32>
    %4 = vector.extract_strided_slice %2 {offsets = [0, 0], sizes = [1, 256], strides = [1, 1]} : vector<9x256xf32> to vector<1x256xf32>
    %5 = vector.broadcast %4 : vector<1x256xf32> to vector<4x256xf32>
    %6 = arith.mulf %3, %5 : vector<4x256xf32>
    %c16_i32 = arith.constant 16 : i32
    %7 = tpu.dynamic_rotate %1 by %c16_i32 dim 1 : vector<4x256xf32>, i32 -> vector<4x256xf32>
    %8 = vector.extract_strided_slice %2 {offsets = [1, 0], sizes = [1, 256], strides = [1, 1]} : vector<9x256xf32> to vector<1x256xf32>
    %9 = vector.broadcast %8 : vector<1x256xf32> to vector<4x256xf32>
    %10 = arith.mulf %7, %9 : vector<4x256xf32>
    %c15_i32 = arith.constant 15 : i32
    %11 = tpu.dynamic_rotate %1 by %c15_i32 dim 1 : vector<4x256xf32>, i32 -> vector<4x256xf32>
    %12 = vector.extract_strided_slice %2 {offsets = [2, 0], sizes = [1, 256], strides = [1, 1]} : vector<9x256xf32> to vector<1x256xf32>
    %13 = vector.broadcast %12 : vector<1x256xf32> to vector<4x256xf32>
    %14 = arith.mulf %11, %13 : vector<4x256xf32>
    %c1_i32 = arith.constant 1 : i32
    %15 = tpu.dynamic_rotate %1 by %c1_i32 dim 1 : vector<4x256xf32>, i32 -> vector<4x256xf32>
    %16 = vector.extract_strided_slice %2 {offsets = [3, 0], sizes = [1, 256], strides = [1, 1]} : vector<9x256xf32> to vector<1x256xf32>
    %17 = vector.broadcast %16 : vector<1x256xf32> to vector<4x256xf32>
    %18 = arith.mulf %15, %17 : vector<4x256xf32>
    %c255_i32 = arith.constant 255 : i32
    %19 = tpu.dynamic_rotate %1 by %c255_i32 dim 1 : vector<4x256xf32>, i32 -> vector<4x256xf32>
    %20 = vector.extract_strided_slice %2 {offsets = [5, 0], sizes = [1, 256], strides = [1, 1]} : vector<9x256xf32> to vector<1x256xf32>
    %21 = vector.broadcast %20 : vector<1x256xf32> to vector<4x256xf32>
    %22 = arith.mulf %19, %21 : vector<4x256xf32>
    %c241_i32 = arith.constant 241 : i32
    %23 = tpu.dynamic_rotate %1 by %c241_i32 dim 1 : vector<4x256xf32>, i32 -> vector<4x256xf32>
    %24 = vector.extract_strided_slice %2 {offsets = [6, 0], sizes = [1, 256], strides = [1, 1]} : vector<9x256xf32> to vector<1x256xf32>
    %25 = vector.broadcast %24 : vector<1x256xf32> to vector<4x256xf32>
    %26 = arith.mulf %23, %25 : vector<4x256xf32>
    %c240_i32 = arith.constant 240 : i32
    %27 = tpu.dynamic_rotate %1 by %c240_i32 dim 1 : vector<4x256xf32>, i32 -> vector<4x256xf32>
    %28 = vector.extract_strided_slice %2 {offsets = [7, 0], sizes = [1, 256], strides = [1, 1]} : vector<9x256xf32> to vector<1x256xf32>
    %29 = vector.broadcast %28 : vector<1x256xf32> to vector<4x256xf32>
    %30 = arith.mulf %27, %29 : vector<4x256xf32>
    %c239_i32 = arith.constant 239 : i32
    %31 = tpu.dynamic_rotate %1 by %c239_i32 dim 1 : vector<4x256xf32>, i32 -> vector<4x256xf32>
    %32 = vector.extract_strided_slice %2 {offsets = [8, 0], sizes = [1, 256], strides = [1, 1]} : vector<9x256xf32> to vector<1x256xf32>
    %33 = vector.broadcast %32 : vector<1x256xf32> to vector<4x256xf32>
    %34 = arith.mulf %31, %33 : vector<4x256xf32>
    %35 = tpu.concatenate %6, %10, %14, %18, %1, %22, %26, %30, %34 in 0 : vector<4x256xf32>, vector<4x256xf32>, vector<4x256xf32>, vector<4x256xf32>, vector<4x256xf32>, vector<4x256xf32>, vector<4x256xf32>, vector<4x256xf32>, vector<4x256xf32> -> vector<36x256xf32>
    %c0_4 = arith.constant 0 : index
    %c0_5 = arith.constant 0 : index
    %36 = vector.load %arg2[%c0_4, %c0_5] : memref<8x36xf32, #tpu.memory_space<vmem>>, vector<8x36xf32>
    %cst = arith.constant dense<0.000000e+00> : vector<8x256xf32>
    %37 = tpu.matmul %36, %35, %cst {dimension_numbers = #tpu.dot_dimension_numbers<[1], [0], [0], [1], [0, 0, 1, 1], [], []>} : vector<8x36xf32>, vector<36x256xf32>, vector<8x256xf32> -> vector<8x256xf32>
    %c0_6 = arith.constant 0 : index
    %c0_7 = arith.constant 0 : index
    %38 = vector.load %arg3[%c0_6, %c0_7] : memref<8x1xf32, #tpu.memory_space<vmem>>, vector<8x1xf32>
    %39 = vector.broadcast %38 : vector<8x1xf32> to vector<8x256xf32>
    %40 = arith.addf %37, %39 : vector<8x256xf32>
    %cst_8 = arith.constant 0.000000e+00 : f32
    %41 = vector.broadcast %cst_8 : f32 to vector<8x256xf32>
    %42 = arith.maximumf %40, %41 : vector<8x256xf32>
    %c255_i32_9 = arith.constant 255 : i32
    %43 = tpu.dynamic_rotate %42 by %c255_i32_9 dim 1 : vector<8x256xf32>, i32 -> vector<8x256xf32>
    %44 = arith.maximumf %42, %43 : vector<8x256xf32>
    %c240_i32_10 = arith.constant 240 : i32
    %45 = tpu.dynamic_rotate %42 by %c240_i32_10 dim 1 : vector<8x256xf32>, i32 -> vector<8x256xf32>
    %46 = arith.maximumf %44, %45 : vector<8x256xf32>
    %c239_i32_11 = arith.constant 239 : i32
    %47 = tpu.dynamic_rotate %42 by %c239_i32_11 dim 1 : vector<8x256xf32>, i32 -> vector<8x256xf32>
    %48 = arith.maximumf %46, %47 : vector<8x256xf32>
    %c0_12 = arith.constant 0 : index
    %c0_13 = arith.constant 0 : index
    %49 = vector.load %arg31[%c0_12, %c0_13] : memref<256x64xf32, #tpu.memory_space<vmem>>, vector<256x64xf32>
    %cst_14 = arith.constant dense<0.000000e+00> : vector<8x64xf32>
    %50 = tpu.matmul %48, %49, %cst_14 {dimension_numbers = #tpu.dot_dimension_numbers<[1], [0], [0], [1], [0, 0, 1, 1], [], []>} : vector<8x256xf32>, vector<256x64xf32>, vector<8x64xf32> -> vector<8x64xf32>
    %c0_15 = arith.constant 0 : index
    %c0_16 = arith.constant 0 : index
    %51 = vector.load %arg29[%c0_15, %c0_16] : memref<9x64xf32, #tpu.memory_space<vmem>>, vector<9x64xf32>
    %c9_i32 = arith.constant 9 : i32
    %52 = tpu.dynamic_rotate %50 by %c9_i32 dim 1 : vector<8x64xf32>, i32 -> vector<8x64xf32>
    %53 = vector.extract_strided_slice %51 {offsets = [0, 0], sizes = [1, 64], strides = [1, 1]} : vector<9x64xf32> to vector<1x64xf32>
    %54 = vector.broadcast %53 : vector<1x64xf32> to vector<8x64xf32>
    %55 = arith.mulf %52, %54 : vector<8x64xf32>
    %c8_i32 = arith.constant 8 : i32
    %56 = tpu.dynamic_rotate %50 by %c8_i32 dim 1 : vector<8x64xf32>, i32 -> vector<8x64xf32>
    %57 = vector.extract_strided_slice %51 {offsets = [1, 0], sizes = [1, 64], strides = [1, 1]} : vector<9x64xf32> to vector<1x64xf32>
    %58 = vector.broadcast %57 : vector<1x64xf32> to vector<8x64xf32>
    %59 = arith.mulf %56, %58 : vector<8x64xf32>
    %c7_i32 = arith.constant 7 : i32
    %60 = tpu.dynamic_rotate %50 by %c7_i32 dim 1 : vector<8x64xf32>, i32 -> vector<8x64xf32>
    %61 = vector.extract_strided_slice %51 {offsets = [2, 0], sizes = [1, 64], strides = [1, 1]} : vector<9x64xf32> to vector<1x64xf32>
    %62 = vector.broadcast %61 : vector<1x64xf32> to vector<8x64xf32>
    %63 = arith.mulf %60, %62 : vector<8x64xf32>
    %c1_i32_17 = arith.constant 1 : i32
    %64 = tpu.dynamic_rotate %50 by %c1_i32_17 dim 1 : vector<8x64xf32>, i32 -> vector<8x64xf32>
    %65 = vector.extract_strided_slice %51 {offsets = [3, 0], sizes = [1, 64], strides = [1, 1]} : vector<9x64xf32> to vector<1x64xf32>
    %66 = vector.broadcast %65 : vector<1x64xf32> to vector<8x64xf32>
    %67 = arith.mulf %64, %66 : vector<8x64xf32>
    %c63_i32 = arith.constant 63 : i32
    %68 = tpu.dynamic_rotate %50 by %c63_i32 dim 1 : vector<8x64xf32>, i32 -> vector<8x64xf32>
    %69 = vector.extract_strided_slice %51 {offsets = [5, 0], sizes = [1, 64], strides = [1, 1]} : vector<9x64xf32> to vector<1x64xf32>
    %70 = vector.broadcast %69 : vector<1x64xf32> to vector<8x64xf32>
    %71 = arith.mulf %68, %70 : vector<8x64xf32>
    %c57_i32 = arith.constant 57 : i32
    %72 = tpu.dynamic_rotate %50 by %c57_i32 dim 1 : vector<8x64xf32>, i32 -> vector<8x64xf32>
    %73 = vector.extract_strided_slice %51 {offsets = [6, 0], sizes = [1, 64], strides = [1, 1]} : vector<9x64xf32> to vector<1x64xf32>
    %74 = vector.broadcast %73 : vector<1x64xf32> to vector<8x64xf32>
    %75 = arith.mulf %72, %74 : vector<8x64xf32>
    %c56_i32 = arith.constant 56 : i32
    %76 = tpu.dynamic_rotate %50 by %c56_i32 dim 1 : vector<8x64xf32>, i32 -> vector<8x64xf32>
    %77 = vector.extract_strided_slice %51 {offsets = [7, 0], sizes = [1, 64], strides = [1, 1]} : vector<9x64xf32> to vector<1x64xf32>
    %78 = vector.broadcast %77 : vector<1x64xf32> to vector<8x64xf32>
    %79 = arith.mulf %76, %78 : vector<8x64xf32>
    %c55_i32 = arith.constant 55 : i32
    %80 = tpu.dynamic_rotate %50 by %c55_i32 dim 1 : vector<8x64xf32>, i32 -> vector<8x64xf32>
    %81 = vector.extract_strided_slice %51 {offsets = [8, 0], sizes = [1, 64], strides = [1, 1]} : vector<9x64xf32> to vector<1x64xf32>
    %82 = vector.broadcast %81 : vector<1x64xf32> to vector<8x64xf32>
    %83 = arith.mulf %80, %82 : vector<8x64xf32>
    %84 = tpu.concatenate %55, %59, %63, %67, %50, %71, %75, %79, %83 in 0 : vector<8x64xf32>, vector<8x64xf32>, vector<8x64xf32>, vector<8x64xf32>, vector<8x64xf32>, vector<8x64xf32>, vector<8x64xf32>, vector<8x64xf32>, vector<8x64xf32> -> vector<72x64xf32>
    %c0_18 = arith.constant 0 : index
    %c0_19 = arith.constant 0 : index
    %85 = vector.load %arg4[%c0_18, %c0_19] : memref<16x72xf32, #tpu.memory_space<vmem>>, vector<16x72xf32>
    %cst_20 = arith.constant dense<0.000000e+00> : vector<16x64xf32>
    %86 = tpu.matmul %85, %84, %cst_20 {dimension_numbers = #tpu.dot_dimension_numbers<[1], [0], [0], [1], [0, 0, 1, 1], [], []>} : vector<16x72xf32>, vector<72x64xf32>, vector<16x64xf32> -> vector<16x64xf32>
    %c0_21 = arith.constant 0 : index
    %c0_22 = arith.constant 0 : index
    %87 = vector.load %arg5[%c0_21, %c0_22] : memref<16x1xf32, #tpu.memory_space<vmem>>, vector<16x1xf32>
    %88 = vector.broadcast %87 : vector<16x1xf32> to vector<16x64xf32>
    %89 = arith.addf %86, %88 : vector<16x64xf32>
    %cst_23 = arith.constant 0.000000e+00 : f32
    %90 = vector.broadcast %cst_23 : f32 to vector<16x64xf32>
    %91 = arith.maximumf %89, %90 : vector<16x64xf32>
    %c63_i32_24 = arith.constant 63 : i32
    %92 = tpu.dynamic_rotate %91 by %c63_i32_24 dim 1 : vector<16x64xf32>, i32 -> vector<16x64xf32>
    %93 = arith.maximumf %91, %92 : vector<16x64xf32>
    %c56_i32_25 = arith.constant 56 : i32
    %94 = tpu.dynamic_rotate %91 by %c56_i32_25 dim 1 : vector<16x64xf32>, i32 -> vector<16x64xf32>
    %95 = arith.maximumf %93, %94 : vector<16x64xf32>
    %c55_i32_26 = arith.constant 55 : i32
    %96 = tpu.dynamic_rotate %91 by %c55_i32_26 dim 1 : vector<16x64xf32>, i32 -> vector<16x64xf32>
    %97 = arith.maximumf %95, %96 : vector<16x64xf32>
    %c0_27 = arith.constant 0 : index
    %c0_28 = arith.constant 0 : index
    %98 = vector.load %arg32[%c0_27, %c0_28] : memref<64x16xf32, #tpu.memory_space<vmem>>, vector<64x16xf32>
    %cst_29 = arith.constant dense<0.000000e+00> : vector<16x16xf32>
    %99 = tpu.matmul %97, %98, %cst_29 {dimension_numbers = #tpu.dot_dimension_numbers<[1], [0], [0], [1], [0, 0, 1, 1], [], []>} : vector<16x64xf32>, vector<64x16xf32>, vector<16x16xf32> -> vector<16x16xf32>
    %c0_30 = arith.constant 0 : index
    %c0_31 = arith.constant 0 : index
    %100 = vector.load %arg30[%c0_30, %c0_31] : memref<9x16xf32, #tpu.memory_space<vmem>>, vector<9x16xf32>
    %c5_i32 = arith.constant 5 : i32
    %101 = tpu.dynamic_rotate %99 by %c5_i32 dim 1 : vector<16x16xf32>, i32 -> vector<16x16xf32>
    %102 = vector.extract_strided_slice %100 {offsets = [0, 0], sizes = [1, 16], strides = [1, 1]} : vector<9x16xf32> to vector<1x16xf32>
    %103 = vector.broadcast %102 : vector<1x16xf32> to vector<16x16xf32>
    %104 = arith.mulf %101, %103 : vector<16x16xf32>
    %c4_i32 = arith.constant 4 : i32
    %105 = tpu.dynamic_rotate %99 by %c4_i32 dim 1 : vector<16x16xf32>, i32 -> vector<16x16xf32>
    %106 = vector.extract_strided_slice %100 {offsets = [1, 0], sizes = [1, 16], strides = [1, 1]} : vector<9x16xf32> to vector<1x16xf32>
    %107 = vector.broadcast %106 : vector<1x16xf32> to vector<16x16xf32>
    %108 = arith.mulf %105, %107 : vector<16x16xf32>
    %c3_i32 = arith.constant 3 : i32
    %109 = tpu.dynamic_rotate %99 by %c3_i32 dim 1 : vector<16x16xf32>, i32 -> vector<16x16xf32>
    %110 = vector.extract_strided_slice %100 {offsets = [2, 0], sizes = [1, 16], strides = [1, 1]} : vector<9x16xf32> to vector<1x16xf32>
    %111 = vector.broadcast %110 : vector<1x16xf32> to vector<16x16xf32>
    %112 = arith.mulf %109, %111 : vector<16x16xf32>
    %c1_i32_32 = arith.constant 1 : i32
    %113 = tpu.dynamic_rotate %99 by %c1_i32_32 dim 1 : vector<16x16xf32>, i32 -> vector<16x16xf32>
    %114 = vector.extract_strided_slice %100 {offsets = [3, 0], sizes = [1, 16], strides = [1, 1]} : vector<9x16xf32> to vector<1x16xf32>
    %115 = vector.broadcast %114 : vector<1x16xf32> to vector<16x16xf32>
    %116 = arith.mulf %113, %115 : vector<16x16xf32>
    %c15_i32_33 = arith.constant 15 : i32
    %117 = tpu.dynamic_rotate %99 by %c15_i32_33 dim 1 : vector<16x16xf32>, i32 -> vector<16x16xf32>
    %118 = vector.extract_strided_slice %100 {offsets = [5, 0], sizes = [1, 16], strides = [1, 1]} : vector<9x16xf32> to vector<1x16xf32>
    %119 = vector.broadcast %118 : vector<1x16xf32> to vector<16x16xf32>
    %120 = arith.mulf %117, %119 : vector<16x16xf32>
    %c13_i32 = arith.constant 13 : i32
    %121 = tpu.dynamic_rotate %99 by %c13_i32 dim 1 : vector<16x16xf32>, i32 -> vector<16x16xf32>
    %122 = vector.extract_strided_slice %100 {offsets = [6, 0], sizes = [1, 16], strides = [1, 1]} : vector<9x16xf32> to vector<1x16xf32>
    %123 = vector.broadcast %122 : vector<1x16xf32> to vector<16x16xf32>
    %124 = arith.mulf %121, %123 : vector<16x16xf32>
    %c12_i32 = arith.constant 12 : i32
    %125 = tpu.dynamic_rotate %99 by %c12_i32 dim 1 : vector<16x16xf32>, i32 -> vector<16x16xf32>
    %126 = vector.extract_strided_slice %100 {offsets = [7, 0], sizes = [1, 16], strides = [1, 1]} : vector<9x16xf32> to vector<1x16xf32>
    %127 = vector.broadcast %126 : vector<1x16xf32> to vector<16x16xf32>
    %128 = arith.mulf %125, %127 : vector<16x16xf32>
    %c11_i32 = arith.constant 11 : i32
    %129 = tpu.dynamic_rotate %99 by %c11_i32 dim 1 : vector<16x16xf32>, i32 -> vector<16x16xf32>
    %130 = vector.extract_strided_slice %100 {offsets = [8, 0], sizes = [1, 16], strides = [1, 1]} : vector<9x16xf32> to vector<1x16xf32>
    %131 = vector.broadcast %130 : vector<1x16xf32> to vector<16x16xf32>
    %132 = arith.mulf %129, %131 : vector<16x16xf32>
    %133 = tpu.concatenate %104, %108, %112, %116, %99, %120, %124, %128, %132 in 0 : vector<16x16xf32>, vector<16x16xf32>, vector<16x16xf32>, vector<16x16xf32>, vector<16x16xf32>, vector<16x16xf32>, vector<16x16xf32>, vector<16x16xf32>, vector<16x16xf32> -> vector<144x16xf32>
    %c0_34 = arith.constant 0 : index
    %c0_35 = arith.constant 0 : index
    %134 = vector.load %arg6[%c0_34, %c0_35] : memref<32x144xf32, #tpu.memory_space<vmem>>, vector<32x144xf32>
    %cst_36 = arith.constant dense<0.000000e+00> : vector<32x16xf32>
    %135 = tpu.matmul %134, %133, %cst_36 {dimension_numbers = #tpu.dot_dimension_numbers<[1], [0], [0], [1], [0, 0, 1, 1], [], []>} : vector<32x144xf32>, vector<144x16xf32>, vector<32x16xf32> -> vector<32x16xf32>
    %c0_37 = arith.constant 0 : index
    %c0_38 = arith.constant 0 : index
    %136 = vector.load %arg7[%c0_37, %c0_38] : memref<32x1xf32, #tpu.memory_space<vmem>>, vector<32x1xf32>
    %137 = vector.broadcast %136 : vector<32x1xf32> to vector<32x16xf32>
    %138 = arith.addf %135, %137 : vector<32x16xf32>
    %cst_39 = arith.constant 0.000000e+00 : f32
    %139 = vector.broadcast %cst_39 : f32 to vector<32x16xf32>
    %140 = arith.maximumf %138, %139 : vector<32x16xf32>
    %c15_i32_40 = arith.constant 15 : i32
    %141 = tpu.dynamic_rotate %140 by %c15_i32_40 dim 1 : vector<32x16xf32>, i32 -> vector<32x16xf32>
    %142 = arith.maximumf %140, %141 : vector<32x16xf32>
    %c12_i32_41 = arith.constant 12 : i32
    %143 = tpu.dynamic_rotate %140 by %c12_i32_41 dim 1 : vector<32x16xf32>, i32 -> vector<32x16xf32>
    %144 = arith.maximumf %142, %143 : vector<32x16xf32>
    %c11_i32_42 = arith.constant 11 : i32
    %145 = tpu.dynamic_rotate %140 by %c11_i32_42 dim 1 : vector<32x16xf32>, i32 -> vector<32x16xf32>
    %146 = arith.maximumf %144, %145 : vector<32x16xf32>
    %c0_43 = arith.constant 0 : index
    %c0_44 = arith.constant 0 : index
    %147 = vector.load %arg33[%c0_43, %c0_44] : memref<16x4xf32, #tpu.memory_space<vmem>>, vector<16x4xf32>
    %cst_45 = arith.constant dense<0.000000e+00> : vector<32x4xf32>
    %148 = tpu.matmul %146, %147, %cst_45 {dimension_numbers = #tpu.dot_dimension_numbers<[1], [0], [0], [1], [0, 0, 1, 1], [], []>} : vector<32x16xf32>, vector<16x4xf32>, vector<32x4xf32> -> vector<32x4xf32>
    %c0_46 = arith.constant 0 : index
    %c0_47 = arith.constant 0 : index
    %149 = vector.load %arg8[%c0_46, %c0_47] : memref<32x1xf32, #tpu.memory_space<vmem>>, vector<32x1xf32>
    %c0_48 = arith.constant 0 : index
    %c0_49 = arith.constant 0 : index
    %150 = vector.load %arg9[%c0_48, %c0_49] : memref<32x1xf32, #tpu.memory_space<vmem>>, vector<32x1xf32>
    %cst_50 = arith.constant dense<0.000000e+00> : vector<4xf32>
    %151 = vector.multi_reduction <add>, %148, %cst_50 [0] : vector<32x4xf32> to vector<4xf32>
    %152 = vector.shape_cast %151 : vector<4xf32> to vector<1x4xf32>
    %cst_51 = arith.constant 3.200000e+01 : f32
    %153 = vector.broadcast %cst_51 : f32 to vector<1x4xf32>
    %154 = arith.divf %152, %153 : vector<1x4xf32>
    %155 = vector.broadcast %154 : vector<1x4xf32> to vector<32x4xf32>
    %156 = arith.subf %148, %155 : vector<32x4xf32>
    %157 = arith.mulf %156, %156 : vector<32x4xf32>
    %cst_52 = arith.constant dense<0.000000e+00> : vector<4xf32>
    %158 = vector.multi_reduction <add>, %157, %cst_52 [0] : vector<32x4xf32> to vector<4xf32>
    %159 = vector.shape_cast %158 : vector<4xf32> to vector<1x4xf32>
    %cst_53 = arith.constant 3.200000e+01 : f32
    %160 = vector.broadcast %cst_53 : f32 to vector<1x4xf32>
    %161 = arith.divf %159, %160 : vector<1x4xf32>
    %162 = vector.broadcast %154 : vector<1x4xf32> to vector<32x4xf32>
    %163 = arith.subf %148, %162 : vector<32x4xf32>
    %cst_54 = arith.constant 9.99999974E-6 : f32
    %164 = vector.broadcast %cst_54 : f32 to vector<1x4xf32>
    %165 = arith.addf %161, %164 : vector<1x4xf32>
    %166 = math.rsqrt %165 : vector<1x4xf32>
    %167 = vector.broadcast %166 : vector<1x4xf32> to vector<32x4xf32>
    %168 = arith.mulf %163, %167 : vector<32x4xf32>
    %169 = vector.broadcast %149 : vector<32x1xf32> to vector<32x4xf32>
    %170 = arith.mulf %168, %169 : vector<32x4xf32>
    %171 = vector.broadcast %150 : vector<32x1xf32> to vector<32x4xf32>
    %172 = arith.addf %170, %171 : vector<32x4xf32>
    %c0_55 = arith.constant 0 : index
    %c0_56 = arith.constant 0 : index
    %173 = vector.load %arg12[%c0_55, %c0_56] : memref<96x32xf32, #tpu.memory_space<vmem>>, vector<96x32xf32>
    %cst_57 = arith.constant dense<0.000000e+00> : vector<96x4xf32>
    %174 = tpu.matmul %173, %172, %cst_57 {dimension_numbers = #tpu.dot_dimension_numbers<[1], [0], [0], [1], [0, 0, 1, 1], [], []>} : vector<96x32xf32>, vector<32x4xf32>, vector<96x4xf32> -> vector<96x4xf32>
    %c0_58 = arith.constant 0 : index
    %c0_59 = arith.constant 0 : index
    %175 = vector.load %arg13[%c0_58, %c0_59] : memref<96x1xf32, #tpu.memory_space<vmem>>, vector<96x1xf32>
    %176 = vector.broadcast %175 : vector<96x1xf32> to vector<96x4xf32>
    %177 = arith.addf %174, %176 : vector<96x4xf32>
    %178 = vector.extract_strided_slice %177 {offsets = [0, 0], sizes = [16, 4], strides = [1, 1]} : vector<96x4xf32> to vector<16x4xf32>
    %179 = vector.extract_strided_slice %177 {offsets = [32, 0], sizes = [16, 4], strides = [1, 1]} : vector<96x4xf32> to vector<16x4xf32>
    %180 = vector.extract_strided_slice %177 {offsets = [64, 0], sizes = [16, 4], strides = [1, 1]} : vector<96x4xf32> to vector<16x4xf32>
    %cst_60 = arith.constant dense<0.000000e+00> : vector<4x4xf32>
    %181 = tpu.matmul %178, %179, %cst_60 {dimension_numbers = #tpu.dot_dimension_numbers<[0], [0], [1], [1], [0, 1, 1, 1], [], []>} : vector<16x4xf32>, vector<16x4xf32>, vector<4x4xf32> -> vector<4x4xf32>
    %cst_61 = arith.constant 2.500000e-01 : f32
    %182 = vector.broadcast %cst_61 : f32 to vector<4x4xf32>
    %183 = arith.mulf %181, %182 : vector<4x4xf32>
    %cst_62 = arith.constant dense<0xFF800000> : vector<4xf32>
    %184 = vector.multi_reduction <maximumf>, %183, %cst_62 [1] : vector<4x4xf32> to vector<4xf32>
    %185 = vector.shape_cast %184 : vector<4xf32> to vector<4x1xf32>
    %186 = vector.broadcast %185 : vector<4x1xf32> to vector<4x4xf32>
    %187 = arith.subf %183, %186 : vector<4x4xf32>
    %188 = math.exp %187 : vector<4x4xf32>
    %cst_63 = arith.constant dense<0.000000e+00> : vector<4xf32>
    %189 = vector.multi_reduction <add>, %188, %cst_63 [1] : vector<4x4xf32> to vector<4xf32>
    %190 = vector.shape_cast %189 : vector<4xf32> to vector<4x1xf32>
    %191 = vector.broadcast %190 : vector<4x1xf32> to vector<4x4xf32>
    %192 = arith.divf %188, %191 : vector<4x4xf32>
    %cst_64 = arith.constant dense<0.000000e+00> : vector<16x4xf32>
    %193 = tpu.matmul %180, %192, %cst_64 {dimension_numbers = #tpu.dot_dimension_numbers<[1], [1], [0], [0], [0, 0, 1, 0], [], []>} : vector<16x4xf32>, vector<4x4xf32>, vector<16x4xf32> -> vector<16x4xf32>
    %194 = vector.extract_strided_slice %177 {offsets = [16, 0], sizes = [16, 4], strides = [1, 1]} : vector<96x4xf32> to vector<16x4xf32>
    %195 = vector.extract_strided_slice %177 {offsets = [48, 0], sizes = [16, 4], strides = [1, 1]} : vector<96x4xf32> to vector<16x4xf32>
    %196 = vector.extract_strided_slice %177 {offsets = [80, 0], sizes = [16, 4], strides = [1, 1]} : vector<96x4xf32> to vector<16x4xf32>
    %cst_65 = arith.constant dense<0.000000e+00> : vector<4x4xf32>
    %197 = tpu.matmul %194, %195, %cst_65 {dimension_numbers = #tpu.dot_dimension_numbers<[0], [0], [1], [1], [0, 1, 1, 1], [], []>} : vector<16x4xf32>, vector<16x4xf32>, vector<4x4xf32> -> vector<4x4xf32>
    %cst_66 = arith.constant 2.500000e-01 : f32
    %198 = vector.broadcast %cst_66 : f32 to vector<4x4xf32>
    %199 = arith.mulf %197, %198 : vector<4x4xf32>
    %cst_67 = arith.constant dense<0xFF800000> : vector<4xf32>
    %200 = vector.multi_reduction <maximumf>, %199, %cst_67 [1] : vector<4x4xf32> to vector<4xf32>
    %201 = vector.shape_cast %200 : vector<4xf32> to vector<4x1xf32>
    %202 = vector.broadcast %201 : vector<4x1xf32> to vector<4x4xf32>
    %203 = arith.subf %199, %202 : vector<4x4xf32>
    %204 = math.exp %203 : vector<4x4xf32>
    %cst_68 = arith.constant dense<0.000000e+00> : vector<4xf32>
    %205 = vector.multi_reduction <add>, %204, %cst_68 [1] : vector<4x4xf32> to vector<4xf32>
    %206 = vector.shape_cast %205 : vector<4xf32> to vector<4x1xf32>
    %207 = vector.broadcast %206 : vector<4x1xf32> to vector<4x4xf32>
    %208 = arith.divf %204, %207 : vector<4x4xf32>
    %cst_69 = arith.constant dense<0.000000e+00> : vector<16x4xf32>
    %209 = tpu.matmul %196, %208, %cst_69 {dimension_numbers = #tpu.dot_dimension_numbers<[1], [1], [0], [0], [0, 0, 1, 0], [], []>} : vector<16x4xf32>, vector<4x4xf32>, vector<16x4xf32> -> vector<16x4xf32>
    %210 = tpu.concatenate %193, %209 in 0 : vector<16x4xf32>, vector<16x4xf32> -> vector<32x4xf32>
    %c0_70 = arith.constant 0 : index
    %c0_71 = arith.constant 0 : index
    %211 = vector.load %arg14[%c0_70, %c0_71] : memref<32x32xf32, #tpu.memory_space<vmem>>, vector<32x32xf32>
    %cst_72 = arith.constant dense<0.000000e+00> : vector<32x4xf32>
    %212 = tpu.matmul %211, %210, %cst_72 {dimension_numbers = #tpu.dot_dimension_numbers<[1], [0], [0], [1], [0, 0, 1, 1], [], []>} : vector<32x32xf32>, vector<32x4xf32>, vector<32x4xf32> -> vector<32x4xf32>
    %c0_73 = arith.constant 0 : index
    %c0_74 = arith.constant 0 : index
    %213 = vector.load %arg15[%c0_73, %c0_74] : memref<32x1xf32, #tpu.memory_space<vmem>>, vector<32x1xf32>
    %214 = vector.broadcast %213 : vector<32x1xf32> to vector<32x4xf32>
    %215 = arith.addf %212, %214 : vector<32x4xf32>
    %216 = arith.addf %148, %215 : vector<32x4xf32>
    %c0_75 = arith.constant 0 : index
    %c0_76 = arith.constant 0 : index
    %217 = vector.load %arg10[%c0_75, %c0_76] : memref<32x1xf32, #tpu.memory_space<vmem>>, vector<32x1xf32>
    %c0_77 = arith.constant 0 : index
    %c0_78 = arith.constant 0 : index
    %218 = vector.load %arg11[%c0_77, %c0_78] : memref<32x1xf32, #tpu.memory_space<vmem>>, vector<32x1xf32>
    %cst_79 = arith.constant dense<0.000000e+00> : vector<4xf32>
    %219 = vector.multi_reduction <add>, %216, %cst_79 [0] : vector<32x4xf32> to vector<4xf32>
    %220 = vector.shape_cast %219 : vector<4xf32> to vector<1x4xf32>
    %cst_80 = arith.constant 3.200000e+01 : f32
    %221 = vector.broadcast %cst_80 : f32 to vector<1x4xf32>
    %222 = arith.divf %220, %221 : vector<1x4xf32>
    %223 = vector.broadcast %222 : vector<1x4xf32> to vector<32x4xf32>
    %224 = arith.subf %216, %223 : vector<32x4xf32>
    %225 = arith.mulf %224, %224 : vector<32x4xf32>
    %cst_81 = arith.constant dense<0.000000e+00> : vector<4xf32>
    %226 = vector.multi_reduction <add>, %225, %cst_81 [0] : vector<32x4xf32> to vector<4xf32>
    %227 = vector.shape_cast %226 : vector<4xf32> to vector<1x4xf32>
    %cst_82 = arith.constant 3.200000e+01 : f32
    %228 = vector.broadcast %cst_82 : f32 to vector<1x4xf32>
    %229 = arith.divf %227, %228 : vector<1x4xf32>
    %230 = vector.broadcast %222 : vector<1x4xf32> to vector<32x4xf32>
    %231 = arith.subf %216, %230 : vector<32x4xf32>
    %cst_83 = arith.constant 9.99999974E-6 : f32
    %232 = vector.broadcast %cst_83 : f32 to vector<1x4xf32>
    %233 = arith.addf %229, %232 : vector<1x4xf32>
    %234 = math.rsqrt %233 : vector<1x4xf32>
    %235 = vector.broadcast %234 : vector<1x4xf32> to vector<32x4xf32>
    %236 = arith.mulf %231, %235 : vector<32x4xf32>
    %237 = vector.broadcast %217 : vector<32x1xf32> to vector<32x4xf32>
    %238 = arith.mulf %236, %237 : vector<32x4xf32>
    %239 = vector.broadcast %218 : vector<32x1xf32> to vector<32x4xf32>
    %240 = arith.addf %238, %239 : vector<32x4xf32>
    %c0_84 = arith.constant 0 : index
    %c0_85 = arith.constant 0 : index
    %241 = vector.load %arg16[%c0_84, %c0_85] : memref<64x32xf32, #tpu.memory_space<vmem>>, vector<64x32xf32>
    %cst_86 = arith.constant dense<0.000000e+00> : vector<64x4xf32>
    %242 = tpu.matmul %241, %240, %cst_86 {dimension_numbers = #tpu.dot_dimension_numbers<[1], [0], [0], [1], [0, 0, 1, 1], [], []>} : vector<64x32xf32>, vector<32x4xf32>, vector<64x4xf32> -> vector<64x4xf32>
    %c0_87 = arith.constant 0 : index
    %c0_88 = arith.constant 0 : index
    %243 = vector.load %arg17[%c0_87, %c0_88] : memref<64x1xf32, #tpu.memory_space<vmem>>, vector<64x1xf32>
    %244 = vector.broadcast %243 : vector<64x1xf32> to vector<64x4xf32>
    %245 = arith.addf %242, %244 : vector<64x4xf32>
    %cst_89 = arith.constant 5.000000e-01 : f32
    %246 = vector.broadcast %cst_89 : f32 to vector<64x4xf32>
    %247 = arith.mulf %246, %245 : vector<64x4xf32>
    %cst_90 = arith.constant 4.471500e-02 : f32
    %248 = vector.broadcast %cst_90 : f32 to vector<64x4xf32>
    %249 = arith.mulf %248, %245 : vector<64x4xf32>
    %250 = arith.mulf %249, %245 : vector<64x4xf32>
    %251 = arith.mulf %250, %245 : vector<64x4xf32>
    %252 = arith.addf %245, %251 : vector<64x4xf32>
    %cst_91 = arith.constant 0.797884583 : f32
    %253 = vector.broadcast %cst_91 : f32 to vector<64x4xf32>
    %254 = arith.mulf %253, %252 : vector<64x4xf32>
    %255 = math.tanh %254 : vector<64x4xf32>
    %cst_92 = arith.constant 1.000000e+00 : f32
    %256 = vector.broadcast %cst_92 : f32 to vector<64x4xf32>
    %257 = arith.addf %256, %255 : vector<64x4xf32>
    %258 = arith.mulf %247, %257 : vector<64x4xf32>
    %c0_93 = arith.constant 0 : index
    %c0_94 = arith.constant 0 : index
    %259 = vector.load %arg18[%c0_93, %c0_94] : memref<32x64xf32, #tpu.memory_space<vmem>>, vector<32x64xf32>
    %cst_95 = arith.constant dense<0.000000e+00> : vector<32x4xf32>
    %260 = tpu.matmul %259, %258, %cst_95 {dimension_numbers = #tpu.dot_dimension_numbers<[1], [0], [0], [1], [0, 0, 1, 1], [], []>} : vector<32x64xf32>, vector<64x4xf32>, vector<32x4xf32> -> vector<32x4xf32>
    %c0_96 = arith.constant 0 : index
    %c0_97 = arith.constant 0 : index
    %261 = vector.load %arg19[%c0_96, %c0_97] : memref<32x1xf32, #tpu.memory_space<vmem>>, vector<32x1xf32>
    %262 = vector.broadcast %261 : vector<32x1xf32> to vector<32x4xf32>
    %263 = arith.addf %260, %262 : vector<32x4xf32>
    %264 = arith.addf %216, %263 : vector<32x4xf32>
    %c0_98 = arith.constant 0 : index
    %c0_99 = arith.constant 0 : index
    %265 = vector.load %arg34[%c0_98, %c0_99] : memref<4x16xf32, #tpu.memory_space<vmem>>, vector<4x16xf32>
    %cst_100 = arith.constant dense<0.000000e+00> : vector<32x16xf32>
    %266 = tpu.matmul %264, %265, %cst_100 {dimension_numbers = #tpu.dot_dimension_numbers<[1], [0], [0], [1], [0, 0, 1, 1], [], []>} : vector<32x4xf32>, vector<4x16xf32>, vector<32x16xf32> -> vector<32x16xf32>
    %267 = tpu.concatenate %266, %140 in 0 : vector<32x16xf32>, vector<32x16xf32> -> vector<64x16xf32>
    %c0_101 = arith.constant 0 : index
    %c0_102 = arith.constant 0 : index
    %268 = vector.load %arg30[%c0_101, %c0_102] : memref<9x16xf32, #tpu.memory_space<vmem>>, vector<9x16xf32>
    %c5_i32_103 = arith.constant 5 : i32
    %269 = tpu.dynamic_rotate %267 by %c5_i32_103 dim 1 : vector<64x16xf32>, i32 -> vector<64x16xf32>
    %270 = vector.extract_strided_slice %268 {offsets = [0, 0], sizes = [1, 16], strides = [1, 1]} : vector<9x16xf32> to vector<1x16xf32>
    %271 = vector.broadcast %270 : vector<1x16xf32> to vector<64x16xf32>
    %272 = arith.mulf %269, %271 : vector<64x16xf32>
    %c4_i32_104 = arith.constant 4 : i32
    %273 = tpu.dynamic_rotate %267 by %c4_i32_104 dim 1 : vector<64x16xf32>, i32 -> vector<64x16xf32>
    %274 = vector.extract_strided_slice %268 {offsets = [1, 0], sizes = [1, 16], strides = [1, 1]} : vector<9x16xf32> to vector<1x16xf32>
    %275 = vector.broadcast %274 : vector<1x16xf32> to vector<64x16xf32>
    %276 = arith.mulf %273, %275 : vector<64x16xf32>
    %c3_i32_105 = arith.constant 3 : i32
    %277 = tpu.dynamic_rotate %267 by %c3_i32_105 dim 1 : vector<64x16xf32>, i32 -> vector<64x16xf32>
    %278 = vector.extract_strided_slice %268 {offsets = [2, 0], sizes = [1, 16], strides = [1, 1]} : vector<9x16xf32> to vector<1x16xf32>
    %279 = vector.broadcast %278 : vector<1x16xf32> to vector<64x16xf32>
    %280 = arith.mulf %277, %279 : vector<64x16xf32>
    %c1_i32_106 = arith.constant 1 : i32
    %281 = tpu.dynamic_rotate %267 by %c1_i32_106 dim 1 : vector<64x16xf32>, i32 -> vector<64x16xf32>
    %282 = vector.extract_strided_slice %268 {offsets = [3, 0], sizes = [1, 16], strides = [1, 1]} : vector<9x16xf32> to vector<1x16xf32>
    %283 = vector.broadcast %282 : vector<1x16xf32> to vector<64x16xf32>
    %284 = arith.mulf %281, %283 : vector<64x16xf32>
    %c15_i32_107 = arith.constant 15 : i32
    %285 = tpu.dynamic_rotate %267 by %c15_i32_107 dim 1 : vector<64x16xf32>, i32 -> vector<64x16xf32>
    %286 = vector.extract_strided_slice %268 {offsets = [5, 0], sizes = [1, 16], strides = [1, 1]} : vector<9x16xf32> to vector<1x16xf32>
    %287 = vector.broadcast %286 : vector<1x16xf32> to vector<64x16xf32>
    %288 = arith.mulf %285, %287 : vector<64x16xf32>
    %c13_i32_108 = arith.constant 13 : i32
    %289 = tpu.dynamic_rotate %267 by %c13_i32_108 dim 1 : vector<64x16xf32>, i32 -> vector<64x16xf32>
    %290 = vector.extract_strided_slice %268 {offsets = [6, 0], sizes = [1, 16], strides = [1, 1]} : vector<9x16xf32> to vector<1x16xf32>
    %291 = vector.broadcast %290 : vector<1x16xf32> to vector<64x16xf32>
    %292 = arith.mulf %289, %291 : vector<64x16xf32>
    %c12_i32_109 = arith.constant 12 : i32
    %293 = tpu.dynamic_rotate %267 by %c12_i32_109 dim 1 : vector<64x16xf32>, i32 -> vector<64x16xf32>
    %294 = vector.extract_strided_slice %268 {offsets = [7, 0], sizes = [1, 16], strides = [1, 1]} : vector<9x16xf32> to vector<1x16xf32>
    %295 = vector.broadcast %294 : vector<1x16xf32> to vector<64x16xf32>
    %296 = arith.mulf %293, %295 : vector<64x16xf32>
    %c11_i32_110 = arith.constant 11 : i32
    %297 = tpu.dynamic_rotate %267 by %c11_i32_110 dim 1 : vector<64x16xf32>, i32 -> vector<64x16xf32>
    %298 = vector.extract_strided_slice %268 {offsets = [8, 0], sizes = [1, 16], strides = [1, 1]} : vector<9x16xf32> to vector<1x16xf32>
    %299 = vector.broadcast %298 : vector<1x16xf32> to vector<64x16xf32>
    %300 = arith.mulf %297, %299 : vector<64x16xf32>
    %301 = tpu.concatenate %272, %276, %280, %284, %267, %288, %292, %296, %300 in 0 : vector<64x16xf32>, vector<64x16xf32>, vector<64x16xf32>, vector<64x16xf32>, vector<64x16xf32>, vector<64x16xf32>, vector<64x16xf32>, vector<64x16xf32>, vector<64x16xf32> -> vector<576x16xf32>
    %c0_111 = arith.constant 0 : index
    %c0_112 = arith.constant 0 : index
    %302 = vector.load %arg20[%c0_111, %c0_112] : memref<32x576xf32, #tpu.memory_space<vmem>>, vector<32x576xf32>
    %cst_113 = arith.constant dense<0.000000e+00> : vector<32x16xf32>
    %303 = tpu.matmul %302, %301, %cst_113 {dimension_numbers = #tpu.dot_dimension_numbers<[1], [0], [0], [1], [0, 0, 1, 1], [], []>} : vector<32x576xf32>, vector<576x16xf32>, vector<32x16xf32> -> vector<32x16xf32>
    %c0_114 = arith.constant 0 : index
    %c0_115 = arith.constant 0 : index
    %304 = vector.load %arg21[%c0_114, %c0_115] : memref<32x1xf32, #tpu.memory_space<vmem>>, vector<32x1xf32>
    %305 = vector.broadcast %304 : vector<32x1xf32> to vector<32x16xf32>
    %306 = arith.addf %303, %305 : vector<32x16xf32>
    %cst_116 = arith.constant 0.000000e+00 : f32
    %307 = vector.broadcast %cst_116 : f32 to vector<32x16xf32>
    %308 = arith.maximumf %306, %307 : vector<32x16xf32>
    %c0_117 = arith.constant 0 : index
    %c0_118 = arith.constant 0 : index
    %309 = vector.load %arg35[%c0_117, %c0_118] : memref<16x64xf32, #tpu.memory_space<vmem>>, vector<16x64xf32>
    %cst_119 = arith.constant dense<0.000000e+00> : vector<32x64xf32>
    %310 = tpu.matmul %308, %309, %cst_119 {dimension_numbers = #tpu.dot_dimension_numbers<[1], [0], [0], [1], [0, 0, 1, 1], [], []>} : vector<32x16xf32>, vector<16x64xf32>, vector<32x64xf32> -> vector<32x64xf32>
    %311 = tpu.concatenate %310, %91 in 0 : vector<32x64xf32>, vector<16x64xf32> -> vector<48x64xf32>
    %c0_120 = arith.constant 0 : index
    %c0_121 = arith.constant 0 : index
    %312 = vector.load %arg29[%c0_120, %c0_121] : memref<9x64xf32, #tpu.memory_space<vmem>>, vector<9x64xf32>
    %c9_i32_122 = arith.constant 9 : i32
    %313 = tpu.dynamic_rotate %311 by %c9_i32_122 dim 1 : vector<48x64xf32>, i32 -> vector<48x64xf32>
    %314 = vector.extract_strided_slice %312 {offsets = [0, 0], sizes = [1, 64], strides = [1, 1]} : vector<9x64xf32> to vector<1x64xf32>
    %315 = vector.broadcast %314 : vector<1x64xf32> to vector<48x64xf32>
    %316 = arith.mulf %313, %315 : vector<48x64xf32>
    %c8_i32_123 = arith.constant 8 : i32
    %317 = tpu.dynamic_rotate %311 by %c8_i32_123 dim 1 : vector<48x64xf32>, i32 -> vector<48x64xf32>
    %318 = vector.extract_strided_slice %312 {offsets = [1, 0], sizes = [1, 64], strides = [1, 1]} : vector<9x64xf32> to vector<1x64xf32>
    %319 = vector.broadcast %318 : vector<1x64xf32> to vector<48x64xf32>
    %320 = arith.mulf %317, %319 : vector<48x64xf32>
    %c7_i32_124 = arith.constant 7 : i32
    %321 = tpu.dynamic_rotate %311 by %c7_i32_124 dim 1 : vector<48x64xf32>, i32 -> vector<48x64xf32>
    %322 = vector.extract_strided_slice %312 {offsets = [2, 0], sizes = [1, 64], strides = [1, 1]} : vector<9x64xf32> to vector<1x64xf32>
    %323 = vector.broadcast %322 : vector<1x64xf32> to vector<48x64xf32>
    %324 = arith.mulf %321, %323 : vector<48x64xf32>
    %c1_i32_125 = arith.constant 1 : i32
    %325 = tpu.dynamic_rotate %311 by %c1_i32_125 dim 1 : vector<48x64xf32>, i32 -> vector<48x64xf32>
    %326 = vector.extract_strided_slice %312 {offsets = [3, 0], sizes = [1, 64], strides = [1, 1]} : vector<9x64xf32> to vector<1x64xf32>
    %327 = vector.broadcast %326 : vector<1x64xf32> to vector<48x64xf32>
    %328 = arith.mulf %325, %327 : vector<48x64xf32>
    %c63_i32_126 = arith.constant 63 : i32
    %329 = tpu.dynamic_rotate %311 by %c63_i32_126 dim 1 : vector<48x64xf32>, i32 -> vector<48x64xf32>
    %330 = vector.extract_strided_slice %312 {offsets = [5, 0], sizes = [1, 64], strides = [1, 1]} : vector<9x64xf32> to vector<1x64xf32>
    %331 = vector.broadcast %330 : vector<1x64xf32> to vector<48x64xf32>
    %332 = arith.mulf %329, %331 : vector<48x64xf32>
    %c57_i32_127 = arith.constant 57 : i32
    %333 = tpu.dynamic_rotate %311 by %c57_i32_127 dim 1 : vector<48x64xf32>, i32 -> vector<48x64xf32>
    %334 = vector.extract_strided_slice %312 {offsets = [6, 0], sizes = [1, 64], strides = [1, 1]} : vector<9x64xf32> to vector<1x64xf32>
    %335 = vector.broadcast %334 : vector<1x64xf32> to vector<48x64xf32>
    %336 = arith.mulf %333, %335 : vector<48x64xf32>
    %c56_i32_128 = arith.constant 56 : i32
    %337 = tpu.dynamic_rotate %311 by %c56_i32_128 dim 1 : vector<48x64xf32>, i32 -> vector<48x64xf32>
    %338 = vector.extract_strided_slice %312 {offsets = [7, 0], sizes = [1, 64], strides = [1, 1]} : vector<9x64xf32> to vector<1x64xf32>
    %339 = vector.broadcast %338 : vector<1x64xf32> to vector<48x64xf32>
    %340 = arith.mulf %337, %339 : vector<48x64xf32>
    %c55_i32_129 = arith.constant 55 : i32
    %341 = tpu.dynamic_rotate %311 by %c55_i32_129 dim 1 : vector<48x64xf32>, i32 -> vector<48x64xf32>
    %342 = vector.extract_strided_slice %312 {offsets = [8, 0], sizes = [1, 64], strides = [1, 1]} : vector<9x64xf32> to vector<1x64xf32>
    %343 = vector.broadcast %342 : vector<1x64xf32> to vector<48x64xf32>
    %344 = arith.mulf %341, %343 : vector<48x64xf32>
    %345 = tpu.concatenate %316, %320, %324, %328, %311, %332, %336, %340, %344 in 0 : vector<48x64xf32>, vector<48x64xf32>, vector<48x64xf32>, vector<48x64xf32>, vector<48x64xf32>, vector<48x64xf32>, vector<48x64xf32>, vector<48x64xf32>, vector<48x64xf32> -> vector<432x64xf32>
    %c0_130 = arith.constant 0 : index
    %c0_131 = arith.constant 0 : index
    %346 = vector.load %arg22[%c0_130, %c0_131] : memref<16x432xf32, #tpu.memory_space<vmem>>, vector<16x432xf32>
    %cst_132 = arith.constant dense<0.000000e+00> : vector<16x64xf32>
    %347 = tpu.matmul %346, %345, %cst_132 {dimension_numbers = #tpu.dot_dimension_numbers<[1], [0], [0], [1], [0, 0, 1, 1], [], []>} : vector<16x432xf32>, vector<432x64xf32>, vector<16x64xf32> -> vector<16x64xf32>
    %c0_133 = arith.constant 0 : index
    %c0_134 = arith.constant 0 : index
    %348 = vector.load %arg23[%c0_133, %c0_134] : memref<16x1xf32, #tpu.memory_space<vmem>>, vector<16x1xf32>
    %349 = vector.broadcast %348 : vector<16x1xf32> to vector<16x64xf32>
    %350 = arith.addf %347, %349 : vector<16x64xf32>
    %cst_135 = arith.constant 0.000000e+00 : f32
    %351 = vector.broadcast %cst_135 : f32 to vector<16x64xf32>
    %352 = arith.maximumf %350, %351 : vector<16x64xf32>
    %c0_136 = arith.constant 0 : index
    %c0_137 = arith.constant 0 : index
    %353 = vector.load %arg36[%c0_136, %c0_137] : memref<64x256xf32, #tpu.memory_space<vmem>>, vector<64x256xf32>
    %cst_138 = arith.constant dense<0.000000e+00> : vector<16x256xf32>
    %354 = tpu.matmul %352, %353, %cst_138 {dimension_numbers = #tpu.dot_dimension_numbers<[1], [0], [0], [1], [0, 0, 1, 1], [], []>} : vector<16x64xf32>, vector<64x256xf32>, vector<16x256xf32> -> vector<16x256xf32>
    %355 = tpu.concatenate %354, %42 in 0 : vector<16x256xf32>, vector<8x256xf32> -> vector<24x256xf32>
    %c0_139 = arith.constant 0 : index
    %c0_140 = arith.constant 0 : index
    %356 = vector.load %arg28[%c0_139, %c0_140] : memref<9x256xf32, #tpu.memory_space<vmem>>, vector<9x256xf32>
    %c17_i32_141 = arith.constant 17 : i32
    %357 = tpu.dynamic_rotate %355 by %c17_i32_141 dim 1 : vector<24x256xf32>, i32 -> vector<24x256xf32>
    %358 = vector.extract_strided_slice %356 {offsets = [0, 0], sizes = [1, 256], strides = [1, 1]} : vector<9x256xf32> to vector<1x256xf32>
    %359 = vector.broadcast %358 : vector<1x256xf32> to vector<24x256xf32>
    %360 = arith.mulf %357, %359 : vector<24x256xf32>
    %c16_i32_142 = arith.constant 16 : i32
    %361 = tpu.dynamic_rotate %355 by %c16_i32_142 dim 1 : vector<24x256xf32>, i32 -> vector<24x256xf32>
    %362 = vector.extract_strided_slice %356 {offsets = [1, 0], sizes = [1, 256], strides = [1, 1]} : vector<9x256xf32> to vector<1x256xf32>
    %363 = vector.broadcast %362 : vector<1x256xf32> to vector<24x256xf32>
    %364 = arith.mulf %361, %363 : vector<24x256xf32>
    %c15_i32_143 = arith.constant 15 : i32
    %365 = tpu.dynamic_rotate %355 by %c15_i32_143 dim 1 : vector<24x256xf32>, i32 -> vector<24x256xf32>
    %366 = vector.extract_strided_slice %356 {offsets = [2, 0], sizes = [1, 256], strides = [1, 1]} : vector<9x256xf32> to vector<1x256xf32>
    %367 = vector.broadcast %366 : vector<1x256xf32> to vector<24x256xf32>
    %368 = arith.mulf %365, %367 : vector<24x256xf32>
    %c1_i32_144 = arith.constant 1 : i32
    %369 = tpu.dynamic_rotate %355 by %c1_i32_144 dim 1 : vector<24x256xf32>, i32 -> vector<24x256xf32>
    %370 = vector.extract_strided_slice %356 {offsets = [3, 0], sizes = [1, 256], strides = [1, 1]} : vector<9x256xf32> to vector<1x256xf32>
    %371 = vector.broadcast %370 : vector<1x256xf32> to vector<24x256xf32>
    %372 = arith.mulf %369, %371 : vector<24x256xf32>
    %c255_i32_145 = arith.constant 255 : i32
    %373 = tpu.dynamic_rotate %355 by %c255_i32_145 dim 1 : vector<24x256xf32>, i32 -> vector<24x256xf32>
    %374 = vector.extract_strided_slice %356 {offsets = [5, 0], sizes = [1, 256], strides = [1, 1]} : vector<9x256xf32> to vector<1x256xf32>
    %375 = vector.broadcast %374 : vector<1x256xf32> to vector<24x256xf32>
    %376 = arith.mulf %373, %375 : vector<24x256xf32>
    %c241_i32_146 = arith.constant 241 : i32
    %377 = tpu.dynamic_rotate %355 by %c241_i32_146 dim 1 : vector<24x256xf32>, i32 -> vector<24x256xf32>
    %378 = vector.extract_strided_slice %356 {offsets = [6, 0], sizes = [1, 256], strides = [1, 1]} : vector<9x256xf32> to vector<1x256xf32>
    %379 = vector.broadcast %378 : vector<1x256xf32> to vector<24x256xf32>
    %380 = arith.mulf %377, %379 : vector<24x256xf32>
    %c240_i32_147 = arith.constant 240 : i32
    %381 = tpu.dynamic_rotate %355 by %c240_i32_147 dim 1 : vector<24x256xf32>, i32 -> vector<24x256xf32>
    %382 = vector.extract_strided_slice %356 {offsets = [7, 0], sizes = [1, 256], strides = [1, 1]} : vector<9x256xf32> to vector<1x256xf32>
    %383 = vector.broadcast %382 : vector<1x256xf32> to vector<24x256xf32>
    %384 = arith.mulf %381, %383 : vector<24x256xf32>
    %c239_i32_148 = arith.constant 239 : i32
    %385 = tpu.dynamic_rotate %355 by %c239_i32_148 dim 1 : vector<24x256xf32>, i32 -> vector<24x256xf32>
    %386 = vector.extract_strided_slice %356 {offsets = [8, 0], sizes = [1, 256], strides = [1, 1]} : vector<9x256xf32> to vector<1x256xf32>
    %387 = vector.broadcast %386 : vector<1x256xf32> to vector<24x256xf32>
    %388 = arith.mulf %385, %387 : vector<24x256xf32>
    %389 = tpu.concatenate %360, %364, %368, %372, %355, %376, %380, %384, %388 in 0 : vector<24x256xf32>, vector<24x256xf32>, vector<24x256xf32>, vector<24x256xf32>, vector<24x256xf32>, vector<24x256xf32>, vector<24x256xf32>, vector<24x256xf32>, vector<24x256xf32> -> vector<216x256xf32>
    %c0_149 = arith.constant 0 : index
    %c0_150 = arith.constant 0 : index
    %390 = vector.load %arg24[%c0_149, %c0_150] : memref<8x216xf32, #tpu.memory_space<vmem>>, vector<8x216xf32>
    %cst_151 = arith.constant dense<0.000000e+00> : vector<8x256xf32>
    %391 = tpu.matmul %390, %389, %cst_151 {dimension_numbers = #tpu.dot_dimension_numbers<[1], [0], [0], [1], [0, 0, 1, 1], [], []>} : vector<8x216xf32>, vector<216x256xf32>, vector<8x256xf32> -> vector<8x256xf32>
    %c0_152 = arith.constant 0 : index
    %c0_153 = arith.constant 0 : index
    %392 = vector.load %arg25[%c0_152, %c0_153] : memref<8x1xf32, #tpu.memory_space<vmem>>, vector<8x1xf32>
    %393 = vector.broadcast %392 : vector<8x1xf32> to vector<8x256xf32>
    %394 = arith.addf %391, %393 : vector<8x256xf32>
    %cst_154 = arith.constant 0.000000e+00 : f32
    %395 = vector.broadcast %cst_154 : f32 to vector<8x256xf32>
    %396 = arith.maximumf %394, %395 : vector<8x256xf32>
    %c0_155 = arith.constant 0 : index
    %c0_156 = arith.constant 0 : index
    %397 = vector.load %arg26[%c0_155, %c0_156] : memref<3x8xf32, #tpu.memory_space<vmem>>, vector<3x8xf32>
    %cst_157 = arith.constant dense<0.000000e+00> : vector<3x256xf32>
    %398 = tpu.matmul %397, %396, %cst_157 {dimension_numbers = #tpu.dot_dimension_numbers<[1], [0], [0], [1], [0, 0, 1, 1], [], []>} : vector<3x8xf32>, vector<8x256xf32>, vector<3x256xf32> -> vector<3x256xf32>
    %c0_158 = arith.constant 0 : index
    %c0_159 = arith.constant 0 : index
    %399 = vector.load %arg27[%c0_158, %c0_159] : memref<3x1xf32, #tpu.memory_space<vmem>>, vector<3x1xf32>
    %400 = vector.broadcast %399 : vector<3x1xf32> to vector<3x256xf32>
    %401 = arith.addf %398, %400 : vector<3x256xf32>
    %c0_160 = arith.constant 0 : index
    %c0_161 = arith.constant 0 : index
    %c0_162 = arith.constant 0 : index
    %402 = vector.load %arg37[%c0_160, %c0_161, %c0_162] : memref<1x3x256xf32, #tpu.memory_space<vmem>>, vector<1x3x256xf32>
    %403 = vector.shape_cast %402 : vector<1x3x256xf32> to vector<3x256xf32>
    %404 = vector.shape_cast %401 : vector<3x256xf32> to vector<1x3x256xf32>
    tpu.vector_store %arg37[%c0_160, %c0_161, %c0_162], %404 {strides = array<i32>} : memref<1x3x256xf32, #tpu.memory_space<vmem>>, vector<1x3x256xf32>,
    return
  }
  func.func @transform_0(%arg0: i32) -> (i32, i32, i32) {
    %c0_i32 = arith.constant 0 : i32
    %c0_i32_0 = arith.constant 0 : i32
    %c0_i32_1 = arith.constant 0 : i32
    return %arg0, %c0_i32, %c0_i32_0 : i32, i32, i32
  }
  func.func @transform_1(%arg0: i32) -> (i32, i32) {
    %c0_i32 = arith.constant 0 : i32
    %c0_i32_0 = arith.constant 0 : i32
    %c0_i32_1 = arith.constant 0 : i32
    return %c0_i32, %c0_i32_0 : i32, i32
  }
  func.func @transform_2(%arg0: i32) -> (i32, i32) {
    %c0_i32 = arith.constant 0 : i32
    %c0_i32_0 = arith.constant 0 : i32
    %c0_i32_1 = arith.constant 0 : i32
    return %c0_i32, %c0_i32_0 : i32, i32
  }
  func.func @transform_3(%arg0: i32) -> (i32, i32) {
    %c0_i32 = arith.constant 0 : i32
    %c0_i32_0 = arith.constant 0 : i32
    %c0_i32_1 = arith.constant 0 : i32
    return %c0_i32, %c0_i32_0 : i32, i32
  }
  func.func @transform_4(%arg0: i32) -> (i32, i32) {
    %c0_i32 = arith.constant 0 : i32
    %c0_i32_0 = arith.constant 0 : i32
    %c0_i32_1 = arith.constant 0 : i32
    return %c0_i32, %c0_i32_0 : i32, i32
  }
  func.func @transform_5(%arg0: i32) -> (i32, i32) {
    %c0_i32 = arith.constant 0 : i32
    %c0_i32_0 = arith.constant 0 : i32
    %c0_i32_1 = arith.constant 0 : i32
    return %c0_i32, %c0_i32_0 : i32, i32
  }
  func.func @transform_6(%arg0: i32) -> (i32, i32) {
    %c0_i32 = arith.constant 0 : i32
    %c0_i32_0 = arith.constant 0 : i32
    %c0_i32_1 = arith.constant 0 : i32
    return %c0_i32, %c0_i32_0 : i32, i32
  }
  func.func @transform_7(%arg0: i32) -> (i32, i32) {
    %c0_i32 = arith.constant 0 : i32
    %c0_i32_0 = arith.constant 0 : i32
    %c0_i32_1 = arith.constant 0 : i32
    return %c0_i32, %c0_i32_0 : i32, i32
  }
  func.func @transform_8(%arg0: i32) -> (i32, i32) {
    %c0_i32 = arith.constant 0 : i32
    %c0_i32_0 = arith.constant 0 : i32
    %c0_i32_1 = arith.constant 0 : i32
    return %c0_i32, %c0_i32_0 : i32, i32
  }
  func.func @transform_9(%arg0: i32) -> (i32, i32) {
    %c0_i32 = arith.constant 0 : i32
    %c0_i32_0 = arith.constant 0 : i32
    %c0_i32_1 = arith.constant 0 : i32
    return %c0_i32, %c0_i32_0 : i32, i32
  }
  func.func @transform_10(%arg0: i32) -> (i32, i32) {
    %c0_i32 = arith.constant 0 : i32
    %c0_i32_0 = arith.constant 0 : i32
    %c0_i32_1 = arith.constant 0 : i32
    return %c0_i32, %c0_i32_0 : i32, i32
  }
  func.func @transform_11(%arg0: i32) -> (i32, i32) {
    %c0_i32 = arith.constant 0 : i32
    %c0_i32_0 = arith.constant 0 : i32
    %c0_i32_1 = arith.constant 0 : i32
    return %c0_i32, %c0_i32_0 : i32, i32
  }
  func.func @transform_12(%arg0: i32) -> (i32, i32) {
    %c0_i32 = arith.constant 0 : i32
    %c0_i32_0 = arith.constant 0 : i32
    %c0_i32_1 = arith.constant 0 : i32
    return %c0_i32, %c0_i32_0 : i32, i32
  }
  func.func @transform_13(%arg0: i32) -> (i32, i32) {
    %c0_i32 = arith.constant 0 : i32
    %c0_i32_0 = arith.constant 0 : i32
    %c0_i32_1 = arith.constant 0 : i32
    return %c0_i32, %c0_i32_0 : i32, i32
  }
  func.func @transform_14(%arg0: i32) -> (i32, i32) {
    %c0_i32 = arith.constant 0 : i32
    %c0_i32_0 = arith.constant 0 : i32
    %c0_i32_1 = arith.constant 0 : i32
    return %c0_i32, %c0_i32_0 : i32, i32
  }
  func.func @transform_15(%arg0: i32) -> (i32, i32) {
    %c0_i32 = arith.constant 0 : i32
    %c0_i32_0 = arith.constant 0 : i32
    %c0_i32_1 = arith.constant 0 : i32
    return %c0_i32, %c0_i32_0 : i32, i32
  }
  func.func @transform_16(%arg0: i32) -> (i32, i32) {
    %c0_i32 = arith.constant 0 : i32
    %c0_i32_0 = arith.constant 0 : i32
    %c0_i32_1 = arith.constant 0 : i32
    return %c0_i32, %c0_i32_0 : i32, i32
  }
  func.func @transform_17(%arg0: i32) -> (i32, i32) {
    %c0_i32 = arith.constant 0 : i32
    %c0_i32_0 = arith.constant 0 : i32
    %c0_i32_1 = arith.constant 0 : i32
    return %c0_i32, %c0_i32_0 : i32, i32
  }
  func.func @transform_18(%arg0: i32) -> (i32, i32) {
    %c0_i32 = arith.constant 0 : i32
    %c0_i32_0 = arith.constant 0 : i32
    %c0_i32_1 = arith.constant 0 : i32
    return %c0_i32, %c0_i32_0 : i32, i32
  }
  func.func @transform_19(%arg0: i32) -> (i32, i32) {
    %c0_i32 = arith.constant 0 : i32
    %c0_i32_0 = arith.constant 0 : i32
    %c0_i32_1 = arith.constant 0 : i32
    return %c0_i32, %c0_i32_0 : i32, i32
  }
  func.func @transform_20(%arg0: i32) -> (i32, i32) {
    %c0_i32 = arith.constant 0 : i32
    %c0_i32_0 = arith.constant 0 : i32
    %c0_i32_1 = arith.constant 0 : i32
    return %c0_i32, %c0_i32_0 : i32, i32
  }
  func.func @transform_21(%arg0: i32) -> (i32, i32) {
    %c0_i32 = arith.constant 0 : i32
    %c0_i32_0 = arith.constant 0 : i32
    %c0_i32_1 = arith.constant 0 : i32
    return %c0_i32, %c0_i32_0 : i32, i32
  }
  func.func @transform_22(%arg0: i32) -> (i32, i32) {
    %c0_i32 = arith.constant 0 : i32
    %c0_i32_0 = arith.constant 0 : i32
    %c0_i32_1 = arith.constant 0 : i32
    return %c0_i32, %c0_i32_0 : i32, i32
  }
  func.func @transform_23(%arg0: i32) -> (i32, i32) {
    %c0_i32 = arith.constant 0 : i32
    %c0_i32_0 = arith.constant 0 : i32
    %c0_i32_1 = arith.constant 0 : i32
    return %c0_i32, %c0_i32_0 : i32, i32
  }
  func.func @transform_24(%arg0: i32) -> (i32, i32) {
    %c0_i32 = arith.constant 0 : i32
    %c0_i32_0 = arith.constant 0 : i32
    %c0_i32_1 = arith.constant 0 : i32
    return %c0_i32, %c0_i32_0 : i32, i32
  }
  func.func @transform_25(%arg0: i32) -> (i32, i32) {
    %c0_i32 = arith.constant 0 : i32
    %c0_i32_0 = arith.constant 0 : i32
    %c0_i32_1 = arith.constant 0 : i32
    return %c0_i32, %c0_i32_0 : i32, i32
  }
  func.func @transform_26(%arg0: i32) -> (i32, i32) {
    %c0_i32 = arith.constant 0 : i32
    %c0_i32_0 = arith.constant 0 : i32
    %c0_i32_1 = arith.constant 0 : i32
    return %c0_i32, %c0_i32_0 : i32, i32
  }
  func.func @transform_27(%arg0: i32) -> (i32, i32) {
    %c0_i32 = arith.constant 0 : i32
    %c0_i32_0 = arith.constant 0 : i32
    %c0_i32_1 = arith.constant 0 : i32
    return %c0_i32, %c0_i32_0 : i32, i32
  }
  func.func @transform_28(%arg0: i32) -> (i32, i32) {
    %c0_i32 = arith.constant 0 : i32
    %c0_i32_0 = arith.constant 0 : i32
    %c0_i32_1 = arith.constant 0 : i32
    return %c0_i32, %c0_i32_0 : i32, i32
  }
  func.func @transform_29(%arg0: i32) -> (i32, i32) {
    %c0_i32 = arith.constant 0 : i32
    %c0_i32_0 = arith.constant 0 : i32
    %c0_i32_1 = arith.constant 0 : i32
    return %c0_i32, %c0_i32_0 : i32, i32
  }
  func.func @transform_30(%arg0: i32) -> (i32, i32) {
    %c0_i32 = arith.constant 0 : i32
    %c0_i32_0 = arith.constant 0 : i32
    %c0_i32_1 = arith.constant 0 : i32
    return %c0_i32, %c0_i32_0 : i32, i32
  }
  func.func @transform_31(%arg0: i32) -> (i32, i32) {
    %c0_i32 = arith.constant 0 : i32
    %c0_i32_0 = arith.constant 0 : i32
    %c0_i32_1 = arith.constant 0 : i32
    return %c0_i32, %c0_i32_0 : i32, i32
  }
  func.func @transform_32(%arg0: i32) -> (i32, i32) {
    %c0_i32 = arith.constant 0 : i32
    %c0_i32_0 = arith.constant 0 : i32
    %c0_i32_1 = arith.constant 0 : i32
    return %c0_i32, %c0_i32_0 : i32, i32
  }
  func.func @transform_33(%arg0: i32) -> (i32, i32) {
    %c0_i32 = arith.constant 0 : i32
    %c0_i32_0 = arith.constant 0 : i32
    %c0_i32_1 = arith.constant 0 : i32
    return %c0_i32, %c0_i32_0 : i32, i32
  }
  func.func @transform_34(%arg0: i32) -> (i32, i32) {
    %c0_i32 = arith.constant 0 : i32
    %c0_i32_0 = arith.constant 0 : i32
    %c0_i32_1 = arith.constant 0 : i32
    return %c0_i32, %c0_i32_0 : i32, i32
  }
  func.func @transform_35(%arg0: i32) -> (i32, i32) {
    %c0_i32 = arith.constant 0 : i32
    %c0_i32_0 = arith.constant 0 : i32
    %c0_i32_1 = arith.constant 0 : i32
    return %c0_i32, %c0_i32_0 : i32, i32
  }
  func.func @transform_36(%arg0: i32) -> (i32, i32, i32) {
    %c0_i32 = arith.constant 0 : i32
    %c0_i32_0 = arith.constant 0 : i32
    %c0_i32_1 = arith.constant 0 : i32
    return %arg0, %c0_i32, %c0_i32_0 : i32, i32, i32
  }
}

</mosaic_0001>

<bundles_post_ra>
// kernel: unet_transformer_forward.1
= control target key start
LH: loop header
LB: loop body
LE: loop exit
PB: predicated region body
PF: predicated region fallthrough
CT: control target
= control target key end

     0   :  { %s5802_s6 = smov 1   ;;  %s5803_s10 = smov 2   ;;  %s7886_s0 = inlined_call_operand.smem [shape: u32[37], index: -1, kind: input, shape index: {}] }
   0x1   :  { %s5886_s5 = sld [smem:[%s7886_s0]]   ;;  %s5804_s14 = smov 3  }
   0x2   :  { %s5891_s9 = sld [smem:[%s7886_s0 + %s5802_s6]]   ;;  %s5805_s18 = smov 4  }
   0x3   :  { %s5896_s13 = sld [smem:[%s7886_s0 + %s5803_s10]]   ;;  %s5806_s22 = smov 5  }
   0x4   :  { %s5901_s17 = sld [smem:[%s7886_s0 + %s5804_s14]]   ;;  %s5807_s26 = smov 6  }
   0x5   :  { %s5906_s21 = sld [smem:[%s7886_s0 + %s5805_s18]]   ;;  %s5808_s30 = smov 7  }
   0x6   :  { %s5911_s25 = sld [smem:[%s7886_s0 + %s5806_s22]]   ;;  %s5809_s4 = smov 8  }
   0x7   :  { %8058 = sst [smem:[#allocation5_spill]] %s5886_s5  ;;  %s5810_s10 = smov 9  }
   0x8   :  { %8059 = sst [smem:[#allocation6_spill]] %s5891_s9  ;;  %s5811_s15 = smov 10  }
   0x9   :  { %s5916_s29 = sld [smem:[%s7886_s0 + %s5807_s26]]   ;;  %s5812_s20 = smov 11  }
   0xa   :  { %s5921_s3 = sld [smem:[%s7886_s0 + %s5808_s30]]   ;;  %s5813_s26 = smov 12  }
   0xb   :  { %s5926_s8 = sld [smem:[%s7886_s0 + %s5809_s4]]   ;;  %s5814_s1 = smov 13  }
   0xc   :  { %s5931_s14 = sld [smem:[%s7886_s0 + %s5810_s10]]   ;;  %s5815_s7 = smov 14  }
   0xd   :  { %s5936_s19 = sld [smem:[%s7886_s0 + %s5811_s15]]   ;;  %s5816_s15 = smov 15  }
   0xe   :  { %s5941_s24 = sld [smem:[%s7886_s0 + %s5812_s20]]   ;;  %s5817_s22 = smov 16  }
   0xf   :  { %s5946_s30 = sld [smem:[%s7886_s0 + %s5813_s26]]   ;;  %s5818_s28 = smov 17  }
  0x10   :  { %8060 = sst [smem:[#allocation7_spill]] %s5921_s3 }
  0x11   :  { %8061 = sst [smem:[#allocation8_spill]] %s5926_s8 }
  0x12   :  { %8062 = sst [smem:[#allocation9_spill]] %s5931_s14 }
  0x13   :  { %8063 = sst [smem:[#allocation10_spill]] %s5936_s19 }
  0x14   :  { %8064 = sst [smem:[#allocation11_spill]] %s5941_s24 }
  0x15   :  { %8065 = sst [smem:[#allocation12_spill]] %s5946_s30 }
  0x16   :  { %s5951_s6 = sld [smem:[%s7886_s0 + %s5814_s1]]  }
  0x17   :  { %s5956_s12 = sld [smem:[%s7886_s0 + %s5815_s7]]   ;;  %s5819_s7 = smov 18  }
  0x18   :  { %s5961_s20 = sld [smem:[%s7886_s0 + %s5816_s15]]   ;;  %s5820_s15 = smov 19  }
  0x19   :  { %s5966_s27 = sld [smem:[%s7886_s0 + %s5817_s22]]   ;;  %s5821_s22 = smov 20  }
  0x1a   :  { %s5971_s4 = sld [smem:[%s7886_s0 + %s5818_s28]]   ;;  %s5822_s28 = smov 21  }
  0x1c   :  { %8066 = sst [smem:[#allocation13_spill]] %s5951_s6 }
  0x1d   :  { %8067 = sst [smem:[#allocation14_spill]] %s5956_s12 }
  0x1e   :  { %8068 = sst [smem:[#allocation15_spill]] %s5961_s20 }
  0x1f   :  { %8069 = sst [smem:[#allocation16_spill]] %s5966_s27 }
  0x20   :  { %8070 = sst [smem:[#allocation17_spill]] %s5971_s4 }
  0x21   :  { %s5976_s6 = sld [smem:[%s7886_s0 + %s5819_s7]]   ;;  %s5823_s7 = smov 22  }
  0x22   :  { %s5981_s20 = sld [smem:[%s7886_s0 + %s5820_s15]]   ;;  %s5824_s15 = smov 23  }
  0x23   :  { %s5986_s12 = sld [smem:[%s7886_s0 + %s5821_s22]]   ;;  %s5825_s22 = smov 24  }
  0x24   :  { %s5991_s4 = sld [smem:[%s7886_s0 + %s5822_s28]]   ;;  %s5826_s28 = smov 25  }
  0x25   :  { %s5996_s19 = sld [smem:[%s7886_s0 + %s5823_s7]]   ;;  %s5827_s7 = smov 26  }
  0x27   :  { %8071 = sst [smem:[#allocation18_spill]] %s5976_s6 }
  0x28   :  { %8072 = sst [smem:[#allocation19_spill]] %s5981_s20 }
  0x29   :  { %8073 = sst [smem:[#allocation20_spill]] %s5986_s12 }
  0x2a   :  { %8074 = sst [smem:[#allocation21_spill]] %s5991_s4 }
  0x2b   :  { %8075 = sst [smem:[#allocation22_spill]] %s5996_s19 }
  0x2c   :  { %s6001_s20 = sld [smem:[%s7886_s0 + %s5824_s15]]   ;;  %s5828_s15 = smov 27  }
  0x2d   :  { %s6006_s12 = sld [smem:[%s7886_s0 + %s5825_s22]]   ;;  %s5829_s22 = smov 28  }
  0x2e   :  { %s6011_s4 = sld [smem:[%s7886_s0 + %s5826_s28]]   ;;  %s5830_s28 = smov 29  }
  0x2f   :  { %s6016_s19 = sld [smem:[%s7886_s0 + %s5827_s7]]   ;;  %s5831_s7 = smov 30  }
  0x32   :  { %8076 = sst [smem:[#allocation23_spill]] %s6001_s20 }
  0x33   :  { %8077 = sst [smem:[#allocation24_spill]] %s6006_s12 }
  0x34   :  { %8078 = sst [smem:[#allocation25_spill]] %s6011_s4 }
  0x35   :  { %8079 = sst [smem:[#allocation26_spill]] %s6016_s19 }
  0x36   :  { %s6021_s20 = sld [smem:[%s7886_s0 + %s5828_s15]]   ;;  %s5832_s15 = smov 31  }
  0x37   :  { %s6026_s12 = sld [smem:[%s7886_s0 + %s5829_s22]]   ;;  %s5833_s22 = smov 32  }
  0x38   :  { %s6031_s4 = sld [smem:[%s7886_s0 + %s5830_s28]]   ;;  %s5834_s28 = smov 33  }
  0x39   :  { %s6036_s19 = sld [smem:[%s7886_s0 + %s5831_s7]]   ;;  %s5835_s7 = smov 34  }
  0x3a   :  { %s6041_s6 = sld [smem:[%s7886_s0 + %s5832_s15]]   ;;  %s5836_s15 = smov 35  }
  0x3b   :  { %s6046_s27 = sld [smem:[%s7886_s0 + %s5833_s22]]   ;;  %s5837_s22 = smov 36  }
  0x3c   :  { %s6051_s14 = sld [smem:[%s7886_s0 + %s5834_s28]]  }
  0x3d   :  { %s6056_s24 = sld [smem:[%s7886_s0 + %s5835_s7]]  }
  0x3e   :  { %8080 = sst [smem:[#allocation27_spill]] %s6031_s4 }
  0x3f   :  { %s6061_s30 = sld [smem:[%s7886_s0 + %s5836_s15]]  }
  0x40   :  { %8081 = sst [smem:[#allocation28_spill]] %s6041_s6 }
  0x41   :  { %8082 = sst [smem:[#allocation29_spill]] %s6046_s27 }
  0x42   :  { %s6066_s27 = sld [smem:[%s7886_s0 + %s5837_s22]]  }
  0x43   :  { %78 = vsyncpa [#allocation3], 0  ;;  %s6068_s28 = smov 0  }
  0x44 LB: > { %s8083_s8 = sld [smem:[#allocation8_spill]]  ;;  %s974_s1 = sshll.u32 %s6036_s19, 4  ;;  %s5800_s28 = sphi %s6068_s28, %s84_s28   ;;  %s975_s1 = int_to_ptr.hbm [resolvable:$true] %s974_s1 }
  0x45   : > { %s8084_s6 = sld [smem:[#allocation28_spill]]  ;;  %s6075_s2 = sadd.s32 4294967295, %s5800_s28  }
  0x46   : > { %s8085_s4 = sld [smem:[#allocation27_spill]]  ;;  %p4837_p0 = scmp.ge.s32.totalorder %s5800_s28, 1 }
  0x47   : > { %s8086_s3 = sld [smem:[#allocation7_spill]]  ;;  %p876_p1 = scmp.lt.s32.totalorder %s5800_s28, 3 }
  0x48   : > { %p4933_p2 = scmp.eq.s32.totalorder %s6075_s2, 0  ;;  %s5838_s7 = smov [#allocation2]  }
  0x49   : > { %p6080_p3 = pnand %p4837_p0, %p876_p1  ;;  %s976_s10 = sshll.u32 %s5838_s7, 4  ;;  %s977_s10 = int_to_ptr.vmem [resolvable:$true] %s976_s10 }
  0x4a   : > { %s5760_s15 = sshra.s32 %s975_s1, 4  ;;  %s5767_s18 = scalar_lea.hbm %s6036_s19, 256  ;;  %s5761_s15 = int_to_ptr.hbm [resolvable:$true] %s5760_s15 }
  0x4b   : > { %p4929_p4 = pneg %p6080_p3  ;;  %s5762_s16 = scalar_lea.hbm %s5761_s15, 256 }
  0x4c   : > { %p5763_p6 = scmp.ne.s32.totalorder %s5761_s15, %s5762_s16  ;;  %p5768_p10 = scmp.lt.s32.totalorder %s5761_s15, %s6036_s19 }
  0x4d   : > { %p6088_p5 = pnand %p4933_p2, %p4929_p4  ;;  %p5769_p11 = scmp.lt.s32.totalorder %s5767_s18, %s5762_s16 }
  0x4f   : > { %p5764_p7 = pneg %p6088_p5  ;;  %p5770_p12 = por %p5769_p11, %p5768_p10 }
  0x51   : > { %p5765_p8 = pnand %p5764_p7, %p5763_p6 }
  0x53   : > { %p5766_p9 = pneg %p5765_p8 }
  0x55   : > { %p5771_p13 = pnand %p5770_p12, %p5766_p9 }
  0x57   : > { %5774 = shalt.err (!%p5771_p13)
}
  0x58   : > { %s5839_s22 = smov 128   ;;  %s5840_s23 = smov 8  }
  0x59   : > { %4932 = dma.hbm_to_vmem [thread:$0]  (!%p6088_p5), %s975_s1, 4096, %s977_s10, [#allocation3], %s5839_s22, %s5839_s22, %s5840_s23  }
  0x5a   : > { %1015 = sbr.rel (%p6080_p3) target bundleno = 6705 (0x1a31), region = 164 }
  0x5f   : > { %5795 = dma.done.wait (%p4933_p2), [#allocation3], 4096  }
  0x60   : > { %5797 = vsyncadd (%p4933_p2), [#allocation3], 4294963200  ;;  %s8089_s5 = sld [smem:[#allocation5_spill]]  ;;  %p1106_p0 = scmp.lt.s32.totalorder %s6075_s2, 1  ;;  %v1291_v26 = vld [vmem:[%s5896_s13] sm:$0xff]  ;;  %v1131_v27 = vlaneseq  ;;  %v5849_v28 = vmov 0  }
  0x61   : > { %s8042_s0 = smov 16   ;;  %s7932_s7 = smov 15   ;;  %5020 = vset.pattern.permute.xlu1 %v5849_v28  ;;  %5041 = vset.pattern.permute.xlu2 %v5849_v28  ;;  %v6139_v30 = vld [vmem:[%s6021_s20] sm:$0xff]  ;;  %v6142_v31 = vld [vmem:[%s6021_s20 + $0x8] sm:$0xff]  ;;  %v5723_v49 = vld [vmem:[%s6021_s20 + $0x10] ss:$0 sm:$0xff] }
  0x62   : > { %s8289_s2 = smov (!%p1106_p0, %s6075_s2), 1  ;;  %s7924_s10 = smov 1   ;;  %5127 = vset.pattern.permute.xlu0 %v5849_v28  ;;  %v6135_v29 = vand.u32 127, %v1131_v27  ;;  %v6146_v34 = vperm.slane %v6139_v30, 7  ;;  %v6149_v35 = vperm.slane %v6142_v31, 7  ;;  %v6156_v39 = vperm.slane %v6139_v30, 1 }
  0x63   : > { %s7903_s26 = sshll.u32 %s8289_s2, 3  ;;  %s8044_s11 = smov 127   ;;  %v6159_v40 = vperm.slane %v6142_v31, 1  ;;  %v6162_v41 = vperm.slane %v6139_v30, 5  ;;  %v6165_v42 = vperm.slane %v6142_v31, 5  ;;  %v6168_v43 = vperm.slane %v6139_v30, 3 }
  0x64   : > { %s7910_s15 = smov 113   ;;  %s7904_s16 = smov 112   ;;  %8090 = vst [vmem:[#allocation30_spill] sm:$0xff] %v6135_v29  ;;  %vm8040_vm0 = vcmp.lt.s32.totalorder %v6135_v29, 112  ;;  %vm1197_vm1 = vcmp.lt.s32.totalorder %v6135_v29, 127  ;;  %v6171_v44 = vperm.slane %v6142_v31, 3 }
  0x65   : > { %s7908_s18 = smov 17   ;;  %s7906_s22 = smov 111   ;;  %8091 = vst [vmem:[#allocation31_spill] sm:$0xff] %v6146_v34  ;;  %vm1181_vm2 = vcmp.lt.s32.totalorder %v6135_v29, 1  ;;  %vm1213_vm3 = vcmp.lt.s32.totalorder %v6135_v29, 113  ;;  %vm1149_vm4 = vcmp.lt.s32.totalorder %v6135_v29, 16 }
  0x66   : > { %s1110_s1 = scalar_lea.vmem %s8089_s5, %s7903_s26  ;;  %8092 = vst [vmem:[#allocation32_spill] sm:$0xff] %v6149_v35  ;;  %vm8041_vm5 = vcmp.lt.s32.totalorder %v6135_v29, 111  ;;  %v5724_v50 = vld [vmem:[%s6021_s20 + $0x18] ss:$0 sm:$0xff]  ;;  %v6186_v51 = vperm.slane %v6139_v30, 6  ;;  %v6189_v52 = vperm.slane %v6142_v31, 6 }
  0x67   : > { %v1116_v0 = vld [vmem:[%s1110_s1] sm:$0xff]  ;;  %8093 = vst [vmem:[#allocation33_spill] sm:$0xff] %v6156_v39  ;;  %vm8029_vm6 = vcmp.lt.s32.totalorder %v6135_v29, 17  ;;  %vm1281_vm7 = vcmask 1043456   ;;  %vm1165_vm8 = vcmp.lt.s32.totalorder %v6135_v29, 15  ;;  %s8105_s9 = sld [smem:[#allocation6_spill]] }
  0x68   : > { %1122 = vst [vmem:[#allocation1] ss:$2 sm:$0xff] %v1116_v0  ;;  %vm1297_vm9 = vcmask 293888   ;;  %s5850_s23 = smov 9   ;;  %s7947_s1 = smov 64   ;;  %vm1447_vm10 = vcmask 1048064  }
  0x69   : > { %8094 = vst [vmem:[#allocation34_spill] sm:$0xff] %v6159_v40  ;;  %s5852_s26 = smov 56   ;;  %vm1568_vm11 = vcmask 588800   ;;  %vm1646_vm12 = vcmask 523264   ;;  %vm1678_vm13 = vcmask 1047680   ;;  %vm1883_vm14 = vcmask 130048  }
  0x6a   : > { %8095 = vst [vmem:[#allocation35_spill] sm:$0xff] %v6162_v41  ;;  %vm2085_vm15 = vcmask 31744   ;;  %s8170_s5 = smov 126  }
  0x6b   : > { %8096 = vst [vmem:[#allocation36_spill] sm:$0xff] %v6165_v42 }
  0x6c   : > { %8097 = vst [vmem:[#allocation37_spill] sm:$0xff] %v6168_v43 }
  0x6d   : > { %8098 = vst [vmem:[#allocation38_spill] sm:$0xff] %v6171_v44 }
  0x6e   : > { %8099 = vst [vmem:[#allocation39_spill] sm:$0xff] %v6186_v51 }
  0x6f   : > { %v1123_v1 = vld.sshfl [vmem:[#allocation1] sm:$0xff pattern:$0x75316420]  ;;  %v1124_v2 = vld.sshfl [vmem:[#allocation1 + $0x8] sm:$0xff pattern:$0x75316420] }
  0x70   : > { %1140 = vst [vmem:[#allocation1] ss:$2 sm:$0xff] %v1116_v0 }
  0x71   : > { %8100 = vst [vmem:[#allocation40_spill] sm:$0xff] %v6189_v52 }
  0x77   : > { %v1141_v3 = vld.sshfl [vmem:[#allocation1] sm:$0xff pattern:$0x75316420]  ;;  %v1142_v4 = vld.sshfl [vmem:[#allocation1 + $0x8] sm:$0xff pattern:$0x75316420] }
  0x78   : > { %1156 = vst [vmem:[#allocation1] ss:$2 sm:$0xff] %v1116_v0  ;;  %1145 = vrot.lane.b32.xlu1 %v1141_v3, %s8042_s0  ;;  %1147 = vrot.lane.b32.xlu2 %v1142_v4, %s8042_s0 }
  0x7f   : > { %v1157_v5 = vld.sshfl [vmem:[#allocation1] sm:$0xff pattern:$0x75316420]  ;;  %v1158_v6 = vld.sshfl [vmem:[#allocation1 + $0x8] sm:$0xff pattern:$0x75316420] }
  0x80   : > { %1161 = vrot.lane.b32.xlu0 %v1157_v5, %s7932_s7  ;;  %1172 = vst [vmem:[#allocation1] ss:$2 sm:$0xff] %v1116_v0 }
  0x87   : > { %v1173_v7 = vld.sshfl [vmem:[#allocation1] sm:$0xff pattern:$0x75316420]  ;;  %v1174_v8 = vld.sshfl [vmem:[#allocation1 + $0x8] sm:$0xff pattern:$0x75316420] }
  0x88   : > { %1179 = vrot.lane.b32.xlu0 %v1174_v8, %s7924_s10  ;;  %1188 = vst [vmem:[#allocation1] ss:$2 sm:$0xff] %v1116_v0  ;;  %1177 = vrot.lane.b32.xlu2 %v1173_v7, %s7924_s10 }
  0x8f   : > { %v1189_v9 = vld.sshfl [vmem:[#allocation1] sm:$0xff pattern:$0x75316420]  ;;  %v1190_v10 = vld.sshfl [vmem:[#allocation1 + $0x8] sm:$0xff pattern:$0x75316420] }
  0x90   : > { %1204 = vst [vmem:[#allocation1] ss:$2 sm:$0xff] %v1116_v0  ;;  %1193 = vrot.lane.b32.xlu2 %v1189_v9, %s8044_s11 }
  0x97   : > { %v1205_v11 = vld.sshfl [vmem:[#allocation1] sm:$0xff pattern:$0x75316420]  ;;  %v1206_v12 = vld.sshfl [vmem:[#allocation1 + $0x8] sm:$0xff pattern:$0x75316420] }
  0x98   : > { %1209 = vrot.lane.b32.xlu0 %v1205_v11, %s7910_s15  ;;  %1211 = vrot.lane.b32.xlu1 %v1206_v12, %s7910_s15  ;;  %1220 = vst [vmem:[#allocation1] ss:$2 sm:$0xff] %v1116_v0  ;;  %s7942_s15 = smov 54  }
  0x99   : > { %1195 = vrot.lane.b32.xlu2 %v1190_v10, %s8044_s11 }
  0x9f   : > { %v1221_v13 = vld.sshfl [vmem:[#allocation1] sm:$0xff pattern:$0x75316420]  ;;  %v1222_v14 = vld.sshfl [vmem:[#allocation1 + $0x8] sm:$0xff pattern:$0x75316420] }
  0xa0   : > { %1225 = vrot.lane.b32.xlu0 %v1221_v13, %s7904_s16  ;;  %1236 = vst [vmem:[#allocation1] ss:$2 sm:$0xff] %v1116_v0 }
  0xa1   : > { %1127 = vrot.lane.b32.xlu2 %v1123_v1, %s7908_s18 }
  0xa7   : > { %v1237_v15 = vld.sshfl [vmem:[#allocation1] sm:$0xff pattern:$0x75316420]  ;;  %v1238_v16 = vld.sshfl [vmem:[#allocation1 + $0x8] sm:$0xff pattern:$0x75316420] }
  0xa8   : > { %1227 = vrot.lane.b32.xlu0 %v1222_v14, %s7904_s16  ;;  %1241 = vrot.lane.b32.xlu1 %v1237_v15, %s7906_s22  ;;  %1264 = vst [vmem:[#allocation1] ss:$2 sm:$0xff] %v1116_v0  ;;  %v6221_v14 = vperm.slane %v6139_v30, 0 }
  0xaa   : > { %8101 = vst [vmem:[#allocation41_spill] sm:$0xff] %v6221_v14 }
  0xaf   : > { %v1265_v11 = vld.sshfl [vmem:[#allocation1] sm:$0xff pattern:$0x75316420]  ;;  %v1266_v12 = vld.sshfl [vmem:[#allocation1 + $0x8] sm:$0xff pattern:$0x75316420] }
  0xb0   : > { %1129 = vrot.lane.b32.xlu0 %v1124_v2, %s7908_s18  ;;  %1243 = vrot.lane.b32.xlu1 %v1238_v16, %s7906_s22  ;;  %s5856_s18 = smov 57  }
  0xb8   : > { %1163 = vrot.lane.b32.xlu1 %v1158_v6, %s7932_s7 }
  0xc0   : > { %1294 = vperm.xlu1 %5020, %v1291_v26  }
  0xd2   : > { %v6130_v18 = vpop.permute.xlu2 %1147 }
  0xe2   : > { %v1178_v21 = vpop.permute.xlu2 %1177 }
  0xea   : > { %v6132_v20 = vpop.permute.xlu1 %1145  ;;  %v1194_v24 = vpop.permute.xlu2 %1193 }
  0xeb   : > { %v1150_v6 = vsel %vm1149_vm4, %v6132_v20, %v6130_v18  ;;  %v1151_v7 = vsel %vm1149_vm4, %v6130_v18, %v6132_v20  ;;  %v6226_v18 = vperm.slane %v6142_v31, 0  ;;  %v6233_v20 = vperm.slane %v6142_v31, 2 }
  0xec   : > { %v1155_v26 = vmul.f32 %v6159_v40, %v1150_v6  ;;  %v1383_v6 = vld [vmem:[#allocation2 + $0x50] sm:$0xff] }
  0xed   : > { %8102 = vst [vmem:[#allocation42_spill] sm:$0xff] %v6226_v18 }
  0xee   : > { %8104 = vst [vmem:[#allocation44_spill] sm:$0xff] %v6233_v20 }
  0xf2   : > { %v6128_v17 = vpop.permute.xlu0 %1161 }
  0xf3   : > { %v1196_v36 = vpop.permute.xlu2 %1195 }
  0xf4   : > { %v1198_v45 = vsel %vm1197_vm1, %v1194_v24, %v1196_v36  ;;  %v1199_v46 = vsel %vm1197_vm1, %v1196_v36, %v1194_v24 }
  0xf5   : > { %v1202_v53 = vmul.f32 %v6162_v41, %v1198_v45  ;;  %v1203_v54 = vmul.f32 %v6165_v42, %v1199_v46 }
  0xf7   : > { %v1271_v4 = vrot.slane %v1202_v53, 4  ;;  %v1272_v5 = vrot.slane %v1203_v54, 4 }
  0xf9   : > { %v1287_v24 = vsel %vm1281_vm7, %v1266_v12, %v1272_v5  ;;  %v1400_v5 = vld [vmem:[#allocation2 + $0xd8] sm:$0xff] }
  0xfa   : > { %v1180_v19 = vpop.permute.xlu0 %1179  ;;  %v1380_v12 = vld [vmem:[#allocation2 + $0x38] sm:$0xff] }
  0xfb   : > { %v1182_v55 = vsel %vm1181_vm2, %v1178_v21, %v1180_v19  ;;  %v1183_v56 = vsel %vm1181_vm2, %v1180_v19, %v1178_v21  ;;  %v1128_v9 = vpop.permute.xlu2 %1127  ;;  %v6230_v19 = vperm.slane %v6139_v30, 2 }
  0xfc   : > { %v1186_v8 = vmul.f32 %v6168_v43, %v1183_v56  ;;  %v1187_v13 = vmul.f32 %v6171_v44, %v1182_v55 }
  0xfd   : > { %8103 = vst [vmem:[#allocation43_spill] sm:$0xff] %v6230_v19 }
  0xfe   : > { %v1260_v31 = vrot.slane %v1186_v8, 4  ;;  %v1382_v8 = vld [vmem:[#allocation2 + $0x48] sm:$0xff] }
 0x10a   : > { %v1210_v22 = vpop.permute.xlu0 %1209  ;;  %v1212_v23 = vpop.permute.xlu1 %1211 }
 0x10b   : > { %v1214_v57 = vsel %vm1213_vm3, %v1210_v22, %v1212_v23  ;;  %v1215_v58 = vsel %vm1213_vm3, %v1212_v23, %v1210_v22  ;;  %v1286_v23 = vsel %vm1281_vm7, %v1265_v11, %v1271_v4  ;;  %v1384_v4 = vld [vmem:[#allocation2 + $0x58] sm:$0xff]  ;;  %v1397_v11 = vld [vmem:[#allocation2 + $0xc0] sm:$0xff] }
 0x10c   : > { %v1218_v2 = vmul.f32 %v6186_v51, %v1214_v57  ;;  %v1219_v3 = vmul.f32 %v6189_v52, %v1215_v58 }
 0x112   : > { %v1226_v25 = vpop.permute.xlu0 %1225 }
 0x11a   : > { %v1228_v32 = vpop.permute.xlu0 %1227  ;;  %v1242_v33 = vpop.permute.xlu1 %1241 }
 0x11b   : > { %v1230_v37 = vsel %vm8040_vm0, %v1226_v25, %v1228_v32  ;;  %v1231_v38 = vsel %vm8040_vm0, %v1228_v32, %v1226_v25  ;;  %v1154_v25 = vmul.f32 %v6156_v39, %v1151_v7  ;;  %v1261_v32 = vrot.slane %v1187_v13, 4  ;;  %v1399_v7 = vld [vmem:[#allocation2 + $0xd0] sm:$0xff]  ;;  %v1396_v13 = vld [vmem:[#allocation2 + $0xb8] sm:$0xff] }
 0x11c   : > { %v1234_v47 = vmul.f32 %v6146_v34, %v1230_v37  ;;  %v1235_v48 = vmul.f32 %v6149_v35, %v1231_v38 }
 0x11e   : > { %v1277_v62 = vrot.slane %v1234_v47, 4  ;;  %v1278_v63 = vrot.slane %v1235_v48, 4  ;;  %v1254_v47 = vrot.slane %v1154_v25, 4  ;;  %v1255_v48 = vrot.slane %v1155_v26, 4  ;;  %v1376_v25 = vld [vmem:[#allocation2 + $0x18] sm:$0xff] }
 0x11f   : > { %v1392_v26 = vld [vmem:[#allocation2 + $0x98] sm:$0xff] }
 0x120   : > { %v1288_v15 = vsel %vm1281_vm7, %v1218_v2, %v1277_v62  ;;  %v1289_v16 = vsel %vm1281_vm7, %v1219_v3, %v1278_v63  ;;  %v1387_v62 = vld [vmem:[#allocation2 + $0x70] sm:$0xff]  ;;  %v1385_v2 = vld [vmem:[#allocation2 + $0x60] sm:$0xff] }
 0x121   : > { %v1403_v63 = vld [vmem:[#allocation2 + $0xf0] sm:$0xff]  ;;  %v1401_v3 = vld [vmem:[#allocation2 + $0xe0] sm:$0xff] }
 0x122   : > { %v1244_v59 = vpop.permute.xlu1 %1243  ;;  %v1130_v10 = vpop.permute.xlu0 %1129 }
 0x123   : > { %v1246_v60 = vsel %vm8041_vm5, %v1242_v33, %v1244_v59  ;;  %v1247_v61 = vsel %vm8041_vm5, %v1244_v59, %v1242_v33  ;;  %v1134_v21 = vsel %vm8029_vm6, %v1128_v9, %v1130_v10  ;;  %v1135_v22 = vsel %vm8029_vm6, %v1130_v10, %v1128_v9  ;;  %v1398_v9 = vld [vmem:[#allocation2 + $0xc8] sm:$0xff]  ;;  %v1381_v10 = vld [vmem:[#allocation2 + $0x40] sm:$0xff] }
 0x124   : > { %v1250_v0 = vmul.f32 %v5723_v49, %v1246_v60  ;;  %v1251_v1 = vmul.f32 %v5724_v50, %v1247_v61  ;;  %v1138_v33 = vmul.f32 %v6221_v14, %v1135_v22  ;;  %v1139_v36 = vmul.f32 %v6226_v18, %v1134_v21  ;;  %v1290_v49 = vld [vmem:[%s8105_s9] sm:$0xff]  ;;  %v1378_v21 = vld [vmem:[#allocation2 + $0x28] sm:$0xff]  ;;  %s8221_s9 = smov 120  }
 0x125   : > { %v1388_v60 = vld [vmem:[#allocation2 + $0x78] sm:$0xff]  ;;  %v1394_v22 = vld [vmem:[#allocation2 + $0xa8] sm:$0xff] }
 0x126   : > { %4846 = vmatpush.msk.msra.mxu0 %vm1281_vm7, %v1250_v0  ;;  %4848 = vmatpush.msk.msra.mxu1 %vm1281_vm7, %v1251_v1  ;;  %v1283_v50 = vsel %vm1281_vm7, %v1139_v36, %v1255_v48  ;;  %v1404_v61 = vld [vmem:[#allocation2 + $0xf8] sm:$0xff]  ;;  %v1386_v0 = vld [vmem:[#allocation2 + $0x68] sm:$0xff] }
 0x127   : > { %1405 = vmatpush.msra.mxu2 %v1388_v60  ;;  %1425 = vmatpush.msra.mxu3 %v1404_v61  ;;  %v1402_v1 = vld [vmem:[#allocation2 + $0xe8] sm:$0xff] }
 0x128   : > { %1319 = vmatpush.msra.mxu0 %v1288_v15  ;;  %1339 = vmatpush.msra.mxu1 %v1289_v16  ;;  %v1379_v15 = vld [vmem:[#allocation2 + $0x30] sm:$0xff] }
 0x129   : > { %1406 = vmatpush.msra.mxu2 %v1387_v62  ;;  %1426 = vmatpush.msra.mxu3 %v1403_v63  ;;  %v1395_v16 = vld [vmem:[#allocation2 + $0xb0] sm:$0xff]  ;;  %v5725_v63 = vld [vmem:[%s6026_s12 + $0x8] ss:$0 sm:$0xff] }
 0x12a   : > { %v1164_v27 = vpop.permute.xlu1 %1163  ;;  %1320 = vmatpush.msra.mxu0 %v1286_v23  ;;  %1340 = vmatpush.msra.mxu1 %v1287_v24  ;;  %v1377_v23 = vld [vmem:[#allocation2 + $0x20] sm:$0xff] }
 0x12b   : > { %v1166_v28 = vsel %vm1165_vm8, %v6128_v17, %v1164_v27  ;;  %v1167_v30 = vsel %vm1165_vm8, %v1164_v27, %v6128_v17  ;;  %v1282_v17 = vsel %vm1281_vm7, %v1138_v33, %v1254_v47  ;;  %1407 = vmatpush.msra.mxu2 %v1386_v0  ;;  %1427 = vmatpush.msra.mxu3 %v1402_v1  ;;  %v1393_v24 = vld [vmem:[#allocation2 + $0xa0] sm:$0xff]  ;;  %v1375_v27 = vld [vmem:[#allocation2 + $0x10] sm:$0xff]  ;;  %v1445_v0 = vld [vmem:[%s6026_s12] sm:$0xff] }
 0x12c   : > { %v1170_v37 = vmul.f32 %v6230_v19, %v1167_v30  ;;  %v1171_v38 = vmul.f32 %v6233_v20, %v1166_v28  ;;  %v1391_v28 = vld [vmem:[#allocation2 + $0x90] sm:$0xff]  ;;  %v1374_v30 = vld [vmem:[#allocation2 + $0x8] sm:$0xff]  ;;  %v1389_v33 = vld [vmem:[#allocation2 + $0x80] sm:$0xff]  ;;  %v1478_v1 = vperm.slane %v1445_v0, 5 }
 0x12d   : > { %1408 = vmatpush.msra.mxu2 %v1385_v2  ;;  %1428 = vmatpush.msra.mxu3 %v1401_v3 }
 0x12e   : > { %v1284_v45 = vsel %vm1281_vm7, %v1170_v37, %v1260_v31  ;;  %v1285_v46 = vsel %vm1281_vm7, %v1171_v38, %v1261_v32  ;;  %v1390_v31 = vld [vmem:[#allocation2 + $0x88] sm:$0xff]  ;;  %v1373_v32 = vld [vmem:[#allocation2] sm:$0xff] }
 0x12f   : > { %1321 = vmatpush.msra.mxu0 %v1284_v45  ;;  %1341 = vmatpush.msra.mxu1 %v1285_v46 }
 0x130   : > { %1409 = vmatpush.msra.mxu2 %v1384_v4  ;;  %1429 = vmatpush.msra.mxu3 %v1400_v5  ;;  %v1460_v5 = vperm.slane %v1445_v0, 1 }
 0x131   : > { %1322 = vmatpush.msra.mxu0 %v1282_v17  ;;  %1342 = vmatpush.msra.mxu1 %v1283_v50 }
 0x132   : > { %4847 = vmatmul.msk.f32.vlgmr.msra.gmra.mxu0 %vm1297_vm9, %v1290_v49  ;;  %4849 = vmatmul.msk.f32.vlgmr.msra.gmra.mxu1 %vm1297_vm9, %v1290_v49  ;;  %v1295_v53 = vpop.permute.xlu1 %1294 }
 0x133   : > { %1410 = vmatpush.msra.mxu2 %v1383_v6  ;;  %1430 = vmatpush.msra.mxu3 %v1399_v7  ;;  %v1490_v6 = vperm.slane %v1445_v0, 7  ;;  %v1472_v7 = vperm.slane %v1445_v0, 3 }
 0x135   : > { %1411 = vmatpush.msra.mxu2 %v1382_v8  ;;  %1431 = vmatpush.msra.mxu3 %v1398_v9 }
 0x137   : > { %1412 = vmatpush.msra.mxu2 %v1381_v10  ;;  %1432 = vmatpush.msra.mxu3 %v1397_v11  ;;  %v1484_v10 = vperm.slane %v1445_v0, 6  ;;  %v1466_v11 = vperm.slane %v1445_v0, 2 }
 0x139   : > { %1413 = vmatpush.msra.mxu2 %v1380_v12  ;;  %1433 = vmatpush.msra.mxu3 %v1396_v13 }
 0x13b   : > { %1414 = vmatpush.msra.mxu2 %v1379_v15  ;;  %1434 = vmatpush.msra.mxu3 %v1395_v16 }
 0x13d   : > { %1415 = vmatpush.msra.mxu2 %v1378_v21  ;;  %1435 = vmatpush.msra.mxu3 %v1394_v22 }
 0x13f   : > { %1416 = vmatpush.msra.mxu2 %v1377_v23  ;;  %1436 = vmatpush.msra.mxu3 %v1393_v24 }
 0x141   : > { %1417 = vmatpush.msra.mxu2 %v1376_v25  ;;  %1437 = vmatpush.msra.mxu3 %v1392_v26 }
 0x143   : > { %1418 = vmatpush.msra.mxu2 %v1375_v27  ;;  %1438 = vmatpush.msra.mxu3 %v1391_v28 }
 0x145   : > { %1419 = vmatpush.msra.mxu2 %v1374_v30  ;;  %1439 = vmatpush.msra.mxu3 %v1390_v31  ;;  %v1454_v30 = vperm.slane %v1445_v0, 0 }
 0x147   : > { %1420 = vmatpush.msra.mxu2 %v1373_v32  ;;  %1440 = vmatpush.msra.mxu3 %v1389_v33 }
 0x1af   : > { %v1324_v54 = vpop.f32.mrf.mxu0  ;;  %v1344_v55 = vpop.f32.mrf.mxu1 }
 0x1b0   : > { %v1325_v56 = vadd.f32 %v1324_v54, %v1295_v53  ;;  %v1345_v57 = vadd.f32 %v1344_v55, %v1295_v53 }
 0x1b2   : > { %v6258_v58 = vmax.f32 %v1325_v56, 0.0  ;;  %v6260_v59 = vmax.f32 %v1345_v57, 0.0 }
 0x1b4   : > { %8106 = vst [vmem:[#allocation45_spill] sm:$0xff] %v6258_v58  ;;  %1351 = vrot.lane.b32.xlu0 %v6260_v59, %s8044_s11  ;;  %1357 = vrot.lane.b32.xlu1 %v6258_v58, %s7904_s16 }
 0x1b5   : > { %8107 = vst [vmem:[#allocation46_spill] sm:$0xff] %v6260_v59  ;;  %1349 = vrot.lane.b32.xlu2 %v6258_v58, %s8044_s11 }
 0x1bc   : > { %1365 = vrot.lane.b32.xlu0 %v6258_v58, %s7906_s22  ;;  %1367 = vrot.lane.b32.xlu1 %v6260_v59, %s7906_s22  ;;  %s5854_s22 = smov 63  }
 0x1bd   : > { %1359 = vrot.lane.b32.xlu2 %v6260_v59, %s7904_s16  ;;  %s7912_s16 = smov 8  }
 0x1c4   : > { %1498 = vrot.lane.b32.xlu1 %v5725_v63, %s5850_s23  ;;  %s8036_s23 = smov 7  }
 0x1cc   : > { %1480 = vrot.lane.b32.xlu1 %v1478_v1, %s7924_s10  ;;  %v1528_v1 = vld [vmem:[%s5906_s21] sm:$0xff] }
 0x1d4   : > { %1462 = vrot.lane.b32.xlu1 %v1460_v5, %s5852_s26  ;;  %s7914_s26 = smov 46  }
 0x20f   : > { %v1350_v36 = vpop.permute.xlu2 %1349 }
 0x217   : > { %v1360_v49 = vpop.permute.xlu2 %1359 }
 0x226   : > { %v1352_v37 = vpop.permute.xlu0 %1351  ;;  %v1358_v38 = vpop.permute.xlu1 %1357 }
 0x227   : > { %v6276_v45 = vsel %vm1197_vm1, %v1350_v36, %v1352_v37  ;;  %v6280_v46 = vsel %vm1197_vm1, %v1352_v37, %v1350_v36  ;;  %v6288_v17 = vsel %vm8040_vm0, %v1358_v38, %v1360_v49  ;;  %v6292_v50 = vsel %vm8040_vm0, %v1360_v49, %v1358_v38 }
 0x228   : > { %8108 = vst [vmem:[#allocation47_spill] sm:$0xff] %v6276_v45  ;;  %v1355_v47 = vmax.f32 %v6258_v58, %v6276_v45  ;;  %v1356_v48 = vmax.f32 %v6260_v59, %v6280_v46 }
 0x229   : > { %8109 = vst [vmem:[#allocation48_spill] sm:$0xff] %v6280_v46 }
 0x22a   : > { %8110 = vst [vmem:[#allocation49_spill] sm:$0xff] %v6288_v17  ;;  %v1363_v55 = vmax.f32 %v1355_v47, %v6288_v17  ;;  %v1364_v56 = vmax.f32 %v1356_v48, %v6292_v50 }
 0x22b   : > { %8111 = vst [vmem:[#allocation50_spill] sm:$0xff] %v6292_v50 }
 0x22e   : > { %v1366_v53 = vpop.permute.xlu0 %1365  ;;  %v1368_v54 = vpop.permute.xlu1 %1367 }
 0x22f   : > { %v6298_v57 = vsel %vm8041_vm5, %v1366_v53, %v1368_v54  ;;  %v6302_v60 = vsel %vm8041_vm5, %v1368_v54, %v1366_v53 }
 0x230   : > { %8112 = vst [vmem:[#allocation51_spill] sm:$0xff] %v6298_v57  ;;  %v1371_v61 = vmax.f32 %v1363_v55, %v6298_v57  ;;  %v1372_v62 = vmax.f32 %v1364_v56, %v6302_v60 }
 0x231   : > { %8113 = vst [vmem:[#allocation52_spill] sm:$0xff] %v6302_v60 }
 0x232   : > { %1421 = vmatmul.f32.vlgmr.msra.gmra.mxu2 %v1371_v61  ;;  %1441 = vmatmul.f32.vlgmr.msra.gmra.mxu3 %v1372_v62 }
 0x236   : > { %v6314_v12 = vpop.permute.xlu1 %1498 }
 0x237   : > { %8114 = vst [vmem:[#allocation53_spill] sm:$0xff] %v6314_v12 }
 0x23e   : > { %v6325_v24 = vpop.permute.xlu1 %1480 }
 0x23f   : > { %8117 = vst [vmem:[#allocation56_spill] sm:$0xff] %v6325_v24 }
 0x246   : > { %v6341_v33 = vpop.permute.xlu1 %1462 }
 0x247   : > { %8120 = vst [vmem:[#allocation59_spill] sm:$0xff] %v6341_v33 }
 0x2b5   : > { %v1422_v2 = vpop.f32.mrf.mxu2  ;;  %v1442_v3 = vpop.f32.mrf.mxu3 }
 0x2b6   : > { %v1443_v4 = vadd.f32 %v1442_v3, %v1422_v2 }
 0x2b8   : > { %1448 = vrot.lane.b32.xlu2 %v1443_v4, %s7947_s1 }
 0x2c0   : > { %1492 = vrot.lane.b32.xlu2 %v1490_v6, %s7912_s16  ;;  %s7944_s16 = smov 55   ;;  %v1529_v6 = vld [vmem:[%s5906_s21 + $0x8] sm:$0xff] }
 0x2c8   : > { %1474 = vrot.lane.b32.xlu2 %v1472_v7, %s5854_s22  ;;  %s7916_s22 = smov 47  }
 0x312   : > { %v1449_v8 = vpop.permute.xlu2 %1448 }
 0x313   : > { %v1450_v9 = vsel %vm1447_vm10, %v1449_v8, %v1443_v4 }
 0x314   : > { %1451 = vrot.lane.b32.xlu0 %v1450_v9, %s7947_s1 }
 0x31a   : > { %v6316_v15 = vpop.permute.xlu2 %1492 }
 0x31b   : > { %8115 = vst [vmem:[#allocation54_spill] sm:$0xff] %v6316_v15 }
 0x31c   : > { %1486 = vrot.lane.b32.xlu0 %v1484_v10, %s8036_s23 }
 0x322   : > { %v6332_v27 = vpop.permute.xlu2 %1474 }
 0x323   : > { %8118 = vst [vmem:[#allocation57_spill] sm:$0xff] %v6332_v27 }
 0x324   : > { %1468 = vrot.lane.b32.xlu0 %v1466_v11, %s5856_s18  ;;  %s7918_s18 = smov 48  }
 0x386   : > { %v1452_v13 = vpop.permute.xlu0 %1451 }
 0x387   : > { %v1453_v16 = vsel %vm1447_vm10, %v1452_v13, %v1443_v4 }
 0x388   : > { %v1501_v21 = vmul.f32 %v6314_v12, %v1453_v16  ;;  %v1495_v22 = vmul.f32 %v6316_v15, %v1453_v16  ;;  %v1483_v26 = vmul.f32 %v6325_v24, %v1453_v16  ;;  %v1477_v31 = vmul.f32 %v6332_v27, %v1453_v16 }
 0x389   : > { %v1465_v36 = vmul.f32 %v6341_v33, %v1453_v16 }
 0x38a   : > { %1524 = vrot.lane.b32.xlu2 %v1501_v21, %s7914_s26  ;;  %1521 = vrot.lane.b32.xlu0 %v1495_v22, %s7916_s22  ;;  %s7922_s26 = smov 120   ;;  %s8032_s22 = smov 126  }
 0x38e   : > { %v6323_v23 = vpop.permute.xlu0 %1486 }
 0x38f   : > { %8116 = vst [vmem:[#allocation55_spill] sm:$0xff] %v6323_v23  ;;  %v1489_v25 = vmul.f32 %v6323_v23, %v1453_v16 }
 0x391   : > { %1518 = vrot.lane.b32.xlu1 %v1489_v25, %s7918_s18  ;;  %s7920_s18 = smov 73   ;;  %v1526_v25 = vld [vmem:[%s5901_s17] sm:$0xff] }
 0x392   : > { %1515 = vrot.lane.b32.xlu2 %v1483_v26, %s7942_s15  ;;  %1512 = vrot.lane.b32.xlu0 %v1443_v4, %s7944_s16  ;;  %s7998_s15 = smov 6  }
 0x396   : > { %v6334_v28 = vpop.permute.xlu0 %1468 }
 0x397   : > { %8119 = vst [vmem:[#allocation58_spill] sm:$0xff] %v6334_v28  ;;  %v1471_v32 = vmul.f32 %v6334_v28, %v1453_v16 }
 0x399   : > { %1509 = vrot.lane.b32.xlu1 %v1477_v31, %s7922_s26 }
 0x39a   : > { %1506 = vrot.lane.b32.xlu2 %v1471_v32, %s8032_s22  ;;  %1456 = vrot.lane.b32.xlu0 %v1454_v30, %s7944_s16  ;;  %v1527_v30 = vld [vmem:[%s5901_s17 + $0x8] sm:$0xff]  ;;  %s8030_s16 = smov 117  }
 0x3a1   : > { %1503 = vrot.lane.b32.xlu1 %v1465_v36, %s8044_s11 }
 0x3e4   : > { %v1525_v37 = vpop.permute.xlu2 %1524 }
 0x3ec   : > { %v1516_v48 = vpop.permute.xlu2 %1515 }
 0x3f4   : > { %v1507_v63 = vpop.permute.xlu2 %1506 }
 0x3fc   : > { %v1522_v38 = vpop.permute.xlu0 %1521 }
 0x3fd   : > { %v5021_v47 = vpack.i.bf16 %v1522_v38, %v1525_v37 }
 0x3ff   : > { %5022 = vrot.lane.b32.xlu2 %v5021_v47, %s7920_s18 }
 0x403   : > { %v1519_v49 = vpop.permute.xlu1 %1518 }
 0x404   : > { %v5026_v53 = vpack.i.bf16 %v1516_v48, %v1519_v49  ;;  %v1513_v54 = vpop.permute.xlu0 %1512 }
 0x406   : > { %5027 = vrot.lane.b32.xlu0 %v5026_v53, %s7920_s18 }
 0x40b   : > { %v1510_v55 = vpop.permute.xlu1 %1509 }
 0x40c   : > { %v5031_v56 = vpack.i.bf16 %v1510_v55, %v1513_v54  ;;  %v6347_v61 = vpop.permute.xlu0 %1456 }
 0x40d   : > { %8121 = vst [vmem:[#allocation60_spill] sm:$0xff] %v6347_v61  ;;  %v1459_v62 = vmul.f32 %v6347_v61, %v1453_v16 }
 0x40e   : > { %5032 = vrot.lane.b32.xlu1 %v5031_v56, %s7920_s18 }
 0x40f   : > { %1541 = vrot.lane.b32.xlu0 %v1459_v62, %s7920_s18 }
 0x413   : > { %v1504_v0 = vpop.permute.xlu1 %1503 }
 0x414   : > { %v5036_v2 = vpack.i.bf16 %v1504_v0, %v1507_v63 }
 0x416   : > { %1532 = vperm.xlu1 %5020, %v1528_v1   ;;  %5037 = vrot.lane.b32.xlu2 %v5036_v2, %s7920_s18  ;;  %s5865_s18 = smov 119  }
 0x41e   : > { %1537 = vperm.xlu2 %5041, %v1529_v6  }
 0x459   : > { %v5023_v3 = vpop.permute.xlu2 %5022 }
 0x45a   : > { %v5024_v4 = vunpack.i.l.bf16 %v5023_v3  ;;  %v5025_v5 = vunpack.i.h.bf16 %v5023_v3 }
 0x45c   : > { %1582 = vmatpush.msrb.mxu0 %v5024_v4 }
 0x45e   : > { %1583 = vmatpush.msrb.mxu0 %v5025_v5 }
 0x470   : > { %v5038_v13 = vpop.permute.xlu2 %5037 }
 0x471   : > { %v5039_v21 = vunpack.i.l.bf16 %v5038_v13  ;;  %v5040_v22 = vunpack.i.h.bf16 %v5038_v13 }
 0x478   : > { %v5028_v7 = vpop.permute.xlu0 %5027  ;;  %v1538_v38 = vpop.permute.xlu2 %1537 }
 0x479   : > { %v5029_v8 = vunpack.i.l.bf16 %v5028_v7  ;;  %v5030_v9 = vunpack.i.h.bf16 %v5028_v7 }
 0x47b   : > { %1584 = vmatpush.msrb.mxu0 %v5029_v8 }
 0x47d   : > { %1585 = vmatpush.msrb.mxu0 %v5030_v9 }
 0x480   : > { %v5033_v10 = vpop.permute.xlu1 %5032 }
 0x481   : > { %v5034_v11 = vunpack.i.l.bf16 %v5033_v10  ;;  %v5035_v16 = vunpack.i.h.bf16 %v5033_v10  ;;  %v1542_v26 = vpop.permute.xlu0 %1541 }
 0x483   : > { %1586 = vmatpush.msrb.mxu0 %v5034_v11 }
 0x485   : > { %1587 = vmatpush.msrb.mxu0 %v5035_v16 }
 0x487   : > { %1588 = vmatpush.msrb.mxu0 %v5039_v21 }
 0x488   : > { %v1533_v31 = vpop.permute.xlu1 %1532 }
 0x489   : > { %1589 = vmatpush.msrb.mxu0 %v5040_v22 }
 0x48b   : > { %1590 = vmatpush.msrb.mxu0 %v1542_v26 }
 0x48c   : > { %4850 = vmatmul.msk.f32.vlgmr.msrb.gmra.mxu0 %vm1568_vm11, %v1526_v25 }
 0x494   : > { %4851 = vmatmul.msk.f32.gmra.mxu0 %vm1568_vm11, %v1527_v30 }
 0x509   : > { %v1592_v32 = vpop.f32.mrf.mxu0 }
 0x50a   : > { %v1593_v36 = vadd.f32 %v1592_v32, %v1533_v31 }
 0x50c   : > { %v6357_v37 = vmax.f32 %v1593_v36, 0.0 }
 0x50e   : > { %8122 = vst [vmem:[#allocation61_spill] sm:$0xff] %v6357_v37  ;;  %1600 = vrot.lane.b32.xlu0 %v6357_v37, %s7947_s1 }
 0x511   : > { %v1595_v47 = vpop.f32.mrf.mxu0 }
 0x512   : > { %v1596_v48 = vadd.f32 %v1595_v47, %v1538_v38  ;;  %v1645_v47 = vld [vmem:[%s8084_s6 + $0x38] sm:$0xff] }
 0x513   : > { %1661 = vmatpush.msrb.mxu1 %v1645_v47 }
 0x514   : > { %v6361_v49 = vmax.f32 %v1596_v48, 0.0  ;;  %v1644_v48 = vld [vmem:[%s8084_s6 + $0x30] sm:$0xff] }
 0x515   : > { %1662 = vmatpush.msrb.mxu1 %v1644_v48 }
 0x516   : > { %8123 = vst [vmem:[#allocation62_spill] sm:$0xff] %v6361_v49  ;;  %1603 = vrot.lane.b32.xlu1 %v6361_v49, %s7947_s1 }
 0x580   : > { %v1601_v53 = vpop.permute.xlu0 %1600 }
 0x581   : > { %v1602_v54 = vsel %vm1447_vm10, %v1601_v53, %v6357_v37  ;;  %v1643_v53 = vld [vmem:[%s8084_s6 + $0x28] sm:$0xff] }
 0x582   : > { %1606 = vrot.lane.b32.xlu2 %v1602_v54, %s7947_s1  ;;  %v1642_v54 = vld [vmem:[%s8084_s6 + $0x20] sm:$0xff]  ;;  %1663 = vmatpush.msrb.mxu1 %v1643_v53 }
 0x584   : > { %1664 = vmatpush.msrb.mxu1 %v1642_v54 }
 0x588   : > { %v1604_v55 = vpop.permute.xlu1 %1603 }
 0x589   : > { %v1605_v56 = vsel %vm1447_vm10, %v1604_v55, %v6361_v49  ;;  %v1641_v55 = vld [vmem:[%s8084_s6 + $0x18] sm:$0xff] }
 0x58a   : > { %1608 = vrot.lane.b32.xlu0 %v1605_v56, %s7947_s1  ;;  %1665 = vmatpush.msrb.mxu1 %v1641_v55  ;;  %v1640_v56 = vld [vmem:[%s8084_s6 + $0x10] sm:$0xff]  ;;  %s5876_s1 = smov 123  }
 0x58c   : > { %1666 = vmatpush.msrb.mxu1 %v1640_v56 }
 0x5dc   : > { %v1607_v62 = vpop.permute.xlu2 %1606 }
 0x5dd   : > { %v6373_v63 = vsel %vm1447_vm10, %v1607_v62, %v6357_v37  ;;  %v1639_v62 = vld [vmem:[%s8084_s6 + $0x8] sm:$0xff] }
 0x5de   : > { %8124 = vst [vmem:[#allocation63_spill] sm:$0xff] %v6373_v63  ;;  %1630 = vrot.lane.b32.xlu0 %v6373_v63, %s5865_s18  ;;  %1622 = vrot.lane.b32.xlu2 %v6373_v63, %s7922_s26  ;;  %v6382_v1 = vmul.f32 %v6373_v63, %v6341_v33  ;;  %v6386_v2 = vmul.f32 %v6373_v63, %v6316_v15 }
 0x5df   : > { %1614 = vrot.lane.b32.xlu1 %v6373_v63, %s8044_s11  ;;  %v6390_v3 = vmul.f32 %v6373_v63, %v6314_v12  ;;  %v6394_v4 = vmul.f32 %v6373_v63, %v6325_v24  ;;  %v6402_v6 = vmul.f32 %v6373_v63, %v6323_v23  ;;  %v6406_v7 = vmul.f32 %v6373_v63, %v6332_v27 }
 0x5e0   : > { %8125 = vst [vmem:[#allocation64_spill] sm:$0xff] %v6382_v1  ;;  %v6410_v8 = vmul.f32 %v6373_v63, %v6334_v28  ;;  %1667 = vmatpush.msrb.mxu1 %v1639_v62 }
 0x5e1   : > { %8126 = vst [vmem:[#allocation65_spill] sm:$0xff] %v6386_v2 }
 0x5e2   : > { %8127 = vst [vmem:[#allocation66_spill] sm:$0xff] %v6390_v3 }
 0x5e3   : > { %8128 = vst [vmem:[#allocation67_spill] sm:$0xff] %v6394_v4 }
 0x5e4   : > { %8130 = vst [vmem:[#allocation69_spill] sm:$0xff] %v6402_v6 }
 0x5e5   : > { %8131 = vst [vmem:[#allocation70_spill] sm:$0xff] %v6406_v7  ;;  %v2082_v7 = vld [vmem:[%s8083_s8 + $0x8] sm:$0xff] }
 0x5e6   : > { %8132 = vst [vmem:[#allocation71_spill] sm:$0xff] %v6410_v8 }
 0x5fc   : > { %v1609_v0 = vpop.permute.xlu0 %1608 }
 0x5fd   : > { %v6398_v5 = vsel %vm1447_vm10, %v1609_v0, %v6361_v49  ;;  %v1638_v0 = vld [vmem:[%s8084_s6] sm:$0xff]  ;;  %s8172_s6 = smov 117  }
 0x5fe   : > { %8129 = vst [vmem:[#allocation68_spill] sm:$0xff] %v6398_v5  ;;  %1632 = vrot.lane.b32.xlu0 %v6398_v5, %s5865_s18  ;;  %1624 = vrot.lane.b32.xlu2 %v6398_v5, %s7922_s26  ;;  %v6417_v9 = vmul.f32 %v6398_v5, %v6341_v33  ;;  %v6421_v10 = vmul.f32 %v6398_v5, %v6316_v15  ;;  %s5866_s18 = smov 4   ;;  %s5867_s26 = smov 12   ;;  %v2084_v33 = vld [vmem:[%s8083_s8 + $0x18] sm:$0xff] }
 0x5ff   : > { %v6425_v11 = vmul.f32 %v6398_v5, %v6314_v12  ;;  %1616 = vrot.lane.b32.xlu1 %v6398_v5, %s8044_s11  ;;  %v6431_v13 = vmul.f32 %v6398_v5, %v6325_v24  ;;  %v6435_v16 = vmul.f32 %v6398_v5, %v6323_v23  ;;  %v6439_v21 = vmul.f32 %v6398_v5, %v6332_v27  ;;  %v2083_v24 = vld [vmem:[%s8083_s8 + $0x10] sm:$0xff] }
 0x600   : > { %8133 = vst [vmem:[#allocation72_spill] sm:$0xff] %v6417_v9  ;;  %v6443_v22 = vmul.f32 %v6398_v5, %v6334_v28  ;;  %1668 = vmatpush.msrb.mxu1 %v1638_v0  ;;  %v2080_v28 = vld [vmem:[%s8086_s3 + $0x18] sm:$0xff] }
 0x601   : > { %8134 = vst [vmem:[#allocation73_spill] sm:$0xff] %v6421_v10 }
 0x602   : > { %8135 = vst [vmem:[#allocation74_spill] sm:$0xff] %v6425_v11 }
 0x603   : > { %8136 = vst [vmem:[#allocation75_spill] sm:$0xff] %v6431_v13 }
 0x604   : > { %8137 = vst [vmem:[#allocation76_spill] sm:$0xff] %v6435_v16  ;;  %v2077_v16 = vld [vmem:[%s8086_s3] sm:$0xff] }
 0x605   : > { %8138 = vst [vmem:[#allocation77_spill] sm:$0xff] %v6439_v21 }
 0x606   : > { %8139 = vst [vmem:[#allocation78_spill] sm:$0xff] %v6443_v22 }
 0x638   : > { %v1623_v38 = vpop.permute.xlu2 %1622 }
 0x650   : > { %v1631_v47 = vpop.permute.xlu0 %1630 }
 0x651   : > { %v1615_v36 = vpop.permute.xlu1 %1614 }
 0x652   : > { %v1620_v32 = vmax.f32 %v6357_v37, %v1615_v36 }
 0x654   : > { %v1628_v31 = vmax.f32 %v1620_v32, %v1623_v38  ;;  %v6474_v32 = vld [vmem:[%s8085_s4] sm:$0xff] }
 0x655   : > { %v1719_v38 = vperm.slane %v6474_v32, 5  ;;  %v1691_v40 = vperm.slane %v6474_v32, 0 }
 0x656   : > { %v1636_v48 = vmax.f32 %v1628_v31, %v1631_v47  ;;  %v1733_v31 = vperm.slane %v6474_v32, 7 }
 0x658   : > { %4852 = vmatmul.msk.f32.vlgmr.msrb.gmra.mxu1 %vm1646_vm12, %v1636_v48  ;;  %v1625_v55 = vpop.permute.xlu2 %1624 }
 0x670   : > { %v1633_v30 = vpop.permute.xlu0 %1632 }
 0x671   : > { %v1617_v53 = vpop.permute.xlu1 %1616 }
 0x672   : > { %v1621_v54 = vmax.f32 %v6361_v49, %v1617_v53  ;;  %v1712_v53 = vperm.slane %v6474_v32, 3 }
 0x674   : > { %v1629_v56 = vmax.f32 %v1621_v54, %v1625_v55  ;;  %v5726_v54 = vld [vmem:[%s8085_s4 + $0x8] ss:$0 sm:$0xff]  ;;  %s8168_s4 = smov 124  }
 0x676   : > { %v1637_v62 = vmax.f32 %v1629_v56, %v1633_v30  ;;  %v1698_v30 = vperm.slane %v6474_v32, 1 }
 0x678   : > { %4853 = vmatmul.msk.f32.gmra.mxu1 %vm1646_vm12, %v1637_v62  ;;  %v1726_v62 = vperm.slane %v6474_v32, 6 }
 0x6d5   : > { %v1670_v0 = vpop.f32.mrf.mxu1 }
 0x6d6   : > { %1679 = vrot.lane.b32.xlu2 %v1670_v0, %s8042_s0 }
 0x6f5   : > { %v1673_v36 = vpop.f32.mrf.mxu1 }
 0x6f6   : > { %1682 = vrot.lane.b32.xlu1 %v1673_v36, %s8042_s0  ;;  %v5057_v51 = vpack.i.bf16 %v1670_v0, %v1673_v36 }
 0x6fe   : > { %1735 = vrot.lane.b32.xlu1 %v1733_v31, %s5866_s18  ;;  %s5868_s18 = smov 5   ;;  %v1705_v31 = vperm.slane %v6474_v32, 2  ;;  %v1805_v32 = vld [vmem:[%s5916_s29 + $0x10] sm:$0xff] }
 0x706   : > { %1721 = vrot.lane.b32.xlu1 %v1719_v38, %s7924_s10  ;;  %s5870_s10 = smov 13  }
 0x70e   : > { %1700 = vrot.lane.b32.xlu1 %v1698_v30, %s5867_s26  ;;  %s5869_s26 = smov 3  }
 0x730   : > { %v1680_v47 = vpop.permute.xlu2 %1679 }
 0x731   : > { %v1681_v48 = vsel %vm1678_vm13, %v1680_v47, %v1670_v0 }
 0x732   : > { %1685 = vrot.lane.b32.xlu2 %v1681_v48, %s8042_s0 }
 0x73a   : > { %1714 = vrot.lane.b32.xlu2 %v1712_v53, %s7932_s7  ;;  %s8034_s7 = smov 124  }
 0x742   : > { %1742 = vrot.lane.b32.xlu2 %v5726_v54, %s5868_s18  ;;  %s8144_s18 = smov 8  }
 0x768   : > { %v1683_v55 = vpop.permute.xlu1 %1682 }
 0x769   : > { %v1684_v56 = vsel %vm1678_vm13, %v1683_v55, %v1673_v36 }
 0x76a   : > { %1687 = vrot.lane.b32.xlu0 %v1684_v56, %s8042_s0 }
 0x770   : > { %v6489_v38 = vpop.permute.xlu1 %1735 }
 0x771   : > { %8140 = vst [vmem:[#allocation79_spill] sm:$0xff] %v6489_v38 }
 0x772   : > { %1728 = vrot.lane.b32.xlu0 %v1726_v62, %s5869_s26  ;;  %s7996_s26 = smov 11  }
 0x778   : > { %v6492_v53 = vpop.permute.xlu1 %1721 }
 0x779   : > { %8141 = vst [vmem:[#allocation80_spill] sm:$0xff] %v6492_v53 }
 0x77a   : > { %1707 = vrot.lane.b32.xlu0 %v1705_v31, %s5870_s10  ;;  %s8038_s10 = smov 10  }
 0x78c   : > { %v1686_v30 = vpop.permute.xlu2 %1685 }
 0x78d   : > { %v1689_v47 = vsel %vm1678_vm13, %v1686_v30, %v1670_v0 }
 0x78e   : > { %v1738_v55 = vmul.f32 %v6489_v38, %v1689_v47  ;;  %v1724_v62 = vmul.f32 %v6492_v53, %v1689_v47 }
 0x794   : > { %v6505_v52 = vpop.permute.xlu2 %1714 }
 0x795   : > { %8143 = vst [vmem:[#allocation82_spill] sm:$0xff] %v6505_v52 }
 0x7dc   : > { %v1688_v48 = vpop.permute.xlu0 %1687 }
 0x7dd   : > { %v1690_v54 = vsel %vm1678_vm13, %v1688_v48, %v1673_v36 }
 0x7de   : > { %v1739_v56 = vmul.f32 %v6489_v38, %v1690_v54  ;;  %v1725_v26 = vmul.f32 %v6492_v53, %v1690_v54 }
 0x7e0   : > { %v5042_v25 = vpack.i.bf16 %v1738_v55, %v1739_v56  ;;  %v5052_v31 = vpack.i.bf16 %v1724_v62, %v1725_v26  ;;  %v6509_v26 = vpop.permute.xlu1 %1700  ;;  %v1717_v62 = vmul.f32 %v6505_v52, %v1689_v47 }
 0x7e1   : > { %8145 = vst [vmem:[#allocation83_spill] sm:$0xff] %v6509_v26  ;;  %v1704_v56 = vmul.f32 %v6509_v26, %v1690_v54  ;;  %v1703_v0 = vmul.f32 %v6509_v26, %v1689_v47 }
 0x7e2   : > { %5043 = vrot.lane.b32.xlu0 %v5042_v25, %s8036_s23  ;;  %5053 = vrot.lane.b32.xlu2 %v5052_v31, %s8038_s10  ;;  %v1718_v25 = vmul.f32 %v6505_v52, %v1690_v54  ;;  %s8156_s23 = sld [smem:[#allocation10_spill]] }
 0x7e3   : > { %s8157_s10 = sld [smem:[#allocation14_spill]] }
 0x7e4   : > { %v6501_v30 = vpop.permute.xlu0 %1728 }
 0x7e5   : > { %8142 = vst [vmem:[#allocation81_spill] sm:$0xff] %v6501_v30  ;;  %v1731_v46 = vmul.f32 %v6501_v30, %v1689_v47  ;;  %v1732_v48 = vmul.f32 %v6501_v30, %v1690_v54 }
 0x7e7   : > { %v5047_v45 = vpack.i.bf16 %v1731_v46, %v1732_v48  ;;  %v5072_v48 = vpack.i.bf16 %v1703_v0, %v1704_v56 }
 0x7e9   : > { %5048 = vrot.lane.b32.xlu1 %v5047_v45, %s8144_s18  ;;  %v5062_v45 = vpack.i.bf16 %v1717_v62, %v1718_v25 }
 0x7ea   : > { %5058 = vrot.lane.b32.xlu0 %v5057_v51, %s7996_s26  ;;  %v6521_v51 = vpop.permute.xlu2 %1742 }
 0x7eb   : > { %8147 = vst [vmem:[#allocation85_spill] sm:$0xff] %v6521_v51  ;;  %v1746_v18 = vmul.f32 %v6521_v51, %v1690_v54  ;;  %v1745_v14 = vmul.f32 %v6521_v51, %v1689_v47 }
 0x7ec   : > { %v6512_v55 = vpop.permute.xlu0 %1707 }
 0x7ed   : > { %8146 = vst [vmem:[#allocation84_spill] sm:$0xff] %v6512_v55  ;;  %v1710_v46 = vmul.f32 %v6512_v55, %v1689_v47  ;;  %v1711_v31 = vmul.f32 %v6512_v55, %v1690_v54  ;;  %v5077_v39 = vpack.i.bf16 %v1745_v14, %v1746_v18 }
 0x7ef   : > { %v5067_v36 = vpack.i.bf16 %v1710_v46, %v1711_v31 }
 0x7f1   : > { %5063 = vrot.lane.b32.xlu1 %v5062_v45, %s8034_s7  ;;  %5068 = vrot.lane.b32.xlu2 %v5067_v36, %s8032_s22  ;;  %s8154_s22 = sld [smem:[#allocation16_spill]] }
 0x7f2   : > { %5073 = vrot.lane.b32.xlu0 %v5072_v48, %s8044_s11 }
 0x7f9   : > { %5078 = vrot.lane.b32.xlu1 %v5077_v39, %s7998_s15  ;;  %1693 = vrot.lane.b32.xlu2 %v1691_v40, %s7996_s26  ;;  %s8150_s26 = sld [smem:[#allocation12_spill]] }
 0x7fa   : > { %s8151_s15 = sld [smem:[#allocation29_spill]] }
 0x7ff   : > { %v2204_v6 = vld [vmem:[%s8150_s26] sm:$0xff]  ;;  %v2209_v37 = vld [vmem:[%s8150_s26 + $0x28] sm:$0xff] }
 0x800   : > { %v2035_v49 = vld [vmem:[%s8151_s15 + $0x8] sm:$0xff] }
 0x801   : > { %2062 = vmatpush.msrb.mxu3 %v2035_v49 }
 0x83c   : > { %v5054_v25 = vpop.permute.xlu2 %5053 }
 0x83d   : > { %5093 = vrot.lane.b32.xlu2 %v5054_v25, %s8030_s16 }
 0x84b   : > { %v5069_v56 = vpop.permute.xlu2 %5068 }
 0x84c   : > { %5108 = vrot.lane.b32.xlu2 %v5069_v56, %s8030_s16 }
 0x853   : > { %v6531_v62 = vpop.permute.xlu2 %1693 }
 0x854   : > { %8148 = vst [vmem:[#allocation86_spill] sm:$0xff] %v6531_v62  ;;  %v5044_v46 = vpop.permute.xlu0 %5043  ;;  %v1696_v31 = vmul.f32 %v6531_v62, %v1689_v47  ;;  %v1697_v14 = vmul.f32 %v6531_v62, %v1690_v54 }
 0x855   : > { %5083 = vrot.lane.b32.xlu0 %v5044_v46, %s8030_s16 }
 0x856   : > { %v5122_v18 = vpack.i.bf16 %v1696_v31, %v1697_v14  ;;  %v1804_v31 = vld [vmem:[%s5916_s29 + $0x8] sm:$0xff]  ;;  %v1806_v14 = vld [vmem:[%s5916_s29 + $0x18] sm:$0xff] }
 0x858   : > { %5123 = vrot.lane.b32.xlu2 %v5122_v18, %s8030_s16 }
 0x85b   : > { %v5049_v39 = vpop.permute.xlu1 %5048 }
 0x85c   : > { %v5059_v40 = vpop.permute.xlu0 %5058  ;;  %5088 = vrot.lane.b32.xlu1 %v5049_v39, %s8030_s16 }
 0x85d   : > { %5098 = vrot.lane.b32.xlu0 %v5059_v40, %s8030_s16 }
 0x860   : > { %1819 = vperm.xlu2 %5041, %v1805_v32  }
 0x863   : > { %v5064_v0 = vpop.permute.xlu1 %5063 }
 0x864   : > { %5103 = vrot.lane.b32.xlu1 %v5064_v0, %s8030_s16  ;;  %v5074_v47 = vpop.permute.xlu0 %5073 }
 0x865   : > { %v5076_v45 = vunpack.i.h.bf16 %v5074_v47  ;;  %v5075_v36 = vunpack.i.l.bf16 %v5074_v47 }
 0x86b   : > { %v5079_v54 = vpop.permute.xlu1 %5078 }
 0x86c   : > { %v5081_v48 = vunpack.i.h.bf16 %v5079_v54  ;;  %v5080_v25 = vunpack.i.l.bf16 %v5079_v54 }
 0x86e   : > { %v5112_v56 = vpack.i.bf16 %v5080_v25, %v5075_v36  ;;  %v5117_v46 = vpack.i.bf16 %v5081_v48, %v5076_v45  ;;  %v1803_v48 = vld [vmem:[%s5916_s29] sm:$0xff] }
 0x870   : > { %5113 = vrot.lane.b32.xlu0 %v5112_v56, %s8030_s16  ;;  %5118 = vrot.lane.b32.xlu1 %v5117_v46, %s8030_s16  ;;  %s8153_s16 = sld [smem:[#allocation9_spill]] }
 0x878   : > { %1814 = vperm.xlu1 %5020, %v1804_v31   ;;  %1809 = vperm.xlu0 %5127, %v1803_v48  }
 0x880   : > { %1824 = vperm.xlu1 %5020, %v1806_v14  }
 0x897   : > { %v5094_v47 = vpop.permute.xlu2 %5093 }
 0x898   : > { %v5095_v45 = vunpack.i.l.bf16 %v5094_v47  ;;  %v5096_v25 = vunpack.i.h.bf16 %v5094_v47 }
 0x8a6   : > { %v5109_v14 = vpop.permute.xlu2 %5108 }
 0x8a7   : > { %v5111_v50 = vunpack.i.h.bf16 %v5109_v14 }
 0x8b2   : > { %v5124_v48 = vpop.permute.xlu2 %5123 }
 0x8c7   : > { %v5084_v18 = vpop.permute.xlu0 %5083 }
 0x8c8   : > { %v5085_v39 = vunpack.i.l.bf16 %v5084_v18  ;;  %v5086_v40 = vunpack.i.h.bf16 %v5084_v18 }
 0x8ca   : > { %1896 = vmatpush.msra.mxu1 %v5085_v39 }
 0x8cc   : > { %1897 = vmatpush.msra.mxu1 %v5086_v40 }
 0x8ce   : > { %v5089_v32 = vpop.permute.xlu1 %5088 }
 0x8cf   : > { %v5090_v0 = vunpack.i.l.bf16 %v5089_v32  ;;  %v5091_v54 = vunpack.i.h.bf16 %v5089_v32  ;;  %v5099_v36 = vpop.permute.xlu0 %5098 }
 0x8d0   : > { %v5100_v46 = vunpack.i.l.bf16 %v5099_v36  ;;  %v5101_v31 = vunpack.i.h.bf16 %v5099_v36 }
 0x8d1   : > { %1898 = vmatpush.msra.mxu1 %v5090_v0  ;;  %v5110_v0 = vunpack.i.l.bf16 %v5109_v14  ;;  %v1798_v14 = vld [vmem:[%s5911_s25 + $0x18] sm:$0xff] }
 0x8d3   : > { %1899 = vmatpush.msra.mxu1 %v5091_v54 }
 0x8d5   : > { %1900 = vmatpush.msra.mxu1 %v5095_v45  ;;  %v1796_v45 = vld [vmem:[%s5911_s25 + $0x8] sm:$0xff] }
 0x8d6   : > { %v5104_v56 = vpop.permute.xlu1 %5103 }
 0x8d7   : > { %1901 = vmatpush.msra.mxu1 %v5096_v25  ;;  %v5105_v18 = vunpack.i.l.bf16 %v5104_v56  ;;  %v5106_v39 = vunpack.i.h.bf16 %v5104_v56  ;;  %v5125_v56 = vunpack.i.l.bf16 %v5124_v48 }
 0x8d9   : > { %1902 = vmatpush.msra.mxu1 %v5100_v46  ;;  %v5126_v46 = vunpack.i.h.bf16 %v5124_v48 }
 0x8db   : > { %1903 = vmatpush.msra.mxu1 %v5101_v31  ;;  %v1795_v31 = vld [vmem:[%s5911_s25] sm:$0xff] }
 0x8dd   : > { %1904 = vmatpush.msra.mxu1 %v5105_v18  ;;  %v1800_v18 = vld [vmem:[%s5911_s25 + $0x28] sm:$0xff] }
 0x8df   : > { %1905 = vmatpush.msra.mxu1 %v5106_v39  ;;  %v1799_v39 = vld [vmem:[%s5911_s25 + $0x20] sm:$0xff] }
 0x8e1   : > { %1906 = vmatpush.msra.mxu1 %v5110_v0 }
 0x8e2   : > { %v5114_v40 = vpop.permute.xlu0 %5113  ;;  %v5119_v32 = vpop.permute.xlu1 %5118 }
 0x8e3   : > { %v5116_v54 = vunpack.i.h.bf16 %v5114_v40  ;;  %v5121_v47 = vunpack.i.h.bf16 %v5119_v32  ;;  %v5115_v36 = vunpack.i.l.bf16 %v5114_v40  ;;  %1907 = vmatpush.msra.mxu1 %v5111_v50  ;;  %v5120_v25 = vunpack.i.l.bf16 %v5119_v32  ;;  %v1797_v50 = vld [vmem:[%s5911_s25 + $0x10] sm:$0xff]  ;;  %v1802_v40 = vld [vmem:[%s5911_s25 + $0x38] sm:$0xff] }
 0x8e4   : > { %v1801_v32 = vld [vmem:[%s5911_s25 + $0x30] sm:$0xff] }
 0x8e5   : > { %1939 = vmatpush.msrb.mxu2 %v5116_v54  ;;  %1908 = vmatpush.msra.mxu1 %v5115_v36 }
 0x8e7   : > { %1940 = vmatpush.msrb.mxu2 %v5121_v47  ;;  %1909 = vmatpush.msra.mxu1 %v5120_v25 }
 0x8e8   : > { %4854 = vmatmul.msk.f32.vlgmr.msrb.gmra.mxu2 %vm1883_vm14, %v1796_v45 }
 0x8e9   : > { %1910 = vmatpush.msra.mxu1 %v5125_v56 }
 0x8ea   : > { %v1810_v0 = vpop.permute.xlu0 %1809  ;;  %v1815_v56 = vpop.permute.xlu1 %1814 }
 0x8eb   : > { %1911 = vmatpush.msra.mxu1 %v5126_v46 }
 0x8ec   : > { %1912 = vmatmul.f32.vlgmr.msra.gmra.mxu1 %v1795_v31 }
 0x8f0   : > { %4855 = vmatmul.msk.f32.gmra.mxu2 %vm1883_vm14, %v1798_v14 }
 0x8f4   : > { %1915 = vmatmul.f32.gmra.mxu1 %v1797_v50 }
 0x8f8   : > { %4856 = vmatmul.msk.f32.gmra.mxu2 %vm1883_vm14, %v1800_v18 }
 0x8fc   : > { %1918 = vmatmul.f32.gmra.mxu1 %v1799_v39  ;;  %v1820_v39 = vpop.permute.xlu2 %1819 }
 0x900   : > { %4857 = vmatmul.msk.f32.gmra.mxu2 %vm1883_vm14, %v1802_v40 }
 0x904   : > { %1921 = vmatmul.f32.gmra.mxu1 %v1801_v32 }
 0x969   : > { %v1913_v47 = vpop.f32.mrf.mxu1 }
 0x96a   : > { %v1914_v45 = vadd.f32 %v1913_v47, %v1810_v0  ;;  %v1825_v47 = vpop.permute.xlu1 %1824 }
 0x96b   : > { %v1942_v54 = vpop.f32.mrf.mxu2 }
 0x96c   : > { %v1943_v36 = vadd.f32 %v1942_v54, %v1914_v45 }
 0x96e   : > { %v6558_v48 = vmax.f32 %v1943_v36, 0.0 }
 0x970   : > { %1958 = vrot.lane.b32.xlu2 %v6558_v48, %s8042_s0 }
 0x971   : > { %v1916_v46 = vpop.f32.mrf.mxu1 }
 0x972   : > { %v1917_v31 = vadd.f32 %v1916_v46, %v1815_v56 }
 0x973   : > { %v1945_v25 = vpop.f32.mrf.mxu2 }
 0x974   : > { %v1946_v14 = vadd.f32 %v1945_v25, %v1917_v31 }
 0x976   : > { %v6562_v50 = vmax.f32 %v1946_v14, 0.0 }
 0x978   : > { %1961 = vrot.lane.b32.xlu0 %v6562_v50, %s8042_s0 }
 0x979   : > { %v1919_v40 = vpop.f32.mrf.mxu1 }
 0x97a   : > { %v1920_v32 = vadd.f32 %v1919_v40, %v1820_v39 }
 0x97b   : > { %v1948_v18 = vpop.f32.mrf.mxu2 }
 0x97c   : > { %v1949_v0 = vadd.f32 %v1948_v18, %v1920_v32 }
 0x97e   : > { %v6566_v54 = vmax.f32 %v1949_v0, 0.0 }
 0x980   : > { %1964 = vrot.lane.b32.xlu1 %v6566_v54, %s8042_s0 }
 0x981   : > { %v1922_v45 = vpop.f32.mrf.mxu1 }
 0x982   : > { %v1923_v56 = vadd.f32 %v1922_v45, %v1825_v47 }
 0x983   : > { %v1951_v36 = vpop.f32.mrf.mxu2 }
 0x984   : > { %v1952_v25 = vadd.f32 %v1951_v36, %v1923_v56 }
 0x986   : > { %v6570_v46 = vmax.f32 %v1952_v25, 0.0 }
 0x988   : > { %1967 = vrot.lane.b32.xlu2 %v6570_v46, %s8042_s0 }
 0x9ca   : > { %v1959_v31 = vpop.permute.xlu2 %1958 }
 0x9cb   : > { %v1960_v14 = vsel %vm1678_vm13, %v1959_v31, %v6558_v48 }
 0x9cc   : > { %1970 = vrot.lane.b32.xlu0 %v1960_v14, %s8042_s0 }
 0x9e2   : > { %v1968_v18 = vpop.permute.xlu2 %1967 }
 0x9e3   : > { %v1969_v39 = vsel %vm1678_vm13, %v1968_v18, %v6570_v46 }
 0x9e4   : > { %1976 = vrot.lane.b32.xlu0 %v1969_v39, %s8042_s0 }
 0x9ea   : > { %v1962_v40 = vpop.permute.xlu0 %1961 }
 0x9eb   : > { %v1963_v32 = vsel %vm1678_vm13, %v1962_v40, %v6562_v50 }
 0x9ec   : > { %1972 = vrot.lane.b32.xlu1 %v1963_v32, %s8042_s0 }
 0x9f2   : > { %v1965_v0 = vpop.permute.xlu1 %1964 }
 0x9f3   : > { %v1966_v47 = vsel %vm1678_vm13, %v1965_v0, %v6566_v54 }
 0x9f4   : > { %1974 = vrot.lane.b32.xlu2 %v1966_v47, %s8042_s0  ;;  %s8159_s0 = sld [smem:[#allocation13_spill]] }
 0xa3e   : > { %v1971_v45 = vpop.permute.xlu0 %1970 }
 0xa3f   : > { %v1978_v36 = vsel %vm1678_vm13, %v1971_v45, %v6558_v48 }
 0xa40   : > { %2002 = vrot.lane.b32.xlu2 %v1978_v36, %s8034_s7  ;;  %1986 = vrot.lane.b32.xlu1 %v1978_v36, %s8044_s11  ;;  %v6660_v41 = vmul.f32 %v1978_v36, %v6509_v26  ;;  %v6663_v29 = vmul.f32 %v1978_v36, %v6492_v53  ;;  %v6666_v57 = vmul.f32 %v1978_v36, %v6512_v55 }
 0xa41   : > { %2018 = vrot.lane.b32.xlu0 %v1978_v36, %s5876_s1  ;;  %v6669_v58 = vmul.f32 %v1978_v36, %v6521_v51  ;;  %v6672_v59 = vmul.f32 %v1978_v36, %v6505_v52  ;;  %v6677_v42 = vmul.f32 %v1978_v36, %v6489_v38  ;;  %v6680_v61 = vmul.f32 %v1978_v36, %v6531_v62 }
 0xa42   : > { %v6683_v12 = vmul.f32 %v1978_v36, %v6501_v30 }
 0xa4e   : > { %v1975_v56 = vpop.permute.xlu2 %1974 }
 0xa4f   : > { %v1980_v25 = vsel %vm1678_vm13, %v1975_v56, %v6566_v54 }
 0xa50   : > { %v6594_v31 = vmul.f32 %v1980_v25, %v6509_v26  ;;  %v6597_v18 = vmul.f32 %v1980_v25, %v6489_v38  ;;  %v6600_v39 = vmul.f32 %v1980_v25, %v6505_v52  ;;  %v6603_v40 = vmul.f32 %v1980_v25, %v6492_v53 }
 0xa51   : > { %v6606_v32 = vmul.f32 %v1980_v25, %v6501_v30  ;;  %v6611_v47 = vmul.f32 %v1980_v25, %v6512_v55  ;;  %v6614_v45 = vmul.f32 %v1980_v25, %v6521_v51  ;;  %v6617_v56 = vmul.f32 %v1980_v25, %v6531_v62 }
 0xa56   : > { %v1977_v14 = vpop.permute.xlu0 %1976 }
 0xa57   : > { %v1981_v0 = vsel %vm1678_vm13, %v1977_v14, %v6570_v46 }
 0xa58   : > { %v6620_v35 = vmul.f32 %v1981_v0, %v6509_v26  ;;  %v6623_v17 = vmul.f32 %v1981_v0, %v6489_v38  ;;  %v6626_v34 = vmul.f32 %v1981_v0, %v6505_v52  ;;  %v6629_v14 = vmul.f32 %v1981_v0, %v6492_v53 }
 0xa59   : > { %v6632_v20 = vmul.f32 %v1981_v0, %v6501_v30  ;;  %v6635_v19 = vmul.f32 %v1981_v0, %v6512_v55  ;;  %v6638_v44 = vmul.f32 %v1981_v0, %v6521_v51  ;;  %v6641_v43 = vmul.f32 %v1981_v0, %v6531_v62 }
 0xa5e   : > { %v1973_v5 = vpop.permute.xlu1 %1972 }
 0xa5f   : > { %v1979_v63 = vsel %vm1678_vm13, %v1973_v5, %v6562_v50 }
 0xa60   : > { %2004 = vrot.lane.b32.xlu2 %v1979_v63, %s8034_s7  ;;  %1988 = vrot.lane.b32.xlu1 %v1979_v63, %s8044_s11  ;;  %v6688_v27 = vmul.f32 %v1979_v63, %v6509_v26  ;;  %v6691_v23 = vmul.f32 %v1979_v63, %v6492_v53  ;;  %v6694_v5 = vmul.f32 %v1979_v63, %v6512_v55 }
 0xa61   : > { %2020 = vrot.lane.b32.xlu0 %v1979_v63, %s5876_s1  ;;  %v6698_v22 = vmul.f32 %v1979_v63, %v6521_v51  ;;  %v6701_v36 = vmul.f32 %v1979_v63, %v6505_v52  ;;  %v6704_v8 = vmul.f32 %v1979_v63, %v6489_v38  ;;  %v6707_v15 = vmul.f32 %v1979_v63, %v6531_v62 }
 0xa62   : > { %v6716_v21 = vmul.f32 %v1979_v63, %v6501_v30  ;;  %v2079_v63 = vld [vmem:[%s8086_s3 + $0x10] sm:$0xff] }
 0xa64   : > { %8149 = vst [vmem:[#allocation87_spill] sm:$0xff] %v6716_v21 }
 0xa68   : > { %2006 = vrot.lane.b32.xlu2 %v1980_v25, %s8034_s7  ;;  %1990 = vrot.lane.b32.xlu1 %v1980_v25, %s8044_s11 }
 0xa69   : > { %2022 = vrot.lane.b32.xlu0 %v1980_v25, %s5876_s1  ;;  %v2078_v25 = vld [vmem:[%s8086_s3 + $0x8] sm:$0xff]  ;;  %s8166_s3 = smov 7  }
 0xa70   : > { %2008 = vrot.lane.b32.xlu2 %v1981_v0, %s8034_s7  ;;  %1992 = vrot.lane.b32.xlu1 %v1981_v0, %s8044_s11  ;;  %s8155_s7 = sld [smem:[#allocation18_spill]] }
 0xa71   : > { %2024 = vrot.lane.b32.xlu0 %v1981_v0, %s5876_s1  ;;  %v2081_v0 = vld [vmem:[%s8083_s8] sm:$0xff]  ;;  %s8152_s1 = sld [smem:[#allocation11_spill]]  ;;  %s8177_s8 = smov 11  }
 0xa78   : > { %2156 = vperm.xlu2 %5041, %v2079_v63   ;;  %2161 = vperm.xlu1 %5020, %v2080_v28   ;;  %v2206_v28 = vld [vmem:[%s8150_s26 + $0x10] sm:$0xff]  ;;  %v2207_v63 = vld [vmem:[%s8150_s26 + $0x18] sm:$0xff] }
 0xa79   : > { %2185 = vperm.xlu0 %5127, %v2084_v33   ;;  %v2205_v33 = vld [vmem:[%s8150_s26 + $0x8] sm:$0xff] }
 0xa80   : > { %2180 = vperm.xlu2 %5041, %v2083_v24   ;;  %2151 = vperm.xlu1 %5020, %v2078_v25   ;;  %v2208_v24 = vld [vmem:[%s8150_s26 + $0x20] sm:$0xff]  ;;  %v2211_v25 = vld [vmem:[%s8150_s26 + $0x38] sm:$0xff] }
 0xa81   : > { %2146 = vperm.xlu0 %5127, %v2077_v16   ;;  %v2034_v16 = vld [vmem:[%s8151_s15] sm:$0xff] }
 0xa82   : > { %2063 = vmatpush.msrb.mxu3 %v2034_v16 }
 0xa88   : > { %2170 = vperm.xlu2 %5041, %v2081_v0   ;;  %2175 = vperm.xlu1 %5020, %v2082_v7   ;;  %v2210_v0 = vld [vmem:[%s8150_s26 + $0x30] sm:$0xff] }
 0xa89   : > { %2218 = vperm.xlu0 %5127, %v2204_v6  }
 0xa90   : > { %2228 = vperm.xlu2 %5041, %v2206_v28   ;;  %2223 = vperm.xlu1 %5020, %v2205_v33  }
 0xa91   : > { %2233 = vperm.xlu0 %5127, %v2207_v63  }
 0xa98   : > { %2238 = vperm.xlu2 %5041, %v2208_v24   ;;  %2243 = vperm.xlu1 %5020, %v2209_v37  }
 0xa99   : > { %2253 = vperm.xlu0 %5127, %v2211_v25  }
 0xa9a   : > { %v2003_v13 = vpop.permute.xlu2 %2002 }
 0xaa0   : > { %2248 = vperm.xlu1 %5020, %v2210_v0  }
 0xab2   : > { %v1987_v6 = vpop.permute.xlu1 %1986 }
 0xab3   : > { %v1998_v7 = vmax.f32 %v6558_v48, %v1987_v6  ;;  %v2019_v28 = vpop.permute.xlu0 %2018 }
 0xab5   : > { %v2014_v4 = vmax.f32 %v1998_v7, %v2003_v13 }
 0xab7   : > { %v2030_v33 = vmax.f32 %v2014_v4, %v2019_v28 }
 0xab9   : > { %4858 = vmatmul.msk.f32.vlgmr.msrb.gmra.mxu3 %vm1883_vm14, %v2030_v33 }
 0xaba   : > { %v2005_v63 = vpop.permute.xlu2 %2004 }
 0xac2   : > { %v2007_v25 = vpop.permute.xlu2 %2006 }
 0xaca   : > { %v2009_v28 = vpop.permute.xlu2 %2008 }
 0xad2   : > { %v1989_v11 = vpop.permute.xlu1 %1988 }
 0xad3   : > { %v1999_v49 = vmax.f32 %v6562_v50, %v1989_v11  ;;  %v2021_v3 = vpop.permute.xlu0 %2020 }
 0xad5   : > { %v2015_v24 = vmax.f32 %v1999_v49, %v2005_v63  ;;  %v5877_v49 = vmov 32.0  }
 0xad6   : > { %5727 = vrcp.f32 %v5877_v49 }
 0xad7   : > { %v2031_v37 = vmax.f32 %v2015_v24, %v2021_v3 }
 0xad9   : > { %4859 = vmatmul.msk.f32.gmra.mxu3 %vm1883_vm14, %v2031_v37 }
 0xada   : > { %v1991_v16 = vpop.permute.xlu1 %1990 }
 0xadb   : > { %v2000_v0 = vmax.f32 %v6566_v54, %v1991_v16  ;;  %v2023_v6 = vpop.permute.xlu0 %2022 }
 0xadd   : > { %v2016_v10 = vmax.f32 %v2000_v0, %v2007_v25 }
 0xadf   : > { %v2032_v13 = vmax.f32 %v2016_v10, %v2023_v6  ;;  %v5728_v10 = vpop.eup %5727 }
 0xae0   : > { %vm2104_vm9 = vweird.f32 %v5728_v10 }
 0xae1   : > { %4860 = vmatmul.msk.f32.gmra.mxu3 %vm1883_vm14, %v2032_v13 }
 0xae2   : > { %v1993_v4 = vpop.permute.xlu1 %1992 }
 0xae3   : > { %v2001_v7 = vmax.f32 %v6570_v46, %v1993_v4  ;;  %v2025_v11 = vpop.permute.xlu0 %2024 }
 0xae5   : > { %v2017_v33 = vmax.f32 %v2001_v7, %v2009_v28 }
 0xae7   : > { %v2033_v2 = vmax.f32 %v2017_v33, %v2025_v11 }
 0xae9   : > { %4861 = vmatmul.msk.f32.gmra.mxu3 %vm1883_vm14, %v2033_v2  ;;  %v2100_v2 = vmul.f32 32.0, %v5728_v10 }
 0xaeb   : > { %v2101_v7 = vsub.f32 1.0, %v2100_v2 }
 0xaed   : > { %v2102_v11 = vmul.f32 %v5728_v10, %v2101_v7 }
 0xaef   : > { %v2103_v1 = vadd.f32 %v5728_v10, %v2102_v11 }
 0xaf1   : > { %v6776_v38 = vsel %vm2104_vm9, %v5728_v10, %v2103_v1 }
 0xb3c   : > { %v6760_v3 = vpop.f32.mrf.mxu3 }
 0xb3d   : > { %v2086_v25 = vsel %vm2085_vm15, %v6760_v3, 0.0 }
 0xb5c   : > { %v6762_v63 = vpop.f32.mrf.mxu3 }
 0xb5d   : > { %v2087_v37 = vsel %vm2085_vm15, %v6762_v63, 0.0 }
 0xb5e   : > { %v2088_v0 = vadd.f32 %v2087_v37, %v2086_v25 }
 0xb64   : > { %v6764_v24 = vpop.f32.mrf.mxu3 }
 0xb65   : > { %v2089_v16 = vsel %vm2085_vm15, %v6764_v24, 0.0 }
 0xb66   : > { %v2090_v6 = vadd.f32 %v2089_v16, %v2088_v0 }
 0xb6c   : > { %v6772_v13 = vpop.f32.mrf.mxu3 }
 0xb6d   : > { %v2091_v4 = vsel %vm2085_vm15, %v6772_v13, 0.0 }
 0xb6e   : > { %v2092_v28 = vadd.f32 %v2091_v4, %v2090_v6 }
 0xb70   : > { %v2093_v33 = vrot.slane %v2092_v28, 4 }
 0xb72   : > { %v2094_v49 = vadd.f32 %v2093_v33, %v2092_v28 }
 0xb74   : > { %v2095_v9 = vrot.slane %v2094_v49, 2 }
 0xb76   : > { %v2096_v60 = vadd.f32 %v2095_v9, %v2094_v49 }
 0xb78   : > { %v2097_v51 = vrot.slane %v2096_v60, 1 }
 0xb7a   : > { %v2098_v52 = vadd.f32 %v2097_v51, %v2096_v60 }
 0xb7c   : > { %v2106_v37 = vmul.f32 %v6776_v38, %v2098_v52 }
 0xb7e   : > { %v2107_v25 = vsub.f32 %v6760_v3, %v2106_v37  ;;  %v2108_v16 = vsub.f32 %v6762_v63, %v2106_v37  ;;  %v2109_v2 = vsub.f32 %v6764_v24, %v2106_v37  ;;  %v2110_v0 = vsub.f32 %v6772_v13, %v2106_v37 }
 0xb80   : > { %v2111_v6 = vmul.f32 %v2107_v25, %v2107_v25  ;;  %v2112_v4 = vmul.f32 %v2108_v16, %v2108_v16  ;;  %v2113_v7 = vmul.f32 %v2109_v2, %v2109_v2  ;;  %v2114_v28 = vmul.f32 %v2110_v0, %v2110_v0 }
 0xb82   : > { %v2115_v9 = vsel %vm2085_vm15, %v2111_v6, 0.0  ;;  %v2116_v1 = vsel %vm2085_vm15, %v2112_v4, 0.0  ;;  %v2118_v60 = vsel %vm2085_vm15, %v2113_v7, 0.0  ;;  %v2120_v51 = vsel %vm2085_vm15, %v2114_v28, 0.0  ;;  %v2162_v6 = vpop.permute.xlu1 %2161  ;;  %v2157_v4 = vpop.permute.xlu2 %2156 }
 0xb83   : > { %v2117_v10 = vadd.f32 %v2116_v1, %v2115_v9 }
 0xb85   : > { %v2119_v52 = vadd.f32 %v2118_v60, %v2117_v10  ;;  %v2186_v10 = vpop.permute.xlu0 %2185 }
 0xb87   : > { %v2121_v33 = vadd.f32 %v2120_v51, %v2119_v52 }
 0xb89   : > { %v2122_v11 = vrot.slane %v2121_v33, 4 }
 0xb8a   : > { %v2152_v28 = vpop.permute.xlu1 %2151 }
 0xb8b   : > { %v2123_v49 = vadd.f32 %v2122_v11, %v2121_v33 }
 0xb8d   : > { %v2124_v53 = vrot.slane %v2123_v49, 2 }
 0xb8f   : > { %v2125_v55 = vadd.f32 %v2124_v53, %v2123_v49  ;;  %v2181_v53 = vpop.permute.xlu2 %2180 }
 0xb91   : > { %v2126_v37 = vrot.slane %v2125_v55, 1 }
 0xb93   : > { %v2127_v30 = vadd.f32 %v2126_v37, %v2125_v55 }
 0xb95   : > { %v2128_v26 = vmul.f32 %v2127_v30, %v6776_v38 }
 0xb97   : > { %v2129_v62 = vadd.f32 1e-05, %v2128_v26 }
 0xb99   : > { %5729 = vrsqrt.f32 %v2129_v62  ;;  %vm2136_vm9 = vweird.f32 %v2129_v62 }
 0xb9f   : > { %v5730_v21 = vpop.eup %5729 }
 0xba0   : > { %v2131_v9 = vmul.f32 %v5730_v21, %v2129_v62  ;;  %vm2137_vm11 = vweird.f32 %v5730_v21  ;;  %v2176_v62 = vpop.permute.xlu1 %2175 }
 0xba1   : > { %vm2138_vm6 = vmor %vm2136_vm9, %vm2137_vm11  ;;  %vm2422_vm11 = vcmask 27648  }
 0xba2   : > { %v2132_v1 = vmul.f32 %v5730_v21, %v2131_v9 }
 0xba4   : > { %v2133_v7 = vmul.f32 0.5, %v2132_v1  ;;  %v2147_v1 = vpop.permute.xlu0 %2146 }
 0xba6   : > { %v2134_v60 = vsub.f32 1.5, %v2133_v7 }
 0xba8   : > { %v2135_v52 = vmul.f32 %v5730_v21, %v2134_v60 }
 0xbaa   : > { %v2139_v51 = vsel %vm2138_vm6, %v5730_v21, %v2135_v52  ;;  %vm2276_vm6 = vcmask 261120   ;;  %v2198_v52 = vld [vmem:[%s8152_s1 + $0x30] sm:$0xff] }
 0xbab   : > { %v2143_v55 = vmul.f32 %v2139_v51, %v2110_v0  ;;  %v2142_v33 = vmul.f32 %v2139_v51, %v2109_v2  ;;  %v2141_v30 = vmul.f32 %v2139_v51, %v2108_v16  ;;  %v2140_v49 = vmul.f32 %v2139_v51, %v2107_v25  ;;  %v2171_v2 = vpop.permute.xlu2 %2170  ;;  %v2192_v0 = vld [vmem:[%s8152_s1] sm:$0xff]  ;;  %v2193_v25 = vld [vmem:[%s8152_s1 + $0x8] sm:$0xff] }
 0xbac   : > { %v2219_v51 = vpop.permute.xlu0 %2218 }
 0xbad   : > { %v2167_v26 = vmul.f32 %v2162_v6, %v2143_v55  ;;  %v2166_v11 = vmul.f32 %v2157_v4, %v2142_v33  ;;  %v2165_v9 = vmul.f32 %v2152_v28, %v2141_v30  ;;  %v2164_v60 = vmul.f32 %v2147_v1, %v2140_v49  ;;  %v2194_v6 = vld [vmem:[%s8152_s1 + $0x10] sm:$0xff]  ;;  %v2195_v4 = vld [vmem:[%s8152_s1 + $0x18] sm:$0xff]  ;;  %v2197_v28 = vld [vmem:[%s8152_s1 + $0x28] sm:$0xff]  ;;  %v2224_v30 = vpop.permute.xlu1 %2223 }
 0xbaf   : > { %v2191_v37 = vadd.f32 %v2186_v10, %v2167_v26  ;;  %v2190_v7 = vadd.f32 %v2181_v53, %v2166_v11  ;;  %v2189_v21 = vadd.f32 %v2176_v62, %v2165_v9  ;;  %v2188_v16 = vadd.f32 %v2171_v2, %v2164_v60  ;;  %v2196_v10 = vld [vmem:[%s8152_s1 + $0x20] sm:$0xff]  ;;  %v2199_v53 = vld [vmem:[%s8152_s1 + $0x38] sm:$0xff] }
 0xbb1   : > { %2325 = vmatpush.msra.mxu0 %v2191_v37 }
 0xbb3   : > { %2326 = vmatpush.msra.mxu0 %v2190_v7  ;;  %v2229_v49 = vpop.permute.xlu2 %2228 }
 0xbb4   : > { %v2234_v1 = vpop.permute.xlu0 %2233 }
 0xbb5   : > { %2327 = vmatpush.msra.mxu0 %v2189_v21  ;;  %v2244_v21 = vpop.permute.xlu1 %2243 }
 0xbb7   : > { %2328 = vmatpush.msra.mxu0 %v2188_v16 }
 0xbb8   : > { %4862 = vmatmul.msk.f32.vlgmr.msra.gmra.mxu0 %vm2276_vm6, %v2192_v0 }
 0xbbb   : > { %v2239_v0 = vpop.permute.xlu2 %2238 }
 0xbc0   : > { %4863 = vmatmul.msk.f32.gmra.mxu0 %vm2276_vm6, %v2193_v25 }
 0xbc8   : > { %4864 = vmatmul.msk.f32.gmra.mxu0 %vm2276_vm6, %v2194_v6 }
 0xbd0   : > { %4865 = vmatmul.msk.f32.gmra.mxu0 %vm2276_vm6, %v2195_v4  ;;  %v2254_v4 = vpop.permute.xlu0 %2253 }
 0xbd8   : > { %4866 = vmatmul.msk.f32.gmra.mxu0 %vm2276_vm6, %v2196_v10 }
 0xbe0   : > { %4867 = vmatmul.msk.f32.gmra.mxu0 %vm2276_vm6, %v2197_v28 }
 0xbe8   : > { %4868 = vmatmul.msk.f32.gmra.mxu0 %vm2276_vm6, %v2198_v52  ;;  %v2249_v52 = vpop.permute.xlu1 %2248 }
 0xbf0   : > { %4869 = vmatmul.msk.f32.gmra.mxu0 %vm2276_vm6, %v2199_v53 }
 0xc35   : > { %v2330_v55 = vpop.f32.mrf.mxu0 }
 0xc36   : > { %v2331_v33 = vadd.f32 %v2330_v55, %v2219_v51 }
 0xc38   : > { %2366 = vxpose.xlu2.b32.start [1/2] (short) (narrow) %v2331_v33, 8 }
 0xc3d   : > { %v2333_v26 = vpop.f32.mrf.mxu0 }
 0xc3e   : > { %v2334_v11 = vadd.f32 %v2333_v26, %v2224_v30 }
 0xc40   : > { %2367 = vxpose.xlu2.b32.end [2/2] (short) (narrow) %v2334_v11, 8  ;;  %v2665_v11 = vld [vmem:[%s8153_s16 + $0x8] sm:$0xff] }
 0xc45   : > { %v2336_v37 = vpop.f32.mrf.mxu0 }
 0xc46   : > { %v2337_v9 = vadd.f32 %v2336_v37, %v2229_v49 }
 0xc48   : > { %2479 = vxpose.xlu0.b32.start [1/2] (short) (narrow) %v2337_v9, 8 }
 0xc4d   : > { %v2339_v7 = vpop.f32.mrf.mxu0 }
 0xc4e   : > { %v2340_v60 = vadd.f32 %v2339_v7, %v2234_v1  ;;  %v2785_v1 = vld [vmem:[%s8154_s22 + $0x30] sm:$0xff]  ;;  %v2782_v7 = vld [vmem:[%s8154_s22 + $0x18] sm:$0xff] }
 0xc50   : > { %2480 = vxpose.xlu0.b32.end [2/2] (short) (narrow) %v2340_v60, 8  ;;  %v2779_v60 = vld [vmem:[%s8154_s22] sm:$0xff] }
 0xc55   : > { %v2342_v62 = vpop.f32.mrf.mxu0 }
 0xc56   : > { %v2343_v25 = vadd.f32 %v2342_v62, %v2239_v0  ;;  %v2970_v62 = vld [vmem:[%s8155_s7 + $0x10] sm:$0xff] }
 0xc5d   : > { %v2345_v2 = vpop.f32.mrf.mxu0 }
 0xc5e   : > { %v2346_v16 = vadd.f32 %v2345_v2, %v2244_v21  ;;  %v2200_v21 = vld [vmem:[%s8152_s1 + $0x40] sm:$0xff]  ;;  %v2201_v2 = vld [vmem:[%s8152_s1 + $0x48] sm:$0xff] }
 0xc5f   : > { %4870 = vmatmul.msk.f32.gmra.mxu0 %vm2276_vm6, %v2200_v21  ;;  %v2597_v21 = vld [vmem:[%s8157_s10 + $0x10] sm:$0xff] }
 0xc60   : > { %2415 = vmatpush.msra.mxu2 %v2346_v16  ;;  %v2202_v16 = vld [vmem:[%s8152_s1 + $0x50] sm:$0xff] }
 0xc62   : > { %2416 = vmatpush.msra.mxu2 %v2343_v25 }
 0xc65   : > { %v2348_v6 = vpop.f32.mrf.mxu0 }
 0xc66   : > { %v2349_v53 = vadd.f32 %v2348_v6, %v2249_v52 }
 0xc67   : > { %4871 = vmatmul.msk.f32.gmra.mxu0 %vm2276_vm6, %v2201_v2  ;;  %v2969_v2 = vld [vmem:[%s8155_s7 + $0x8] sm:$0xff] }
 0xc6d   : > { %v2351_v10 = vpop.f32.mrf.mxu0 }
 0xc6e   : > { %v2352_v28 = vadd.f32 %v2351_v10, %v2254_v4  ;;  %v2203_v4 = vld [vmem:[%s8152_s1 + $0x58] sm:$0xff]  ;;  %s8164_s1 = smov 10  }
 0xc6f   : > { %4872 = vmatmul.msk.f32.gmra.mxu0 %vm2276_vm6, %v2202_v16  ;;  %v2598_v16 = vld [vmem:[%s8157_s10 + $0x18] sm:$0xff] }
 0xc70   : > { %2528 = vmatpush.msrb.mxu2 %v2352_v28 }
 0xc72   : > { %2529 = vmatpush.msrb.mxu2 %v2349_v53 }
 0xc77   : > { %4873 = vmatmul.msk.f32.gmra.mxu0 %vm2276_vm6, %v2203_v4  ;;  %v2671_v4 = vld [vmem:[%s8156_s23 + $0x18] sm:$0xff] }
 0xcd1   : > { %v2382_v51 = vpop.trf.xlu2 }
 0xcd2   : > { %4874 = vmatmul.msk.f32.vlgmr.msra.gmra.mxu2 %vm1883_vm14, %v2382_v51 }
 0xcec   : > { %v2495_v55 = vpop.trf.xlu0 }
 0xced   : > { %4878 = vmatmul.msk.f32.vlgmr.msrb.gmra.mxu2 %vm1883_vm14, %v2495_v55  ;;  %v2214_v55 = vld [vmem:[%s8150_s26 + $0x50] sm:$0xff] }
 0xd55   : > { %v2418_v33 = vpop.f32.mrf.mxu2 }
 0xd56   : > { %v2421_v30 = vmul.f32 0.25, %v2418_v33 }
 0xd58   : > { %v2423_v26 = vsel %vm2422_vm11, %v2421_v30, -inf }
 0xd59   : > { %2424 = vmax.xlane.f32.xlu2 %v2423_v26  ;;  %v2212_v26 = vld [vmem:[%s8150_s26 + $0x40] sm:$0xff] }
 0xd70   : > { %v2531_v49 = vpop.f32.mrf.mxu2 }
 0xd71   : > { %v2534_v37 = vmul.f32 0.25, %v2531_v49  ;;  %2730 = vperm.xlu2 %5041, %v2665_v11   ;;  %v2215_v11 = vld [vmem:[%s8150_s26 + $0x58] sm:$0xff]  ;;  %v2670_v49 = vld [vmem:[%s8156_s23 + $0x10] sm:$0xff] }
 0xd73   : > { %v2535_v9 = vsel %vm2422_vm11, %v2534_v37, -inf }
 0xd74   : > { %2536 = vmax.xlane.f32.xlu1 %v2535_v9  ;;  %v2786_v9 = vld [vmem:[%s8154_s22 + $0x38] sm:$0xff] }
 0xd79   : > { %2819 = vperm.xlu2 %5041, %v2785_v1   ;;  %v2595_v1 = vld [vmem:[%s8157_s10] sm:$0xff] }
 0xd81   : > { %2804 = vperm.xlu2 %5041, %v2782_v7   ;;  %v2783_v7 = vld [vmem:[%s8154_s22 + $0x20] sm:$0xff] }
 0xd89   : > { %2789 = vperm.xlu2 %5041, %v2779_v60   ;;  %v2596_v60 = vld [vmem:[%s8157_s10 + $0x8] sm:$0xff]  ;;  %s8252_s10 = sld [smem:[#allocation26_spill]] }
 0xd91   : > { %2984 = vperm.xlu2 %5041, %v2970_v62   ;;  %v2780_v62 = vld [vmem:[%s8154_s22 + $0x8] sm:$0xff] }
 0xdcc   : > { %v2425_v0 = vpop.xlane.xlu2 %2424 }
 0xdcd   : > { %v2426_v25 = vsub.f32 %v2421_v30, %v2425_v0  ;;  %v2667_v0 = vld [vmem:[%s8153_s16 + $0x18] sm:$0xff] }
 0xdcf   : > { %v2427_v6 = vmul.f32 1.442695, %v2426_v25  ;;  %v8158_v25 = vpack.i.bf16 %v6660_v41, %v6688_v27 }
 0xdd1   : > { %5731 = vpow2.f32 %v2427_v6  ;;  %v2666_v6 = vld [vmem:[%s8153_s16 + $0x10] sm:$0xff] }
 0xdd7   : > { %v6821_v10 = vpop.eup %5731 }
 0xdd8   : > { %v2429_v28 = vsel %vm2422_vm11, %v6821_v10, 0.0 }
 0xdd9   : > { %2430 = vadd.xlane.f32.xlu1 %v2429_v28  ;;  %v2664_v28 = vld [vmem:[%s8153_s16] sm:$0xff] }
 0xde7   : > { %v2537_v52 = vpop.xlane.xlu1 %2536 }
 0xde8   : > { %v2538_v53 = vsub.f32 %v2534_v37, %v2537_v52  ;;  %v2213_v37 = vld [vmem:[%s8150_s26 + $0x48] sm:$0xff] }
 0xdea   : > { %v2539_v51 = vmul.f32 1.442695, %v2538_v53  ;;  %v2669_v53 = vld [vmem:[%s8156_s23 + $0x8] sm:$0xff] }
 0xdec   : > { %5733 = vpow2.f32 %v2539_v51 }
 0xdf2   : > { %v6826_v33 = vpop.eup %5733  ;;  %2268 = vperm.xlu1 %5020, %v2214_v55  }
 0xdf3   : > { %v2541_v30 = vsel %vm2422_vm11, %v6826_v33, 0.0 }
 0xdf4   : > { %2542 = vadd.xlane.f32.xlu0 %v2541_v30 }
 0xdfa   : > { %2258 = vperm.xlu1 %5020, %v2212_v26  }
 0xe02   : > { %2273 = vperm.xlu1 %5020, %v2215_v11   ;;  %v2668_v11 = vld [vmem:[%s8156_s23] sm:$0xff] }
 0xe08   : > { %2759 = vperm.xlu0 %5127, %v2670_v49  }
 0xe0a   : > { %2263 = vperm.xlu1 %5020, %v2213_v37  }
 0xe10   : > { %2824 = vperm.xlu0 %5127, %v2786_v9  }
 0xe12   : > { %2601 = vperm.xlu1 %5020, %v2595_v1  }
 0xe18   : > { %2809 = vperm.xlu0 %5127, %v2783_v7  }
 0xe1a   : > { %2606 = vperm.xlu1 %5020, %v2596_v60   ;;  %v2784_v60 = vld [vmem:[%s8154_s22 + $0x28] sm:$0xff] }
 0xe20   : > { %2794 = vperm.xlu0 %5127, %v2780_v62  }
 0xe22   : > { %2611 = vperm.xlu1 %5020, %v2597_v21   ;;  %v2354_v21 = vpop.f32.mrf.mxu0 }
 0xe28   : > { %2979 = vperm.xlu0 %5127, %v2969_v2  }
 0xe2a   : > { %2616 = vperm.xlu1 %5020, %v2598_v16   ;;  %v2781_v16 = vld [vmem:[%s8154_s22 + $0x10] sm:$0xff] }
 0xe30   : > { %5134 = vrot.lane.b32.xlu0 %v8158_v25, %s8044_s11 }
 0xe32   : > { %2740 = vperm.xlu1 %5020, %v2667_v0  }
 0xe3a   : > { %2735 = vperm.xlu1 %5020, %v2666_v6  }
 0xe42   : > { %2764 = vperm.xlu1 %5020, %v2671_v4   ;;  %v2357_v4 = vpop.f32.mrf.mxu0 }
 0xe4a   : > { %2725 = vperm.xlu1 %5020, %v2664_v28  }
 0xe4c   : > { %v2431_v52 = vpop.xlane.xlu1 %2430 }
 0xe4d   : > { %5735 = vrcp.f32 %v2431_v52  ;;  %v2443_v26 = vand.u32 2147483648, %v2431_v52  ;;  %v2441_v27 = vand.u32 2147483647, %v2431_v52  ;;  %vm2437_vm11 = vweird.f32 %v2431_v52 }
 0xe4f   : > { %v2444_v37 = vor.u32 1.1754944e-38, %v2443_v26  ;;  %vm2442_vm5 = vcmp.eq.f32.partialorder %v2441_v27, 8.507059e+37  ;;  %v2971_v27 = vld [vmem:[%s8155_s7 + $0x18] sm:$0xff] }
 0xe52   : > { %2754 = vperm.xlu1 %5020, %v2669_v53  }
 0xe53   : > { %v5736_v51 = vpop.eup %5735 }
 0xe54   : > { %v2433_v55 = vmul.f32 %v5736_v51, %v2431_v52  ;;  %vm2438_vm9 = vweird.f32 %v5736_v51 }
 0xe55   : > { %vm2439_vm0 = vmor %vm2437_vm11, %vm2438_vm9 }
 0xe56   : > { %v2434_v30 = vsub.f32 1.0, %v2433_v55 }
 0xe58   : > { %v2435_v41 = vmul.f32 %v5736_v51, %v2434_v30 }
 0xe5a   : > { %v2436_v49 = vadd.f32 %v5736_v51, %v2435_v41  ;;  %2749 = vperm.xlu1 %5020, %v2668_v11  }
 0xe5c   : > { %v2440_v9 = vsel %vm2439_vm0, %v5736_v51, %v2436_v49 }
 0xe5d   : > { %v2445_v1 = vsel %vm2442_vm5, %v2444_v37, %v2440_v9  ;;  %v2360_v37 = vpop.f32.mrf.mxu0 }
 0xe5e   : > { %v2446_v7 = vmul.f32 %v6821_v10, %v2445_v1  ;;  %v2968_v10 = vld [vmem:[%s8155_s7] sm:$0xff]  ;;  %s8174_s7 = smov 6  }
 0xe60   : > { %4875 = vmatpush.xpose.msk.msra.mxu3 %vm2085_vm15, %v2446_v7 }
 0xe62   : > { %2814 = vperm.xlu1 %5020, %v2784_v60  }
 0xe64   : > { %v2269_v62 = vpop.permute.xlu1 %2268 }
 0xe65   : > { %v2361_v1 = vadd.f32 %v2360_v37, %v2269_v62 }
 0xe67   : > { %v2543_v2 = vpop.xlane.xlu0 %2542 }
 0xe68   : > { %5737 = vrcp.f32 %v2543_v2  ;;  %v2555_v53 = vand.u32 2147483648, %v2543_v2  ;;  %v2553_v55 = vand.u32 2147483647, %v2543_v2  ;;  %vm2549_vm5 = vweird.f32 %v2543_v2 }
 0xe6a   : > { %2799 = vperm.xlu1 %5020, %v2781_v16   ;;  %v2556_v11 = vor.u32 1.1754944e-38, %v2555_v53  ;;  %vm2554_vm11 = vcmp.eq.f32.partialorder %v2553_v55, 8.507059e+37 }
 0xe6c   : > { %v2259_v0 = vpop.permute.xlu1 %2258 }
 0xe6d   : > { %v2355_v25 = vadd.f32 %v2354_v21, %v2259_v0  ;;  %v2363_v21 = vpop.f32.mrf.mxu0 }
 0xe6e   : > { %v5738_v6 = vpop.eup %5737 }
 0xe6f   : > { %v2545_v28 = vmul.f32 %v5738_v6, %v2543_v2  ;;  %4876 = vmatmul.msk.f32.vlgmr.msra.gmra.mxu3 %vm2085_vm15, %v2355_v25  ;;  %vm2550_vm0 = vweird.f32 %v5738_v6  ;;  %v8160_v2 = vpack.i.bf16 %v6594_v31, %v6620_v35  ;;  %v2593_v35 = vld [vmem:[%s8159_s0 + $0x10] sm:$0xff]  ;;  %v2594_v31 = vld [vmem:[%s8159_s0 + $0x18] sm:$0xff] }
 0xe70   : > { %vm2551_vm9 = vmor %vm2549_vm5, %vm2550_vm0 }
 0xe71   : > { %v2546_v52 = vsub.f32 1.0, %v2545_v28 }
 0xe72   : > { %2974 = vperm.xlu1 %5020, %v2968_v10  }
 0xe73   : > { %v2547_v51 = vmul.f32 %v5738_v6, %v2546_v52 }
 0xe74   : > { %v2274_v30 = vpop.permute.xlu1 %2273 }
 0xe75   : > { %v2548_v26 = vadd.f32 %v5738_v6, %v2547_v51 }
 0xe77   : > { %v2552_v41 = vsel %vm2551_vm9, %v5738_v6, %v2548_v26  ;;  %v2591_v6 = vld [vmem:[%s8159_s0] sm:$0xff] }
 0xe78   : > { %v2557_v49 = vsel %vm2554_vm11, %v2556_v11, %v2552_v41 }
 0xe79   : > { %v2558_v9 = vmul.f32 %v6826_v33, %v2557_v49  ;;  %v2364_v33 = vadd.f32 %v2363_v21, %v2274_v30 }
 0xe7a   : > { %2989 = vperm.xlu1 %5020, %v2971_v27  }
 0xe7b   : > { %4879 = vmatpush.xpose.msk.msra.mxu2 %vm2085_vm15, %v2558_v9 }
 0xe7c   : > { %v2264_v7 = vpop.permute.xlu1 %2263 }
 0xe7d   : > { %v2358_v60 = vadd.f32 %v2357_v4, %v2264_v7  ;;  %v2592_v4 = vld [vmem:[%s8159_s0 + $0x8] sm:$0xff]  ;;  %s8162_s0 = sld [smem:[#allocation17_spill]] }
 0xe7e   : > { %4880 = vmatmul.msk.f32.vlgmr.msra.gmra.mxu2 %vm2085_vm15, %v2361_v1 }
 0xe7f   : > { %4877 = vmatmul.msk.f32.gmra.mxu3 %vm2085_vm15, %v2358_v60 }
 0xe82   : > { %5129 = vrot.lane.b32.xlu1 %v8160_v2, %s8044_s11  ;;  %s8161_s11 = sld [smem:[#allocation15_spill]] }
 0xe84   : > { %v2602_v28 = vpop.permute.xlu1 %2601 }
 0xe86   : > { %4881 = vmatmul.msk.f32.gmra.mxu2 %vm2085_vm15, %v2364_v33 }
 0xe8c   : > { %v2607_v52 = vpop.permute.xlu1 %2606 }
 0xe94   : > { %v2612_v51 = vpop.permute.xlu1 %2611 }
 0xe9c   : > { %v2617_v9 = vpop.permute.xlu1 %2616 }
 0xef2   : > { %v2473_v16 = vpop.f32.mrf.mxu3 }
 0xf01   : > { %v2585_v62 = vpop.f32.mrf.mxu2 }
 0xf02   : > { %v2476_v25 = vpop.f32.mrf.mxu3 }
 0xf09   : > { %v2588_v0 = vpop.f32.mrf.mxu2 }
 0xf0a   : > { %2643 = vmatpush.msrb.mxu3 %v2588_v0 }
 0xf0c   : > { %2644 = vmatpush.msrb.mxu3 %v2585_v62 }
 0xf0e   : > { %2645 = vmatpush.msrb.mxu3 %v2476_v25 }
 0xf10   : > { %2646 = vmatpush.msrb.mxu3 %v2473_v16 }
 0xf11   : > { %4882 = vmatmul.msk.f32.vlgmr.msrb.gmra.mxu3 %vm2276_vm6, %v2591_v6 }
 0xf19   : > { %4883 = vmatmul.msk.f32.gmra.mxu3 %vm2276_vm6, %v2592_v4 }
 0xf21   : > { %4884 = vmatmul.msk.f32.gmra.mxu3 %vm2276_vm6, %v2593_v35 }
 0xf29   : > { %4885 = vmatmul.msk.f32.gmra.mxu3 %vm2276_vm6, %v2594_v31 }
 0xf94   : > { %v2648_v10 = vpop.f32.mrf.mxu3 }
 0xf95   : > { %v2649_v26 = vadd.f32 %v2648_v10, %v2602_v28 }
 0xf97   : > { %v6880_v27 = vadd.f32 %v2649_v26, %v6760_v3 }
 0xf99   : > { %v2672_v7 = vsel %vm2085_vm15, %v6880_v27, 0.0 }
 0xf9c   : > { %v2651_v53 = vpop.f32.mrf.mxu3 }
 0xf9d   : > { %v2652_v55 = vadd.f32 %v2651_v53, %v2607_v52 }
 0xf9f   : > { %v6877_v41 = vadd.f32 %v2652_v55, %v6762_v63  ;;  %v2741_v55 = vpop.permute.xlu1 %2740 }
 0xfa1   : > { %v2673_v37 = vsel %vm2085_vm15, %v6877_v41, 0.0 }
 0xfa2   : > { %v2674_v63 = vadd.f32 %v2673_v37, %v2672_v7 }
 0xfa4   : > { %v2654_v30 = vpop.f32.mrf.mxu3 }
 0xfa5   : > { %v2655_v11 = vadd.f32 %v2654_v30, %v2612_v51 }
 0xfa7   : > { %v6883_v49 = vadd.f32 %v2655_v11, %v6764_v24 }
 0xfa9   : > { %v2675_v60 = vsel %vm2085_vm15, %v6883_v49, 0.0 }
 0xfaa   : > { %v2676_v3 = vadd.f32 %v2675_v60, %v2674_v63 }
 0xfac   : > { %v2657_v1 = vpop.f32.mrf.mxu3 }
 0xfad   : > { %v2658_v21 = vadd.f32 %v2657_v1, %v2617_v9 }
 0xfaf   : > { %v6892_v2 = vadd.f32 %v2658_v21, %v6772_v13 }
 0xfb1   : > { %v2677_v24 = vsel %vm2085_vm15, %v6892_v2, 0.0 }
 0xfb2   : > { %v2678_v33 = vadd.f32 %v2677_v24, %v2676_v3  ;;  %v2736_v3 = vpop.permute.xlu1 %2735 }
 0xfb4   : > { %v2679_v62 = vrot.slane %v2678_v33, 4 }
 0xfb6   : > { %v2680_v16 = vadd.f32 %v2679_v62, %v2678_v33 }
 0xfb8   : > { %v2681_v0 = vrot.slane %v2680_v16, 2 }
 0xfba   : > { %v2682_v25 = vadd.f32 %v2681_v0, %v2680_v16 }
 0xfbc   : > { %v2683_v6 = vrot.slane %v2682_v25, 1 }
 0xfbe   : > { %v2684_v4 = vadd.f32 %v2683_v6, %v2682_v25  ;;  %v2765_v25 = vpop.permute.xlu1 %2764 }
 0xfc0   : > { %v2685_v35 = vmul.f32 %v2684_v4, %v6776_v38 }
 0xfc2   : > { %v2686_v31 = vsub.f32 %v6880_v27, %v2685_v35  ;;  %v2687_v28 = vsub.f32 %v6877_v41, %v2685_v35  ;;  %v2688_v13 = vsub.f32 %v6883_v49, %v2685_v35  ;;  %v2689_v10 = vsub.f32 %v6892_v2, %v2685_v35 }
 0xfc4   : > { %v2690_v52 = vmul.f32 %v2686_v31, %v2686_v31  ;;  %v2691_v53 = vmul.f32 %v2687_v28, %v2687_v28  ;;  %v2692_v51 = vmul.f32 %v2688_v13, %v2688_v13  ;;  %v2693_v30 = vmul.f32 %v2689_v10, %v2689_v10 }
 0xfc6   : > { %v2694_v26 = vsel %vm2085_vm15, %v2690_v52, 0.0  ;;  %v2695_v11 = vsel %vm2085_vm15, %v2691_v53, 0.0  ;;  %v2697_v9 = vsel %vm2085_vm15, %v2692_v51, 0.0  ;;  %v2699_v7 = vsel %vm2085_vm15, %v2693_v30, 0.0  ;;  %v2726_v35 = vpop.permute.xlu1 %2725 }
 0xfc7   : > { %v2696_v37 = vadd.f32 %v2695_v11, %v2694_v26 }
 0xfc9   : > { %v2698_v1 = vadd.f32 %v2697_v9, %v2696_v37 }
 0xfcb   : > { %v2700_v60 = vadd.f32 %v2699_v7, %v2698_v1 }
 0xfcd   : > { %v2701_v21 = vrot.slane %v2700_v60, 4 }
 0xfce   : > { %v2755_v11 = vpop.permute.xlu1 %2754 }
 0xfcf   : > { %v2702_v63 = vadd.f32 %v2701_v21, %v2700_v60 }
 0xfd1   : > { %v2703_v24 = vrot.slane %v2702_v63, 2 }
 0xfd3   : > { %v2704_v33 = vadd.f32 %v2703_v24, %v2702_v63  ;;  %v2731_v63 = vpop.permute.xlu2 %2730 }
 0xfd5   : > { %v2705_v62 = vrot.slane %v2704_v33, 1 }
 0xfd7   : > { %v2706_v16 = vadd.f32 %v2705_v62, %v2704_v33  ;;  %v2760_v62 = vpop.permute.xlu0 %2759 }
 0xfd9   : > { %v2707_v0 = vmul.f32 %v2706_v16, %v6776_v38 }
 0xfdb   : > { %v2708_v6 = vadd.f32 1e-05, %v2707_v0 }
 0xfdd   : > { %5739 = vrsqrt.f32 %v2708_v6  ;;  %vm2715_vm5 = vweird.f32 %v2708_v6 }
 0xfe3   : > { %v5740_v4 = vpop.eup %5739 }
 0xfe4   : > { %v2710_v52 = vmul.f32 %v5740_v4, %v2708_v6  ;;  %vm2716_vm0 = vweird.f32 %v5740_v4  ;;  %v2775_v6 = vld [vmem:[%s8161_s11 + $0x20] sm:$0xff] }
 0xfe5   : > { %vm2717_vm9 = vmor %vm2715_vm5, %vm2716_vm0 }
 0xfe6   : > { %v2711_v53 = vmul.f32 %v5740_v4, %v2710_v52  ;;  %v2778_v52 = vld [vmem:[%s8161_s11 + $0x38] sm:$0xff] }
 0xfe8   : > { %v2712_v51 = vmul.f32 0.5, %v2711_v53 }
 0xfea   : > { %v2713_v26 = vsub.f32 1.5, %v2712_v51 }
 0xfec   : > { %v2714_v30 = vmul.f32 %v5740_v4, %v2713_v26 }
 0xfee   : > { %v2718_v37 = vsel %vm2717_vm9, %v5740_v4, %v2714_v30  ;;  %v2776_v4 = vld [vmem:[%s8161_s11 + $0x28] sm:$0xff] }
 0xfef   : > { %v2722_v9 = vmul.f32 %v2718_v37, %v2689_v10  ;;  %v2721_v1 = vmul.f32 %v2718_v37, %v2688_v13  ;;  %v2720_v7 = vmul.f32 %v2718_v37, %v2687_v28  ;;  %v2719_v21 = vmul.f32 %v2718_v37, %v2686_v31  ;;  %v2750_v13 = vpop.permute.xlu1 %2749  ;;  %v2771_v31 = vld [vmem:[%s8161_s11] sm:$0xff] }
 0xff1   : > { %v2746_v38 = vmul.f32 %v2741_v55, %v2722_v9  ;;  %v2745_v60 = vmul.f32 %v2736_v3, %v2721_v1  ;;  %v2744_v33 = vmul.f32 %v2731_v63, %v2720_v7  ;;  %v2743_v0 = vmul.f32 %v2726_v35, %v2719_v21  ;;  %v2772_v55 = vld [vmem:[%s8161_s11 + $0x8] sm:$0xff]  ;;  %v2773_v3 = vld [vmem:[%s8161_s11 + $0x10] sm:$0xff]  ;;  %v2820_v9 = vpop.permute.xlu2 %2819 }
 0xff2   : > { %v2777_v35 = vld [vmem:[%s8161_s11 + $0x30] sm:$0xff] }
 0xff3   : > { %v2770_v24 = vadd.f32 %v2765_v25, %v2746_v38  ;;  %v2769_v16 = vadd.f32 %v2760_v62, %v2745_v60  ;;  %v2768_v10 = vadd.f32 %v2755_v11, %v2744_v33  ;;  %v2767_v28 = vadd.f32 %v2750_v13, %v2743_v0  ;;  %v2774_v25 = vld [vmem:[%s8161_s11 + $0x18] sm:$0xff]  ;;  %v2825_v11 = vpop.permute.xlu0 %2824 }
 0xff5   : > { %2863 = vmatpush.msrb.mxu1 %v2770_v24 }
 0xff7   : > { %2864 = vmatpush.msrb.mxu1 %v2769_v16  ;;  %v2815_v1 = vpop.permute.xlu1 %2814 }
 0xff9   : > { %2865 = vmatpush.msrb.mxu1 %v2768_v10  ;;  %v2805_v60 = vpop.permute.xlu2 %2804 }
 0xffb   : > { %2866 = vmatpush.msrb.mxu1 %v2767_v28  ;;  %v2810_v38 = vpop.permute.xlu0 %2809 }
 0xffc   : > { %4886 = vmatmul.msk.f32.vlgmr.msrb.gmra.mxu1 %vm2276_vm6, %v2771_v31 }
 0xfff   : > { %v2800_v0 = vpop.permute.xlu1 %2799 }
0x1003   : > { %v2795_v31 = vpop.permute.xlu0 %2794 }
0x1004   : > { %4887 = vmatmul.msk.f32.gmra.mxu1 %vm2276_vm6, %v2772_v55 }
0x100c   : > { %4888 = vmatmul.msk.f32.gmra.mxu1 %vm2276_vm6, %v2773_v3  ;;  %v2790_v3 = vpop.permute.xlu2 %2789 }
0x1014   : > { %4889 = vmatmul.msk.f32.gmra.mxu1 %vm2276_vm6, %v2774_v25 }
0x101c   : > { %4890 = vmatmul.msk.f32.gmra.mxu1 %vm2276_vm6, %v2775_v6 }
0x1024   : > { %4891 = vmatmul.msk.f32.gmra.mxu1 %vm2276_vm6, %v2776_v4 }
0x102c   : > { %4892 = vmatmul.msk.f32.gmra.mxu1 %vm2276_vm6, %v2777_v35 }
0x1034   : > { %4893 = vmatmul.msk.f32.gmra.mxu1 %vm2276_vm6, %v2778_v52 }
0x1079   : > { %v2868_v53 = vpop.f32.mrf.mxu1 }
0x107a   : > { %v6940_v35 = vadd.f32 %v2868_v53, %v2790_v3 }
0x1081   : > { %v2871_v51 = vpop.f32.mrf.mxu1 }
0x1082   : > { %v6936_v25 = vadd.f32 %v2871_v51, %v2795_v31 }
0x1089   : > { %v2874_v26 = vpop.f32.mrf.mxu1 }
0x108a   : > { %v6931_v10 = vadd.f32 %v2874_v26, %v2800_v0 }
0x108c   : > { %v2902_v52 = vmul.f32 0.044715, %v6931_v10 }
0x1091   : > { %v2877_v30 = vpop.f32.mrf.mxu1 }
0x1092   : > { %v6927_v62 = vadd.f32 %v2877_v30, %v2805_v60 }
0x1094   : > { %v2903_v6 = vmul.f32 0.044715, %v6927_v62 }
0x1096   : > { %v2911_v51 = vmul.f32 %v2903_v6, %v6927_v62 }
0x1099   : > { %v2880_v37 = vpop.f32.mrf.mxu1 }
0x109a   : > { %v6924_v63 = vadd.f32 %v2880_v37, %v2810_v38  ;;  %v2900_v38 = vmul.f32 0.044715, %v6940_v35 }
0x109c   : > { %v2904_v13 = vmul.f32 0.044715, %v6924_v63 }
0x109e   : > { %v2912_v30 = vmul.f32 %v2904_v13, %v6924_v63 }
0x10a1   : > { %v2883_v7 = vpop.f32.mrf.mxu1 }
0x10a2   : > { %v6922_v21 = vadd.f32 %v2883_v7, %v2815_v1  ;;  %v2901_v1 = vmul.f32 0.044715, %v6936_v25 }
0x10a4   : > { %v2905_v24 = vmul.f32 0.044715, %v6922_v21  ;;  %v2909_v31 = vmul.f32 %v2901_v1, %v6936_v25 }
0x10a6   : > { %v2913_v55 = vmul.f32 %v2905_v24, %v6922_v21  ;;  %v2920_v24 = vmul.f32 %v2912_v30, %v6924_v63 }
0x10a8   : > { %v2928_v6 = vadd.f32 %v2920_v24, %v6924_v63 }
0x10a9   : > { %v2886_v33 = vpop.f32.mrf.mxu1 }
0x10aa   : > { %v6929_v16 = vadd.f32 %v2886_v33, %v2820_v9  ;;  %v2921_v9 = vmul.f32 %v2913_v55, %v6922_v21  ;;  %v2910_v33 = vmul.f32 %v2902_v52, %v6931_v10  ;;  %v2917_v52 = vmul.f32 %v2909_v31, %v6936_v25 }
0x10ac   : > { %v2906_v28 = vmul.f32 0.044715, %v6929_v16  ;;  %v2929_v0 = vadd.f32 %v2921_v9, %v6922_v21 }
0x10ae   : > { %v2914_v4 = vmul.f32 %v2906_v28, %v6929_v16  ;;  %v2919_v28 = vmul.f32 %v2911_v51, %v6927_v62  ;;  %v2936_v51 = vmul.f32 0.7978846, %v2928_v6 }
0x10b0   : > { %v2922_v26 = vmul.f32 %v2914_v4, %v6929_v16  ;;  %v2918_v4 = vmul.f32 %v2910_v33, %v6931_v10  ;;  %v2927_v30 = vadd.f32 %v2919_v28, %v6927_v62 }
0x10b1   : > { %v2889_v37 = vpop.f32.mrf.mxu1 }
0x10b2   : > { %v2890_v7 = vadd.f32 %v2889_v37, %v2825_v11  ;;  %v2930_v53 = vadd.f32 %v2922_v26, %v6929_v16  ;;  %v2908_v11 = vmul.f32 %v2900_v38, %v6940_v35  ;;  %v2937_v26 = vmul.f32 0.7978846, %v2929_v0 }
0x10b3   : > { %v2926_v1 = vadd.f32 %v2918_v4, %v6931_v10  ;;  %v2935_v38 = vmul.f32 0.7978846, %v2927_v30 }
0x10b4   : > { %v2907_v60 = vmul.f32 0.044715, %v2890_v7  ;;  %v2938_v3 = vmul.f32 0.7978846, %v2930_v53  ;;  %v2916_v9 = vmul.f32 %v2908_v11, %v6940_v35  ;;  %v2925_v53 = vadd.f32 %v2917_v52, %v6936_v25 }
0x10b5   : > { %v2934_v24 = vmul.f32 0.7978846, %v2926_v1 }
0x10b6   : > { %v2915_v13 = vmul.f32 %v2907_v60, %v2890_v7  ;;  %5741 = vtanh.f32 %v2938_v3  ;;  %v2924_v33 = vadd.f32 %v2916_v9, %v6940_v35 }
0x10b7   : > { %5743 = vtanh.f32 %v2937_v26 }
0x10b8   : > { %v2923_v55 = vmul.f32 %v2915_v13, %v2890_v7  ;;  %v2933_v13 = vmul.f32 0.7978846, %v2925_v53  ;;  %v2932_v11 = vmul.f32 0.7978846, %v2924_v33 }
0x10ba   : > { %v2931_v37 = vadd.f32 %v2923_v55, %v2890_v7  ;;  %v2899_v55 = vmul.f32 0.5, %v2890_v7  ;;  %v2896_v7 = vmul.f32 0.5, %v6924_v63  ;;  %v2893_v63 = vmul.f32 0.5, %v6936_v25  ;;  %v3037_v25 = vld [vmem:[%s6051_s14] sm:$0xf] }
0x10bb   : > { %4898 = vmatpush.msk.msra.mxu3 %vm1281_vm7, %v3037_v25 }
0x10bc   : > { %v2939_v60 = vmul.f32 0.7978846, %v2931_v37  ;;  %v5742_v0 = vpop.eup %5741  ;;  %v2898_v37 = vmul.f32 0.5, %v6929_v16 }
0x10bd   : > { %v5744_v28 = vpop.eup %5743  ;;  %v2954_v6 = vadd.f32 1.0, %v5742_v0  ;;  %v2895_v0 = vmul.f32 0.5, %v6927_v62  ;;  %v2892_v62 = vmul.f32 0.5, %v6940_v35 }
0x10be   : > { %5745 = vtanh.f32 %v2939_v60  ;;  %v2953_v30 = vadd.f32 1.0, %v5744_v28  ;;  %v2897_v60 = vmul.f32 0.5, %v6922_v21  ;;  %v2894_v21 = vmul.f32 0.5, %v6931_v10  ;;  %v2965_v10 = vld [vmem:[%s8162_s0 + $0x8] sm:$0xff] }
0x10bf   : > { %5747 = vtanh.f32 %v2936_v51  ;;  %v2962_v9 = vmul.f32 %v2954_v6, %v2898_v37  ;;  %v2967_v37 = vld [vmem:[%s8162_s0 + $0x18] sm:$0xff] }
0x10c0   : > { %5749 = vtanh.f32 %v2935_v38  ;;  %v2961_v38 = vmul.f32 %v2953_v30, %v2897_v60  ;;  %v2975_v30 = vpop.permute.xlu1 %2974  ;;  %v2980_v60 = vpop.permute.xlu0 %2979 }
0x10c1   : > { %5751 = vtanh.f32 %v2934_v24 }
0x10c2   : > { %5753 = vtanh.f32 %v2933_v13 }
0x10c3   : > { %5755 = vtanh.f32 %v2932_v11 }
0x10c4   : > { %v5746_v31 = vpop.eup %5745 }
0x10c5   : > { %v2955_v3 = vadd.f32 1.0, %v5746_v31  ;;  %v5748_v4 = vpop.eup %5747 }
0x10c6   : > { %v5750_v52 = vpop.eup %5749  ;;  %v2952_v51 = vadd.f32 1.0, %v5748_v4  ;;  %v2964_v4 = vld [vmem:[%s8162_s0] sm:$0xff] }
0x10c7   : > { %v2963_v26 = vmul.f32 %v2955_v3, %v2899_v55  ;;  %v5752_v1 = vpop.eup %5751  ;;  %v2951_v53 = vadd.f32 1.0, %v5750_v52 }
0x10c8   : > { %v5754_v24 = vpop.eup %5753  ;;  %v2960_v33 = vmul.f32 %v2952_v51, %v2896_v7  ;;  %v2950_v16 = vadd.f32 1.0, %v5752_v1  ;;  %v2985_v7 = vpop.permute.xlu2 %2984 }
0x10c9   : > { %3012 = vmatpush.msrb.mxu2 %v2963_v26  ;;  %v5756_v13 = vpop.eup %5755  ;;  %v2959_v28 = vmul.f32 %v2951_v53, %v2895_v0  ;;  %v2949_v31 = vadd.f32 1.0, %v5754_v24  ;;  %v2966_v26 = vld [vmem:[%s8162_s0 + $0x10] sm:$0xff]  ;;  %v2990_v0 = vpop.permute.xlu1 %2989  ;;  %s8163_s0 = smov 16  }
0x10ca   : > { %v2958_v11 = vmul.f32 %v2950_v16, %v2894_v21  ;;  %v2948_v55 = vadd.f32 1.0, %v5756_v13  ;;  %v8165_v21 = vpack.i.bf16 %v6663_v29, %v6691_v23  ;;  %v8171_v29 = vpack.i.bf16 %v6666_v57, %v6694_v5 }
0x10cb   : > { %3013 = vmatpush.msrb.mxu2 %v2962_v9  ;;  %v2957_v3 = vmul.f32 %v2949_v31, %v2893_v63  ;;  %v8169_v63 = vpack.i.bf16 %v6600_v39, %v6626_v34  ;;  %v8175_v34 = vpack.i.bf16 %v6669_v58, %v6698_v22  ;;  %v8178_v39 = vpack.i.bf16 %v6677_v42, %v6704_v8 }
0x10cc   : > { %v2956_v6 = vmul.f32 %v2948_v55, %v2892_v62  ;;  %v5178_v58 = vpack.i.bf16 %v6566_v54, %v6570_v46  ;;  %v8179_v42 = vpack.i.bf16 %v6680_v61, %v6707_v15  ;;  %v5188_v54 = vpack.i.bf16 %v6558_v48, %v6562_v50 }
0x10cd   : > { %3014 = vmatpush.msrb.mxu2 %v2961_v38  ;;  %v8180_v15 = vpack.i.bf16 %v6606_v32, %v6632_v20  ;;  %v8181_v61 = vpack.i.bf16 %v6611_v47, %v6635_v19 }
0x10cf   : > { %3015 = vmatpush.msrb.mxu2 %v2960_v33 }
0x10d1   : > { %3016 = vmatpush.msrb.mxu2 %v2959_v28  ;;  %v5130_v23 = vpop.permute.xlu1 %5129 }
0x10d3   : > { %3017 = vmatpush.msrb.mxu2 %v2958_v11  ;;  %v8167_v11 = vpack.i.bf16 %v6597_v18, %v6623_v17  ;;  %v8173_v17 = vpack.i.bf16 %v6603_v40, %v6629_v14  ;;  %v8176_v18 = vpack.i.bf16 %v6672_v59, %v6701_v36 }
0x10d5   : > { %3018 = vmatpush.msrb.mxu2 %v2957_v3 }
0x10d7   : > { %3019 = vmatpush.msrb.mxu2 %v2956_v6 }
0x10d8   : > { %4894 = vmatmul.msk.f32.vlgmr.msrb.gmra.mxu2 %vm1646_vm12, %v2964_v4 }
0x10e0   : > { %4895 = vmatmul.msk.f32.gmra.mxu2 %vm1646_vm12, %v2965_v10  ;;  %v8182_v10 = vpack.i.bf16 %v6614_v45, %v6638_v44  ;;  %v8183_v45 = vpack.i.bf16 %v6617_v56, %v6641_v43 }
0x10e8   : > { %4896 = vmatmul.msk.f32.gmra.mxu2 %vm1646_vm12, %v2966_v26 }
0x10f0   : > { %4897 = vmatmul.msk.f32.gmra.mxu2 %vm1646_vm12, %v2967_v37 }
0x115b   : > { %v3021_v35 = vpop.f32.mrf.mxu2 }
0x115c   : > { %v3022_v52 = vadd.f32 %v3021_v35, %v2975_v30 }
0x115e   : > { %v3033_v9 = vadd.f32 %v3022_v52, %v6880_v27  ;;  %v8184_v52 = vld [vmem:[#allocation87_spill] sm:$0xff] }
0x1160   : > { %4899 = vmatmul.msk.f32.vlgmr.msra.gmra.mxu3 %vm2085_vm15, %v3033_v9  ;;  %v8185_v9 = vpack.i.bf16 %v6683_v12, %v8184_v52  ;;  %v8193_v52 = vld [vmem:[#allocation79_spill] sm:$0xff] }
0x1163   : > { %v3024_v51 = vpop.f32.mrf.mxu2 }
0x1164   : > { %v3025_v1 = vadd.f32 %v3024_v51, %v2980_v60 }
0x1166   : > { %v3034_v38 = vadd.f32 %v3025_v1, %v6877_v41 }
0x1168   : > { %4900 = vmatmul.msk.f32.gmra.mxu3 %vm2085_vm15, %v3034_v38 }
0x116b   : > { %v3027_v53 = vpop.f32.mrf.mxu2 }
0x116c   : > { %v3028_v24 = vadd.f32 %v3027_v53, %v2985_v7 }
0x116e   : > { %v3035_v33 = vadd.f32 %v3028_v24, %v6883_v49  ;;  %v8186_v24 = vld [vmem:[#allocation86_spill] sm:$0xff] }
0x1170   : > { %4901 = vmatmul.msk.f32.gmra.mxu3 %vm2085_vm15, %v3035_v33 }
0x1173   : > { %v3030_v16 = vpop.f32.mrf.mxu2 }
0x1174   : > { %v3031_v13 = vadd.f32 %v3030_v16, %v2990_v0 }
0x1176   : > { %v3036_v27 = vadd.f32 %v3031_v13, %v6892_v2  ;;  %v5135_v2 = vpop.permute.xlu0 %5134 }
0x1178   : > { %4902 = vmatmul.msk.f32.gmra.mxu3 %vm2085_vm15, %v3036_v27 }
0x11e3   : > { %v6989_v28 = vpop.f32.mrf.mxu3 }
0x11e4   : > { %3082 = vrot.lane.b32.xlu0 %v6989_v28, %s8163_s0 }
0x11eb   : > { %v6993_v41 = vpop.f32.mrf.mxu3 }
0x11ec   : > { %3085 = vrot.lane.b32.xlu1 %v6993_v41, %s8163_s0  ;;  %v5223_v57 = vpack.i.bf16 %v6989_v28, %v6993_v41 }
0x11f3   : > { %v6997_v49 = vpop.f32.mrf.mxu3 }
0x11f4   : > { %5149 = vrot.lane.b32.xlu1 %v8165_v21, %s8164_s1  ;;  %3088 = vrot.lane.b32.xlu2 %v6997_v49, %s8163_s0 }
0x11fb   : > { %v7005_v31 = vpop.f32.mrf.mxu3 }
0x11fc   : > { %5159 = vrot.lane.b32.xlu1 %v8167_v11, %s8166_s3  ;;  %5144 = vrot.lane.b32.xlu2 %v8169_v63, %s8168_s4  ;;  %v5203_v20 = vpack.i.bf16 %v6997_v49, %v7005_v31 }
0x11fd   : > { %3091 = vrot.lane.b32.xlu0 %v7005_v31, %s8163_s0 }
0x1204   : > { %5199 = vrot.lane.b32.xlu1 %v8171_v29, %s8170_s5  ;;  %5174 = vrot.lane.b32.xlu2 %v5135_v2, %s8172_s6 }
0x1205   : > { %5139 = vrot.lane.b32.xlu0 %v8173_v17, %s8164_s1 }
0x120c   : > { %5214 = vrot.lane.b32.xlu1 %v8175_v34, %s8174_s7 }
0x120d   : > { %5154 = vrot.lane.b32.xlu0 %v8176_v18, %s8168_s4  ;;  %v8188_v18 = vld [vmem:[#allocation81_spill] sm:$0xff] }
0x1214   : > { %5224 = vrot.lane.b32.xlu1 %v5223_v57, %s8177_s8 }
0x1215   : > { %5164 = vrot.lane.b32.xlu0 %v5130_v23, %s8172_s6  ;;  %v8187_v23 = vld [vmem:[#allocation83_spill] sm:$0xff] }
0x121d   : > { %5169 = vrot.lane.b32.xlu0 %v8178_v39, %s8166_s3 }
0x1225   : > { %5179 = vrot.lane.b32.xlu0 %v5178_v58, %s8177_s8 }
0x124e   : > { %v3089_v22 = vpop.permute.xlu2 %3088 }
0x124f   : > { %v3090_v59 = vsel %vm1678_vm13, %v3089_v22, %v6997_v49  ;;  %v8189_v22 = vld [vmem:[#allocation84_spill] sm:$0xff] }
0x1250   : > { %3098 = vrot.lane.b32.xlu1 %v3090_v59, %s8163_s0 }
0x1256   : > { %v3083_v40 = vpop.permute.xlu0 %3082  ;;  %v5145_v5 = vpop.permute.xlu2 %5144 }
0x1257   : > { %v3084_v14 = vsel %vm1678_vm13, %v3083_v40, %v6989_v28  ;;  %v5147_v55 = vunpack.i.h.bf16 %v5145_v5  ;;  %v5146_v62 = vunpack.i.l.bf16 %v5145_v5 }
0x1258   : > { %3094 = vrot.lane.b32.xlu2 %v3084_v14, %s8163_s0  ;;  %5234 = vrot.lane.b32.xlu1 %v8179_v42, %s8172_s6 }
0x125e   : > { %v3086_v8 = vpop.permute.xlu1 %3085  ;;  %v5175_v60 = vpop.permute.xlu2 %5174 }
0x125f   : > { %v3087_v46 = vsel %vm1678_vm13, %v3086_v8, %v6993_v41  ;;  %v5176_v1 = vunpack.i.l.bf16 %v5175_v60  ;;  %v5177_v38 = vunpack.i.h.bf16 %v5175_v60 }
0x1260   : > { %5189 = vrot.lane.b32.xlu2 %v5188_v54, %s8177_s8  ;;  %3096 = vrot.lane.b32.xlu0 %v3087_v46, %s8163_s0 }
0x1266   : > { %v5150_v36 = vpop.permute.xlu1 %5149 }
0x1267   : > { %v5152_v3 = vunpack.i.h.bf16 %v5150_v36  ;;  %v5151_v50 = vunpack.i.l.bf16 %v5150_v36  ;;  %v8191_v36 = vld [vmem:[#allocation80_spill] sm:$0xff] }
0x1268   : > { %5209 = vrot.lane.b32.xlu2 %v8180_v15, %s8144_s18  ;;  %5184 = vrot.lane.b32.xlu0 %v8181_v61, %s8170_s5 }
0x1269   : > { %v5243_v48 = vpack.i.bf16 %v5152_v3, %v5147_v55  ;;  %v5238_v6 = vpack.i.bf16 %v5151_v50, %v5146_v62 }
0x126b   : > { %5244 = vrot.lane.b32.xlu1 %v5243_v48, %s8172_s6 }
0x126e   : > { %v7083_v47 = vpop.permute.xlu1 %5159 }
0x126f   : > { %v3092_v4 = vpop.permute.xlu0 %3091  ;;  %v5161_v37 = vunpack.i.l.bf16 %v7083_v47 }
0x1270   : > { %5239 = vrot.lane.b32.xlu2 %v5238_v6, %s8172_s6  ;;  %5194 = vrot.lane.b32.xlu0 %v8182_v10, %s8174_s7  ;;  %v3093_v19 = vsel %vm1678_vm13, %v3092_v4, %v7005_v31 }
0x1276   : > { %v7098_v43 = vpop.permute.xlu1 %5199 }
0x1277   : > { %v7079_v32 = vpop.permute.xlu0 %5139 }
0x1278   : > { %5204 = vrot.lane.b32.xlu0 %v5203_v20, %s8177_s8  ;;  %3100 = vrot.lane.b32.xlu2 %v3093_v19, %s8163_s0  ;;  %v5142_v53 = vunpack.i.h.bf16 %v7079_v32  ;;  %s8190_s8 = smov 127   ;;  %v8192_v19 = vld [vmem:[#allocation82_spill] sm:$0xff] }
0x127e   : > { %v7108_v0 = vpop.permute.xlu1 %5214 }
0x127f   : > { %v7085_v26 = vpop.permute.xlu0 %5154 }
0x1280   : > { %v5157_v44 = vunpack.i.h.bf16 %v7085_v26  ;;  %5219 = vrot.lane.b32.xlu0 %v8183_v45, %s8172_s6 }
0x1282   : > { %v5248_v25 = vpack.i.bf16 %v5157_v44, %v5161_v37 }
0x1284   : > { %5249 = vrot.lane.b32.xlu2 %v5248_v25, %s8172_s6 }
0x1286   : > { %v7116_v21 = vpop.permute.xlu1 %5224 }
0x1287   : > { %v5165_v30 = vpop.permute.xlu0 %5164 }
0x1288   : > { %v5166_v35 = vunpack.i.l.bf16 %v5165_v30  ;;  %5229 = vrot.lane.b32.xlu0 %v8185_v9, %s8144_s18  ;;  %v5167_v51 = vunpack.i.h.bf16 %v5165_v30 }
0x128a   : > { %3642 = vmatpush.msra.mxu2 %v5166_v35 }
0x128c   : > { %3643 = vmatpush.msra.mxu2 %v5167_v51 }
0x128e   : > { %3644 = vmatpush.msra.mxu2 %v5176_v1 }
0x128f   : > { %v7112_v13 = vpop.permute.xlu0 %5169 }
0x1290   : > { %3645 = vmatpush.msra.mxu2 %v5177_v38 }
0x12b2   : > { %v3095_v56 = vpop.permute.xlu2 %3094 }
0x12b3   : > { %v7102_v7 = vsel %vm1678_vm13, %v3095_v56, %v6989_v28  ;;  %v7118_v28 = vpop.permute.xlu0 %5179 }
0x12b4   : > { %v3106_v12 = vmul.f32 %v7102_v7, %v8186_v24  ;;  %v3114_v34 = vmul.f32 %v7102_v7, %v8187_v23  ;;  %v3146_v57 = vmul.f32 %v7102_v7, %v8188_v18  ;;  %v3122_v59 = vmul.f32 %v7102_v7, %v8189_v22 }
0x12b5   : > { %v3138_v15 = vmul.f32 %v7102_v7, %v8191_v36  ;;  %v3130_v45 = vmul.f32 %v7102_v7, %v8192_v19  ;;  %v3154_v51 = vmul.f32 %v7102_v7, %v8193_v52 }
0x12b6   : > { %v5253_v33 = vpack.i.bf16 %v5142_v53, %v3106_v12  ;;  %v8194_v53 = vld [vmem:[#allocation85_spill] sm:$0xff] }
0x12b8   : > { %5254 = vrot.lane.b32.xlu0 %v5253_v33, %s8172_s6 }
0x12ba   : > { %v7110_v16 = vpop.permute.xlu2 %5189 }
0x12c2   : > { %v7114_v27 = vpop.permute.xlu2 %5209  ;;  %v3099_v11 = vpop.permute.xlu1 %3098 }
0x12c3   : > { %v3104_v5 = vsel %vm1678_vm13, %v3099_v11, %v6997_v49  ;;  %v3162_v11 = vmul.f32 %v7102_v7, %v8194_v53 }
0x12c4   : > { %v3108_v49 = vmul.f32 %v3104_v5, %v8186_v24  ;;  %v3140_v25 = vmul.f32 %v3104_v5, %v8191_v36  ;;  %v3132_v1 = vmul.f32 %v3104_v5, %v8192_v19 }
0x12ca   : > { %v7120_v2 = vpop.permute.xlu2 %5239  ;;  %v7134_v14 = vpop.permute.xlu1 %5234 }
0x12cb   : > { %v5241_v63 = vunpack.i.l.bf16 %v7120_v2 }
0x12cd   : > { %3671 = vmatpush.msrb.mxu0 %v5241_v63  ;;  %v3156_v63 = vmul.f32 %v3104_v5, %v8193_v52 }
0x12d2   : > { %v3097_v29 = vpop.permute.xlu0 %3096  ;;  %v3101_v42 = vpop.permute.xlu2 %3100 }
0x12d3   : > { %v3103_v17 = vsel %vm1678_vm13, %v3097_v29, %v6993_v41  ;;  %v3105_v46 = vsel %vm1678_vm13, %v3101_v42, %v7005_v31  ;;  %v3116_v31 = vmul.f32 %v3104_v5, %v8187_v23  ;;  %v3164_v42 = vmul.f32 %v3104_v5, %v8194_v53 }
0x12d4   : > { %v3115_v39 = vmul.f32 %v3103_v17, %v8187_v23  ;;  %v3147_v58 = vmul.f32 %v3103_v17, %v8188_v18  ;;  %v3123_v40 = vmul.f32 %v3103_v17, %v8189_v22  ;;  %v3139_v55 = vmul.f32 %v3103_v17, %v8191_v36 }
0x12d5   : > { %v3117_v3 = vmul.f32 %v3105_v46, %v8187_v23  ;;  %v3109_v61 = vmul.f32 %v3105_v46, %v8186_v24  ;;  %v3131_v37 = vmul.f32 %v3103_v17, %v8192_v19  ;;  %v3141_v44 = vmul.f32 %v3105_v46, %v8191_v36 }
0x12d6   : > { %v5258_v8 = vpack.i.bf16 %v3114_v34, %v3115_v39  ;;  %v5288_v41 = vpack.i.bf16 %v3146_v57, %v3147_v58  ;;  %v5278_v54 = vpack.i.bf16 %v3122_v59, %v3123_v40  ;;  %v5263_v6 = vpack.i.bf16 %v3138_v15, %v3139_v55 }
0x12d7   : > { %v5298_v10 = vpack.i.bf16 %v3116_v31, %v3117_v3  ;;  %v5333_v20 = vpack.i.bf16 %v3108_v49, %v3109_v61  ;;  %v5268_v30 = vpack.i.bf16 %v3130_v45, %v3131_v37  ;;  %v5303_v35 = vpack.i.bf16 %v3140_v25, %v3141_v44 }
0x12d8   : > { %5259 = vrot.lane.b32.xlu1 %v5258_v8, %s8190_s8  ;;  %5289 = vrot.lane.b32.xlu2 %v5288_v41, %s8144_s18  ;;  %v3155_v9 = vmul.f32 %v3103_v17, %v8193_v52  ;;  %v3133_v60 = vmul.f32 %v3105_v46, %v8192_v19  ;;  %v3163_v12 = vmul.f32 %v3103_v17, %v8194_v53  ;;  %v5141_v39 = vunpack.i.l.bf16 %v7079_v32 }
0x12d9   : > { %5279 = vrot.lane.b32.xlu0 %v5278_v54, %s8170_s5  ;;  %v3157_v33 = vmul.f32 %v3105_v46, %v8193_v52  ;;  %v3107_v34 = vmul.f32 %v3103_v17, %v8186_v24  ;;  %v3125_v57 = vmul.f32 %v3105_v46, %v8189_v22  ;;  %v3124_v58 = vmul.f32 %v3104_v5, %v8189_v22 }
0x12da   : > { %v5273_v38 = vpack.i.bf16 %v3154_v51, %v3155_v9  ;;  %v5308_v56 = vpack.i.bf16 %v3132_v1, %v3133_v60  ;;  %v5283_v29 = vpack.i.bf16 %v3162_v11, %v3163_v12  ;;  %v3165_v7 = vmul.f32 %v3105_v46, %v8194_v53  ;;  %v5185_v54 = vpop.permute.xlu0 %5184 }
0x12db   : > { %v5313_v23 = vpack.i.bf16 %v3156_v63, %v3157_v33  ;;  %v5293_v59 = vpack.i.bf16 %v5141_v39, %v3107_v34  ;;  %v5318_v40 = vpack.i.bf16 %v3124_v58, %v3125_v57  ;;  %v3149_v24 = vmul.f32 %v3105_v46, %v8188_v18 }
0x12dc   : > { %v5323_v8 = vpack.i.bf16 %v3164_v42, %v3165_v7  ;;  %v3148_v17 = vmul.f32 %v3104_v5, %v8188_v18  ;;  %v5162_v55 = vunpack.i.h.bf16 %v7083_v47  ;;  %v5171_v47 = vunpack.i.l.bf16 %v7112_v13 }
0x12dd   : > { %v7148_v48 = vpop.permute.xlu1 %5244  ;;  %v5181_v44 = vunpack.i.l.bf16 %v7118_v28  ;;  %v5187_v9 = vunpack.i.h.bf16 %v5185_v54  ;;  %v5191_v51 = vunpack.i.l.bf16 %v7110_v16  ;;  %v5201_v34 = vunpack.i.l.bf16 %v7098_v43 }
0x12de   : > { %v5246_v50 = vunpack.i.l.bf16 %v7148_v48  ;;  %v7152_v62 = vpop.permute.xlu2 %5249  ;;  %v5328_v32 = vpack.i.bf16 %v3148_v17, %v3149_v24  ;;  %v5216_v39 = vunpack.i.l.bf16 %v7108_v0  ;;  %v5212_v42 = vunpack.i.h.bf16 %v7114_v27 }
0x12df   : > { %v5251_v4 = vunpack.i.l.bf16 %v7152_v62 }
0x12e0   : > { %3672 = vmatpush.msrb.mxu0 %v5246_v50  ;;  %5264 = vrot.lane.b32.xlu1 %v5263_v6, %s8164_s1  ;;  %v5172_v50 = vunpack.i.h.bf16 %v7112_v13  ;;  %v5182_v13 = vunpack.i.h.bf16 %v7118_v28 }
0x12e1   : > { %5299 = vrot.lane.b32.xlu2 %v5298_v10, %s8190_s8  ;;  %3729 = vmatpush.msra.mxu1 %v5251_v4 }
0x12e2   : > { %5334 = vrot.lane.b32.xlu0 %v5333_v20, %s8172_s6  ;;  %v5195_v46 = vpop.permute.xlu0 %5194 }
0x12e3   : > { %v5196_v1 = vunpack.i.l.bf16 %v5195_v46 }
0x12e8   : > { %5269 = vrot.lane.b32.xlu1 %v5268_v30, %s8168_s4 }
0x12e9   : > { %5304 = vrot.lane.b32.xlu2 %v5303_v35, %s8164_s1  ;;  %v5186_v35 = vunpack.i.l.bf16 %v5185_v54  ;;  %s8207_s1 = smov 46  }
0x12ea   : > { %v5205_v10 = vpop.permute.xlu0 %5204 }
0x12eb   : > { %v5373_v53 = vpack.i.bf16 %v5191_v51, %v5186_v35  ;;  %v5206_v11 = vunpack.i.l.bf16 %v5205_v10 }
0x12ed   : > { %v5393_v58 = vpack.i.bf16 %v5206_v11, %v5201_v34 }
0x12f0   : > { %5274 = vrot.lane.b32.xlu1 %v5273_v38, %s8166_s3 }
0x12f1   : > { %5309 = vrot.lane.b32.xlu2 %v5308_v56, %s8168_s4  ;;  %v5192_v56 = vunpack.i.h.bf16 %v7110_v16  ;;  %v5197_v16 = vunpack.i.h.bf16 %v5195_v46  ;;  %s8198_s4 = smov 64  }
0x12f2   : > { %v7221_v52 = vpop.permute.xlu0 %5219 }
0x12f3   : > { %v5383_v33 = vpack.i.bf16 %v5192_v56, %v5187_v9 }
0x12f8   : > { %5284 = vrot.lane.b32.xlu1 %v5283_v29, %s8174_s7  ;;  %v5211_v29 = vunpack.i.l.bf16 %v7114_v27  ;;  %v5242_v27 = vunpack.i.h.bf16 %v7120_v2 }
0x12f9   : > { %5314 = vrot.lane.b32.xlu2 %v5313_v23, %s8166_s3  ;;  %s8195_s3 = sld [smem:[#allocation20_spill]] }
0x12fa   : > { %v5230_v57 = vpop.permute.xlu0 %5229 }
0x1300   : > { %5294 = vrot.lane.b32.xlu1 %v5293_v59, %s8172_s6 }
0x1301   : > { %5319 = vrot.lane.b32.xlu2 %v5318_v40, %s8170_s5  ;;  %v5398_v40 = vpack.i.bf16 %v5216_v39, %v5211_v29 }
0x1309   : > { %5324 = vrot.lane.b32.xlu2 %v5323_v8, %s8174_s7  ;;  %v5207_v8 = vunpack.i.h.bf16 %v5205_v10  ;;  %s8202_s7 = smov 47  }
0x1311   : > { %5329 = vrot.lane.b32.xlu2 %v5328_v32, %s8144_s18  ;;  %v5202_v32 = vunpack.i.h.bf16 %v7098_v43  ;;  %s8206_s18 = smov 55  }
0x132a   : > { %v7243_v54 = vpop.permute.xlu0 %5254 }
0x132b   : > { %v5257_v46 = vunpack.i.h.bf16 %v7243_v54 }
0x1332   : > { %v7192_v22 = vpop.permute.xlu2 %5289 }
0x133b   : > { %v5300_v41 = vpop.permute.xlu2 %5299 }
0x1343   : > { %v7194_v36 = vpop.permute.xlu2 %5304 }
0x1344   : > { %v5307_v3 = vunpack.i.h.bf16 %v7194_v36  ;;  %v5306_v43 = vunpack.i.l.bf16 %v7194_v36 }
0x1346   : > { %v5343_v15 = vpack.i.bf16 %v5162_v55, %v5307_v3  ;;  %v5232_v3 = vunpack.i.h.bf16 %v5230_v57 }
0x1348   : > { %5344 = vrot.lane.b32.xlu1 %v5343_v15, %s8172_s6 }
0x134a   : > { %v5260_v61 = vpop.permute.xlu1 %5259 }
0x134b   : > { %v7199_v31 = vpop.permute.xlu2 %5309  ;;  %5339 = vrot.lane.b32.xlu2 %v5260_v61, %s8172_s6  ;;  %v5403_v61 = vpack.i.bf16 %v5207_v8, %v5202_v32  ;;  %v5280_v35 = vpop.permute.xlu0 %5279  ;;  %v5221_v8 = vunpack.i.l.bf16 %v7221_v52  ;;  %v5222_v32 = vunpack.i.h.bf16 %v7221_v52 }
0x134c   : > { %v5312_v18 = vunpack.i.h.bf16 %v7199_v31  ;;  %v5282_v51 = vunpack.i.h.bf16 %v5280_v35  ;;  %v5281_v56 = vunpack.i.l.bf16 %v5280_v35 }
0x134e   : > { %v5348_v49 = vpack.i.bf16 %v5312_v18, %v5171_v47 }
0x1350   : > { %5354 = vrot.lane.b32.xlu1 %v5300_v41, %s8172_s6  ;;  %v5217_v41 = vunpack.i.h.bf16 %v7108_v0 }
0x1352   : > { %v7204_v5 = vpop.permute.xlu1 %5264  ;;  %v5408_v15 = vpack.i.bf16 %v5217_v41, %v5212_v42  ;;  %v5236_v41 = vunpack.i.l.bf16 %v7134_v14 }
0x1353   : > { %v5267_v6 = vunpack.i.h.bf16 %v7204_v5  ;;  %v7209_v20 = vpop.permute.xlu2 %5314  ;;  %5349 = vrot.lane.b32.xlu2 %v5348_v49, %s8172_s6 }
0x1354   : > { %v5317_v19 = vunpack.i.h.bf16 %v7209_v20  ;;  %v5316_v49 = vunpack.i.l.bf16 %v7209_v20 }
0x1355   : > { %v5358_v4 = vpack.i.bf16 %v5172_v50, %v5267_v6  ;;  %v5247_v50 = vunpack.i.h.bf16 %v7148_v48  ;;  %v5156_v6 = vunpack.i.l.bf16 %v7085_v26  ;;  %v5266_v48 = vunpack.i.l.bf16 %v7204_v5 }
0x1356   : > { %v5368_v30 = vpack.i.bf16 %v5317_v19, %v5182_v13 }
0x1357   : > { %v5413_v2 = vpack.i.bf16 %v5306_v43, %v5156_v6 }
0x1358   : > { %5359 = vrot.lane.b32.xlu1 %v5358_v4, %s8172_s6  ;;  %v5226_v4 = vunpack.i.l.bf16 %v7116_v21 }
0x135a   : > { %v7214_v37 = vpop.permute.xlu1 %5269 }
0x135b   : > { %v5271_v45 = vunpack.i.l.bf16 %v7214_v37  ;;  %v7225_v12 = vpop.permute.xlu2 %5319  ;;  %v5272_v0 = vunpack.i.h.bf16 %v7214_v37  ;;  %v5227_v37 = vunpack.i.h.bf16 %v7116_v21 }
0x135c   : > { %v5321_v47 = vunpack.i.l.bf16 %v7225_v12  ;;  %v5322_v36 = vunpack.i.h.bf16 %v7225_v12 }
0x135d   : > { %v5363_v25 = vpack.i.bf16 %v5181_v44, %v5271_v45  ;;  %v5423_v10 = vpack.i.bf16 %v5272_v0, %v5316_v49  ;;  %v5311_v45 = vunpack.i.l.bf16 %v7199_v31 }
0x135e   : > { %v5443_v19 = vpack.i.bf16 %v5226_v4, %v5321_v47 }
0x135f   : > { %5364 = vrot.lane.b32.xlu0 %v5363_v25, %s8172_s6  ;;  %v5418_v13 = vpack.i.bf16 %v5266_v48, %v5311_v45  ;;  %v5428_v25 = vpack.i.bf16 %v5227_v37, %v5322_v36 }
0x1360   : > { %5369 = vrot.lane.b32.xlu1 %v5368_v30, %s8172_s6 }
0x1362   : > { %v5275_v60 = vpop.permute.xlu1 %5274 }
0x1363   : > { %v5276_v38 = vunpack.i.l.bf16 %v5275_v60  ;;  %v5277_v63 = vunpack.i.h.bf16 %v5275_v60  ;;  %v5325_v7 = vpop.permute.xlu2 %5324  ;;  %v5231_v60 = vunpack.i.l.bf16 %v5230_v57 }
0x1364   : > { %v5327_v24 = vunpack.i.h.bf16 %v5325_v7  ;;  %v5326_v5 = vunpack.i.l.bf16 %v5325_v7 }
0x1365   : > { %v5378_v28 = vpack.i.bf16 %v5196_v1, %v5276_v38  ;;  %v5388_v59 = vpack.i.bf16 %v5197_v16, %v5277_v63  ;;  %v3383_v1 = vld [vmem:[%s8195_s3 + $0x8] sm:$0xff] }
0x1366   : > { %v5433_v18 = vpack.i.bf16 %v5327_v24, %v5232_v3  ;;  %v5453_v21 = vpack.i.bf16 %v5326_v5, %v5231_v60  ;;  %v5252_v5 = vunpack.i.h.bf16 %v7152_v62 }
0x1367   : > { %5379 = vrot.lane.b32.xlu2 %v5378_v28, %s8172_s6  ;;  %5374 = vrot.lane.b32.xlu0 %v5373_v53, %s8172_s6  ;;  %v3382_v53 = vld [vmem:[%s8195_s3] sm:$0xff]  ;;  %v3385_v28 = vld [vmem:[%s8195_s3 + $0x18] sm:$0xff] }
0x1368   : > { %5384 = vrot.lane.b32.xlu1 %v5383_v33, %s8172_s6  ;;  %v3384_v33 = vld [vmem:[%s8195_s3 + $0x10] sm:$0xff]  ;;  %s8211_s3 = smov 54  }
0x136a   : > { %v7231_v23 = vpop.permute.xlu1 %5284 }
0x136b   : > { %v5330_v44 = vpop.permute.xlu2 %5329  ;;  %v5287_v26 = vunpack.i.h.bf16 %v7231_v23  ;;  %v5286_v9 = vunpack.i.l.bf16 %v7231_v23 }
0x136c   : > { %v5332_v20 = vunpack.i.h.bf16 %v5330_v44  ;;  %v5331_v38 = vunpack.i.l.bf16 %v5330_v44 }
0x136d   : > { %v5438_v31 = vpack.i.bf16 %v5282_v51, %v5286_v9 }
0x136e   : > { %v5448_v30 = vpack.i.bf16 %v5287_v26, %v5332_v20  ;;  %v5458_v12 = vpack.i.bf16 %v5331_v38, %v5281_v56 }
0x136f   : > { %5394 = vrot.lane.b32.xlu2 %v5393_v58, %s8172_s6  ;;  %5389 = vrot.lane.b32.xlu0 %v5388_v59, %s8172_s6 }
0x1370   : > { %5399 = vrot.lane.b32.xlu1 %v5398_v40, %s8172_s6 }
0x1372   : > { %v7239_v17 = vpop.permute.xlu1 %5294 }
0x1373   : > { %v5297_v55 = vunpack.i.h.bf16 %v7239_v17  ;;  %v5296_v52 = vunpack.i.l.bf16 %v7239_v17 }
0x1375   : > { %3700 = vmatpush.msrb.mxu3 %v5297_v55  ;;  %v5237_v55 = vunpack.i.h.bf16 %v7134_v14 }
0x1377   : > { %5409 = vrot.lane.b32.xlu2 %v5408_v15, %s8172_s6  ;;  %5404 = vrot.lane.b32.xlu0 %v5403_v61, %s8172_s6 }
0x1378   : > { %5434 = vrot.lane.b32.xlu1 %v5433_v18, %s8172_s6  ;;  %3701 = vmatpush.msrb.mxu3 %v5257_v46 }
0x137a   : > { %3702 = vmatpush.msrb.mxu3 %v5242_v27  ;;  %v5256_v27 = vunpack.i.l.bf16 %v7243_v54 }
0x137c   : > { %3703 = vmatpush.msrb.mxu3 %v5247_v50 }
0x137f   : > { %5424 = vrot.lane.b32.xlu2 %v5423_v10, %s8172_s6  ;;  %5414 = vrot.lane.b32.xlu0 %v5413_v2, %s8172_s6 }
0x1380   : > { %5444 = vrot.lane.b32.xlu1 %v5443_v19, %s8172_s6 }
0x1387   : > { %5429 = vrot.lane.b32.xlu2 %v5428_v25, %s8172_s6  ;;  %5419 = vrot.lane.b32.xlu0 %v5418_v13, %s8172_s6 }
0x1388   : > { %5449 = vrot.lane.b32.xlu1 %v5448_v30, %s8172_s6 }
0x138f   : > { %5454 = vrot.lane.b32.xlu0 %v5453_v21, %s8172_s6  ;;  %5439 = vrot.lane.b32.xlu2 %v5438_v31, %s8172_s6 }
0x1390   : > { %3393 = vperm.xlu1 %5020, %v3383_v1  }
0x1397   : > { %3388 = vperm.xlu2 %5041, %v3382_v53   ;;  %5459 = vrot.lane.b32.xlu0 %v5458_v12, %s8172_s6 }
0x139f   : > { %3403 = vperm.xlu2 %5041, %v3385_v28   ;;  %5464 = vrot.lane.b32.xlu0 %v7192_v22, %s8172_s6  ;;  %v5335_v22 = vpop.permute.xlu0 %5334  ;;  %s8196_s6 = sld [smem:[#allocation19_spill]] }
0x13a0   : > { %v5336_v46 = vunpack.i.l.bf16 %v5335_v22  ;;  %v5337_v18 = vunpack.i.h.bf16 %v5335_v22 }
0x13a5   : > { %v5340_v11 = vpop.permute.xlu2 %5339  ;;  %v3362_v0 = vld [vmem:[%s8196_s6] sm:$0xff]  ;;  %v3367_v4 = vld [vmem:[%s8196_s6 + $0x28] sm:$0xff]  ;;  %v3372_v37 = vld [vmem:[%s8196_s6 + $0x50] sm:$0xff] }
0x13a6   : > { %v5341_v59 = vunpack.i.l.bf16 %v5340_v11  ;;  %v5342_v40 = vunpack.i.h.bf16 %v5340_v11  ;;  %v3377_v13 = vld [vmem:[%s8196_s6 + $0x78] sm:$0xff] }
0x13a7   : > { %3398 = vperm.xlu0 %5127, %v3384_v33  }
0x13ad   : > { %v7279_v63 = vpop.permute.xlu2 %5349 }
0x13ae   : > { %v5351_v34 = vunpack.i.l.bf16 %v7279_v63  ;;  %v5352_v1 = vunpack.i.h.bf16 %v7279_v63 }
0x13ba   : > { %v7281_v29 = vpop.permute.xlu1 %5344 }
0x13bb   : > { %v5347_v23 = vunpack.i.h.bf16 %v7281_v29  ;;  %v5346_v9 = vunpack.i.l.bf16 %v7281_v29 }
0x13bd   : > { %3730 = vmatpush.msra.mxu1 %v5347_v23 }
0x13bf   : > { %3731 = vmatpush.msra.mxu1 %v5351_v34 }
0x13c1   : > { %v5380_v16 = vpop.permute.xlu2 %5379 }
0x13c2   : > { %v5355_v57 = vpop.permute.xlu1 %5354  ;;  %v5382_v6 = vunpack.i.h.bf16 %v5380_v16  ;;  %v5381_v17 = vunpack.i.l.bf16 %v5380_v16 }
0x13c3   : > { %v5356_v39 = vunpack.i.l.bf16 %v5355_v57  ;;  %v5357_v58 = vunpack.i.h.bf16 %v5355_v57 }
0x13c5   : > { %3646 = vmatpush.msra.mxu2 %v5356_v39 }
0x13c7   : > { %3647 = vmatpush.msra.mxu2 %v5357_v58 }
0x13c9   : > { %3648 = vmatpush.msra.mxu2 %v5341_v59  ;;  %v7285_v7 = vpop.permute.xlu2 %5394 }
0x13ca   : > { %v7287_v42 = vpop.permute.xlu1 %5359  ;;  %v5397_v59 = vunpack.i.h.bf16 %v7285_v7  ;;  %v5396_v22 = vunpack.i.l.bf16 %v7285_v7 }
0x13cb   : > { %v5362_v24 = vunpack.i.h.bf16 %v7287_v42  ;;  %3649 = vmatpush.msra.mxu2 %v5342_v40  ;;  %v5361_v38 = vunpack.i.l.bf16 %v7287_v42 }
0x13cd   : > { %3650 = vmatpush.msra.mxu2 %v5221_v8  ;;  %3732 = vmatpush.msra.mxu1 %v5362_v24 }
0x13cf   : > { %3651 = vmatpush.msra.mxu2 %v5222_v32 }
0x13d1   : > { %3652 = vmatpush.msra.mxu2 %v5236_v41  ;;  %v5410_v3 = vpop.permute.xlu2 %5409  ;;  %v7294_v15 = vpop.permute.xlu0 %5364 }
0x13d2   : > { %v7296_v61 = vpop.permute.xlu1 %5369  ;;  %v5411_v36 = vunpack.i.l.bf16 %v5410_v3  ;;  %v5412_v26 = vunpack.i.h.bf16 %v5410_v3  ;;  %v5367_v62 = vunpack.i.h.bf16 %v7294_v15  ;;  %v5366_v53 = vunpack.i.l.bf16 %v7294_v15  ;;  %v3366_v15 = vld [vmem:[%s8196_s6 + $0x20] sm:$0xff] }
0x13d3   : > { %3653 = vmatpush.msra.mxu2 %v5237_v55  ;;  %v5372_v49 = vunpack.i.h.bf16 %v7296_v61  ;;  %v5371_v12 = vunpack.i.l.bf16 %v7296_v61 }
0x13d5   : > { %3654 = vmatpush.msra.mxu2 %v5336_v46 }
0x13d7   : > { %3655 = vmatpush.msra.mxu2 %v5337_v18  ;;  %v3364_v18 = vld [vmem:[%s8196_s6 + $0x10] sm:$0xff] }
0x13d9   : > { %3656 = vmatpush.msra.mxu2 %v5296_v52  ;;  %v7300_v43 = vpop.permute.xlu2 %5424  ;;  %v7302_v14 = vpop.permute.xlu0 %5374 }
0x13da   : > { %v5426_v50 = vunpack.i.l.bf16 %v7300_v43  ;;  %v7306_v47 = vpop.permute.xlu1 %5384  ;;  %v5427_v28 = vunpack.i.h.bf16 %v7300_v43  ;;  %v5377_v11 = vunpack.i.h.bf16 %v7302_v14  ;;  %v5376_v63 = vunpack.i.l.bf16 %v7302_v14  ;;  %v3363_v14 = vld [vmem:[%s8196_s6 + $0x8] sm:$0xff] }
0x13db   : > { %3657 = vmatpush.msra.mxu2 %v5256_v27  ;;  %v5387_v34 = vunpack.i.h.bf16 %v7306_v47  ;;  %v5386_v16 = vunpack.i.l.bf16 %v7306_v47  ;;  %v3371_v47 = vld [vmem:[%s8196_s6 + $0x48] sm:$0xff] }
0x13dc   : > { %3658 = vmatmul.f32.vlgmr.msra.gmra.mxu2 %v3362_v0  ;;  %3733 = vmatpush.msra.mxu1 %v5426_v50 }
0x13dd   : > { %3766 = vmatpush.msrb.mxu2 %v5382_v6 }
0x13de   : > { %3734 = vmatpush.msra.mxu1 %v5372_v49  ;;  %v3369_v49 = vld [vmem:[%s8196_s6 + $0x38] sm:$0xff] }
0x13e0   : > { %3735 = vmatpush.msra.mxu1 %v5381_v17  ;;  %v3365_v17 = vld [vmem:[%s8196_s6 + $0x18] sm:$0xff] }
0x13e1   : > { %v5390_v54 = vpop.permute.xlu0 %5389  ;;  %v7316_v51 = vpop.permute.xlu2 %5429 }
0x13e2   : > { %v5392_v2 = vunpack.i.h.bf16 %v5390_v54  ;;  %v5391_v10 = vunpack.i.l.bf16 %v5390_v54  ;;  %v5400_v19 = vpop.permute.xlu1 %5399  ;;  %v5432_v61 = vunpack.i.h.bf16 %v7316_v51  ;;  %v5431_v46 = vunpack.i.l.bf16 %v7316_v51  ;;  %v3368_v54 = vld [vmem:[%s8196_s6 + $0x30] sm:$0xff]  ;;  %v4344_v51 = vld [vmem:[%s6061_s30 + $0x28] sm:$0xff] }
0x13e3   : > { %v5401_v44 = vunpack.i.l.bf16 %v5400_v19  ;;  %v5402_v48 = vunpack.i.h.bf16 %v5400_v19  ;;  %v3373_v19 = vld [vmem:[%s8196_s6 + $0x58] sm:$0xff] }
0x13e4   : > { %3661 = vmatmul.f32.gmra.mxu2 %v3367_v4  ;;  %3736 = vmatpush.msra.mxu1 %v5391_v10  ;;  %v3376_v4 = vld [vmem:[%s8196_s6 + $0x70] sm:$0xff]  ;;  %v3370_v10 = vld [vmem:[%s8196_s6 + $0x40] sm:$0xff] }
0x13e5   : > { %3767 = vmatpush.msrb.mxu2 %v5392_v2  ;;  %v3374_v2 = vld [vmem:[%s8196_s6 + $0x60] sm:$0xff] }
0x13e6   : > { %3737 = vmatpush.msra.mxu1 %v5401_v44  ;;  %v3381_v44 = vld [vmem:[%s8196_s6 + $0x98] sm:$0xff] }
0x13e7   : > { %3768 = vmatpush.msrb.mxu2 %v5402_v48  ;;  %v3379_v48 = vld [vmem:[%s8196_s6 + $0x88] sm:$0xff] }
0x13e8   : > { %3738 = vmatpush.msra.mxu1 %v5411_v36  ;;  %v3375_v36 = vld [vmem:[%s8196_s6 + $0x68] sm:$0xff] }
0x13e9   : > { %3769 = vmatpush.msrb.mxu2 %v5412_v26  ;;  %v7310_v20 = vpop.permute.xlu0 %5404  ;;  %v5440_v57 = vpop.permute.xlu2 %5439  ;;  %v3378_v26 = vld [vmem:[%s8196_s6 + $0x80] sm:$0xff] }
0x13ea   : > { %v5435_v25 = vpop.permute.xlu1 %5434  ;;  %v5441_v42 = vunpack.i.l.bf16 %v5440_v57  ;;  %v5407_v8 = vunpack.i.h.bf16 %v7310_v20  ;;  %v5406_v24 = vunpack.i.l.bf16 %v7310_v20  ;;  %v5442_v43 = vunpack.i.h.bf16 %v5440_v57  ;;  %v3380_v20 = vld [vmem:[%s8196_s6 + $0x90] sm:$0xff]  ;;  %s8217_s6 = smov 48  }
0x13eb   : > { %v5437_v39 = vunpack.i.h.bf16 %v5435_v25  ;;  %v5436_v58 = vunpack.i.l.bf16 %v5435_v25  ;;  %v4352_v25 = vld [vmem:[%s6061_s30 + $0x68] sm:$0xff] }
0x13ec   : > { %3664 = vmatmul.f32.gmra.mxu2 %v3372_v37  ;;  %v3792_v37 = vld [vmem:[%s6056_s24 + $0x8] sm:$0xff] }
0x13f1   : > { %v5415_v45 = vpop.permute.xlu0 %5414 }
0x13f2   : > { %v5417_v30 = vunpack.i.h.bf16 %v5415_v45  ;;  %v5416_v35 = vunpack.i.l.bf16 %v5415_v45  ;;  %v5445_v56 = vpop.permute.xlu1 %5444  ;;  %v3791_v45 = vld [vmem:[%s6056_s24] sm:$0xff] }
0x13f3   : > { %v5447_v55 = vunpack.i.h.bf16 %v5445_v56  ;;  %v5446_v3 = vunpack.i.l.bf16 %v5445_v56  ;;  %v3389_v56 = vpop.permute.xlu2 %3388 }
0x13f4   : > { %3667 = vmatmul.f32.gmra.mxu2 %v3377_v13  ;;  %3673 = vmatpush.msrb.mxu0 %v5416_v35  ;;  %v4354_v13 = vld [vmem:[%s6061_s30 + $0x78] sm:$0xff] }
0x13f5   : > { %3704 = vmatpush.msrb.mxu3 %v5417_v30  ;;  %v4350_v35 = vld [vmem:[%s6061_s30 + $0x58] sm:$0xff] }
0x13f6   : > { %3674 = vmatpush.msrb.mxu0 %v5252_v5  ;;  %v4348_v5 = vld [vmem:[%s6061_s30 + $0x48] sm:$0xff] }
0x13f7   : > { %3705 = vmatpush.msrb.mxu3 %v5346_v9 }
0x13f9   : > { %v5420_v60 = vpop.permute.xlu0 %5419 }
0x13fa   : > { %v5422_v21 = vunpack.i.h.bf16 %v5420_v60  ;;  %v5421_v31 = vunpack.i.l.bf16 %v5420_v60  ;;  %v5450_v40 = vpop.permute.xlu1 %5449  ;;  %v4346_v60 = vld [vmem:[%s6061_s30 + $0x38] sm:$0xff] }
0x13fb   : > { %v5452_v32 = vunpack.i.h.bf16 %v5450_v40  ;;  %v5451_v52 = vunpack.i.l.bf16 %v5450_v40  ;;  %v8197_v40 = vld [vmem:[#allocation52_spill] sm:$0xff] }
0x13fc   : > { %3675 = vmatpush.msrb.mxu0 %v5421_v31  ;;  %3706 = vmatpush.msrb.mxu3 %v5422_v21  ;;  %v4342_v21 = vld [vmem:[%s6061_s30 + $0x18] sm:$0xff]  ;;  %v4340_v31 = vld [vmem:[%s6061_s30 + $0x8] sm:$0xff] }
0x13fe   : > { %3676 = vmatpush.msrb.mxu0 %v5352_v1  ;;  %3707 = vmatpush.msrb.mxu3 %v5361_v38 }
0x1400   : > { %3677 = vmatpush.msrb.mxu0 %v5366_v53  ;;  %3708 = vmatpush.msrb.mxu3 %v5367_v62 }
0x1401   : > { %v5455_v33 = vpop.permute.xlu0 %5454 }
0x1402   : > { %v5457_v29 = vunpack.i.h.bf16 %v5455_v33  ;;  %v5456_v23 = vunpack.i.l.bf16 %v5455_v33  ;;  %3678 = vmatpush.msrb.mxu0 %v5427_v28  ;;  %3709 = vmatpush.msrb.mxu3 %v5371_v12 }
0x1404   : > { %3679 = vmatpush.msrb.mxu0 %v5376_v63  ;;  %3710 = vmatpush.msrb.mxu3 %v5377_v11 }
0x1405   : > { %3739 = vmatpush.msra.mxu1 %v5456_v23  ;;  %3770 = vmatpush.msrb.mxu2 %v5457_v29  ;;  %v3394_v23 = vpop.permute.xlu1 %3393 }
0x1406   : > { %3680 = vmatpush.msrb.mxu0 %v5386_v16  ;;  %3711 = vmatpush.msrb.mxu3 %v5387_v34 }
0x1407   : > { %3740 = vmatpush.msra.mxu1 %v5436_v58  ;;  %3771 = vmatpush.msrb.mxu2 %v5437_v39 }
0x1408   : > { %3681 = vmatpush.msrb.mxu0 %v5396_v22  ;;  %3712 = vmatpush.msrb.mxu3 %v5397_v59  ;;  %v5757_v22 = vld [vmem:[%s6021_s20 + $0x18] ss:$0 sm:$0xff] }
0x1409   : > { %3772 = vmatpush.msrb.mxu2 %v5441_v42  ;;  %v5460_v41 = vpop.permute.xlu0 %5459  ;;  %v4580_v42 = vmul.f32 %v5757_v22, %v8197_v40  ;;  %v8223_v22 = vld [vmem:[#allocation77_spill] sm:$0xff] }
0x140a   : > { %v5462_v7 = vunpack.i.h.bf16 %v5460_v41  ;;  %3682 = vmatpush.msrb.mxu0 %v5406_v24  ;;  %3713 = vmatpush.msrb.mxu3 %v5407_v8  ;;  %v5461_v27 = vunpack.i.l.bf16 %v5460_v41 }
0x140b   : > { %3773 = vmatpush.msrb.mxu2 %v5452_v32 }
0x140c   : > { %3683 = vmatpush.msrb.mxu0 %v5446_v3  ;;  %3714 = vmatpush.msrb.mxu3 %v5447_v55 }
0x140d   : > { %3741 = vmatpush.msra.mxu1 %v5462_v7  ;;  %4903 = vmatmul.msk.f32.vlgmr.msrb.gmra.mxu2 %vm1646_vm12, %v3366_v15 }
0x140e   : > { %3684 = vmatpush.msrb.mxu0 %v5431_v46  ;;  %3715 = vmatpush.msrb.mxu3 %v5432_v61 }
0x140f   : > { %3742 = vmatpush.msra.mxu1 %v5451_v52  ;;  %3716 = vmatmul.f32.vlgmr.msrb.gmra.mxu3 %v3364_v18 }
0x1410   : > { %3685 = vmatpush.msrb.mxu0 %v5461_v27 }
0x1411   : > { %v5465_v0 = vpop.permute.xlu0 %5464 }
0x1412   : > { %v5466_v50 = vunpack.i.l.bf16 %v5465_v0  ;;  %3686 = vmatpush.msrb.mxu0 %v5442_v43  ;;  %v5467_v6 = vunpack.i.h.bf16 %v5465_v0  ;;  %v3404_v0 = vpop.permute.xlu2 %3403 }
0x1413   : > { %3687 = vmatmul.f32.vlgmr.msrb.gmra.mxu0 %v3363_v14 }
0x1414   : > { %3743 = vmatpush.msra.mxu1 %v5466_v50  ;;  %3819 = vmatpush.msra.mxu0 %v3792_v37 }
0x1415   : > { %4904 = vmatmul.msk.f32.gmra.mxu2 %vm1646_vm12, %v3371_v47 }
0x1416   : > { %3744 = vmatpush.msra.mxu1 %v5467_v6  ;;  %3820 = vmatpush.msra.mxu0 %v3791_v45  ;;  %v8199_v45 = vld [vmem:[#allocation64_spill] sm:$0xff] }
0x1417   : > { %3719 = vmatmul.f32.gmra.mxu3 %v3369_v49  ;;  %3745 = vmatmul.f32.vlgmr.msra.gmra.mxu1 %v3365_v17 }
0x1418   : > { %4392 = vmatpush.msrb.mxu0 %v4354_v13  ;;  %v8200_v13 = vld [vmem:[#allocation72_spill] sm:$0xff] }
0x1419   : > { %v3399_v55 = vpop.permute.xlu0 %3398 }
0x141a   : > { %4393 = vmatpush.msrb.mxu0 %v4352_v25  ;;  %v8201_v25 = vpack.i.bf16 %v8199_v45, %v8200_v13 }
0x141b   : > { %3690 = vmatmul.f32.gmra.mxu0 %v3368_v54 }
0x141c   : > { %4394 = vmatpush.msrb.mxu0 %v4350_v35  ;;  %v8204_v35 = vld [vmem:[#allocation73_spill] sm:$0xff] }
0x141d   : > { %4905 = vmatmul.msk.f32.gmra.mxu2 %vm1646_vm12, %v3376_v4 }
0x141e   : > { %4395 = vmatpush.msrb.mxu0 %v4348_v5 }
0x141f   : > { %3722 = vmatmul.f32.gmra.mxu3 %v3374_v2  ;;  %3748 = vmatmul.f32.gmra.mxu1 %v3370_v10 }
0x1420   : > { %4396 = vmatpush.msrb.mxu0 %v4346_v60 }
0x1422   : > { %4397 = vmatpush.msrb.mxu0 %v4344_v51 }
0x1423   : > { %3693 = vmatmul.f32.gmra.mxu0 %v3373_v19 }
0x1424   : > { %4398 = vmatpush.msrb.mxu0 %v4342_v21  ;;  %v8208_v21 = vld [vmem:[#allocation66_spill] sm:$0xff] }
0x1425   : > { %4906 = vmatmul.msk.f32.gmra.mxu2 %vm1646_vm12, %v3381_v44 }
0x1426   : > { %4399 = vmatpush.msrb.mxu0 %v4340_v31  ;;  %v8209_v31 = vld [vmem:[#allocation74_spill] sm:$0xff] }
0x1427   : > { %3725 = vmatmul.f32.gmra.mxu3 %v3379_v48  ;;  %3751 = vmatmul.f32.gmra.mxu1 %v3375_v36 }
0x142b   : > { %3696 = vmatmul.f32.gmra.mxu0 %v3378_v26 }
0x142f   : > { %3754 = vmatmul.f32.gmra.mxu1 %v3380_v20 }
0x145f   : > { %v3659_v30 = vpop.f32.mrf.mxu2 }
0x1460   : > { %v3660_v62 = vadd.f32 %v3659_v30, %v3389_v56  ;;  %v8203_v30 = vld [vmem:[#allocation65_spill] sm:$0xff] }
0x1461   : > { %v8205_v5 = vpack.i.bf16 %v8203_v30, %v8204_v35 }
0x1467   : > { %v3662_v9 = vpop.f32.mrf.mxu2 }
0x1468   : > { %v3663_v34 = vadd.f32 %v3662_v9, %v3394_v23  ;;  %v8215_v23 = vld [vmem:[#allocation62_spill] sm:$0xff] }
0x146f   : > { %v3665_v1 = vpop.f32.mrf.mxu2 }
0x1470   : > { %v3666_v3 = vadd.f32 %v3665_v1, %v3399_v55  ;;  %v8210_v1 = vpack.i.bf16 %v8208_v21, %v8209_v31  ;;  %v8235_v21 = vld [vmem:[#allocation53_spill] sm:$0xff] }
0x1477   : > { %v3668_v38 = vpop.f32.mrf.mxu2 }
0x1478   : > { %v3669_v50 = vadd.f32 %v3668_v38, %v3404_v0 }
0x1490   : > { %v3688_v53 = vpop.f32.mrf.mxu0  ;;  %v3775_v12 = vpop.f32.mrf.mxu2 }
0x1491   : > { %v3689_v28 = vadd.f32 %v3688_v53, %v3660_v62 }
0x1492   : > { %v3717_v33 = vpop.f32.mrf.mxu3 }
0x1493   : > { %v3718_v11 = vadd.f32 %v3717_v33, %v3689_v28  ;;  %v8212_v33 = vld [vmem:[#allocation67_spill] sm:$0xff] }
0x1494   : > { %v3746_v63 = vpop.f32.mrf.mxu1 }
0x1495   : > { %v3747_v29 = vadd.f32 %v3746_v63, %v3718_v11  ;;  %v8213_v11 = vld [vmem:[#allocation75_spill] sm:$0xff] }
0x1496   : > { %v8214_v63 = vpack.i.bf16 %v8212_v33, %v8213_v11 }
0x1497   : > { %v3776_v16 = vadd.f32 %v3775_v12, %v3747_v29 }
0x1498   : > { %v3691_v57 = vpop.f32.mrf.mxu0  ;;  %v3778_v39 = vpop.f32.mrf.mxu2 }
0x1499   : > { %v3787_v58 = vmax.f32 %v3776_v16, 0.0  ;;  %v3692_v59 = vadd.f32 %v3691_v57, %v3663_v34  ;;  %v8216_v34 = vld [vmem:[#allocation61_spill] sm:$0xff] }
0x149a   : > { %v3720_v8 = vpop.f32.mrf.mxu3  ;;  %v5478_v16 = vpack.i.bf16 %v8216_v34, %v8215_v23  ;;  %v8218_v57 = vld [vmem:[#allocation69_spill] sm:$0xff] }
0x149b   : > { %v3721_v24 = vadd.f32 %v3720_v8, %v3692_v59  ;;  %4907 = vmatmul.msk.f32.vlgmr.msra.gmra.mxu0 %vm1883_vm14, %v3787_v58  ;;  %v8222_v59 = vld [vmem:[#allocation70_spill] sm:$0xff] }
0x149c   : > { %4658 = vmatpush.msra.mxu0 %v4580_v42  ;;  %v3749_v32 = vpop.f32.mrf.mxu1  ;;  %v8224_v40 = vpack.i.bf16 %v8222_v59, %v8223_v22 }
0x149d   : > { %v3750_v41 = vadd.f32 %v3749_v32, %v3721_v24 }
0x149f   : > { %v3779_v7 = vadd.f32 %v3778_v39, %v3750_v41  ;;  %v8219_v39 = vld [vmem:[#allocation76_spill] sm:$0xff] }
0x14a0   : > { %v3694_v15 = vpop.f32.mrf.mxu0  ;;  %v3781_v52 = vpop.f32.mrf.mxu2  ;;  %v8220_v58 = vpack.i.bf16 %v8218_v57, %v8219_v39 }
0x14a1   : > { %v3788_v61 = vmax.f32 %v3779_v7, 0.0  ;;  %v3695_v46 = vadd.f32 %v3694_v15, %v3666_v3  ;;  %v8225_v3 = vld [vmem:[#allocation56_spill] sm:$0xff]  ;;  %v8226_v15 = vld [vmem:[#allocation58_spill] sm:$0xff] }
0x14a2   : > { %v3723_v18 = vpop.f32.mrf.mxu3 }
0x14a3   : > { %v3724_v27 = vadd.f32 %v3723_v18, %v3695_v46  ;;  %4908 = vmatmul.msk.f32.gmra.mxu0 %vm1883_vm14, %v3788_v61 }
0x14a4   : > { %v3752_v43 = vpop.f32.mrf.mxu1 }
0x14a5   : > { %v3753_v14 = vadd.f32 %v3752_v43, %v3724_v27 }
0x14a7   : > { %v3782_v47 = vadd.f32 %v3781_v52, %v3753_v14  ;;  %v8227_v52 = vld [vmem:[#allocation59_spill] sm:$0xff] }
0x14a8   : > { %v3697_v6 = vpop.f32.mrf.mxu0  ;;  %v3784_v10 = vpop.f32.mrf.mxu2 }
0x14a9   : > { %v3789_v49 = vmax.f32 %v3782_v47, 0.0  ;;  %v3698_v17 = vadd.f32 %v3697_v6, %v3669_v50  ;;  %v8228_v47 = vld [vmem:[#allocation54_spill] sm:$0xff] }
0x14aa   : > { %v3726_v54 = vpop.f32.mrf.mxu3 }
0x14ab   : > { %v3727_v4 = vadd.f32 %v3726_v54, %v3698_v17  ;;  %4909 = vmatmul.msk.f32.gmra.mxu0 %vm1883_vm14, %v3789_v49 }
0x14ac   : > { %v3755_v2 = vpop.f32.mrf.mxu1 }
0x14ad   : > { %v3756_v19 = vadd.f32 %v3755_v2, %v3727_v4 }
0x14af   : > { %v3785_v44 = vadd.f32 %v3784_v10, %v3756_v19  ;;  %v8229_v10 = vld [vmem:[#allocation71_spill] sm:$0xff]  ;;  %v8230_v19 = vld [vmem:[#allocation78_spill] sm:$0xff] }
0x14b1   : > { %v3790_v48 = vmax.f32 %v3785_v44, 0.0  ;;  %v8231_v44 = vpack.i.bf16 %v8229_v10, %v8230_v19 }
0x14b3   : > { %4910 = vmatmul.msk.f32.gmra.mxu0 %vm1883_vm14, %v3790_v48 }
0x1518   : > { %v3822_v36 = vpop.f32.mrf.mxu0 }
0x1520   : > { %v3825_v26 = vpop.f32.mrf.mxu0 }
0x1521   : > { %3837 = vrot.lane.b32.xlu2 %v3825_v26, %s8198_s4  ;;  %v5493_v62 = vpack.i.bf16 %v3822_v36, %v3825_v26 }
0x1528   : > { %v3828_v20 = vpop.f32.mrf.mxu0 }
0x1529   : > { %3840 = vrot.lane.b32.xlu0 %v3828_v20, %s8198_s4 }
0x1530   : > { %v3831_v37 = vpop.f32.mrf.mxu0 }
0x1531   : > { %5469 = vrot.lane.b32.xlu0 %v8201_v25, %s8190_s8  ;;  %3843 = vrot.lane.b32.xlu1 %v3831_v37, %s8198_s4  ;;  %v5483_v51 = vpack.i.bf16 %v3828_v20, %v3831_v37 }
0x1539   : > { %3834 = vrot.lane.b32.xlu1 %v3822_v36, %s8198_s4 }
0x1541   : > { %5474 = vrot.lane.b32.xlu1 %v8205_v5, %s8202_s7 }
0x157b   : > { %v3838_v9 = vpop.permute.xlu2 %3837 }
0x157c   : > { %v3839_v60 = vsel %vm1447_vm10, %v3838_v9, %v3825_v26 }
0x157d   : > { %3848 = vrot.lane.b32.xlu1 %v3839_v60, %s8198_s4 }
0x1585   : > { %5484 = vrot.lane.b32.xlu1 %v5483_v51, %s8206_s18 }
0x158d   : > { %5504 = vrot.lane.b32.xlu1 %v8210_v1, %s8207_s1 }
0x159b   : > { %v3841_v38 = vpop.permute.xlu0 %3840 }
0x159c   : > { %v3842_v56 = vsel %vm1447_vm10, %v3841_v38, %v3828_v20 }
0x159d   : > { %3850 = vrot.lane.b32.xlu2 %v3842_v56, %s8198_s4 }
0x15a3   : > { %v3844_v53 = vpop.permute.xlu1 %3843  ;;  %v5470_v8 = vpop.permute.xlu0 %5469 }
0x15a4   : > { %v3845_v29 = vsel %vm1447_vm10, %v3844_v53, %v3831_v37 }
0x15a5   : > { %5494 = vrot.lane.b32.xlu2 %v5493_v62, %s8206_s18 }
0x15ab   : > { %v3835_v12 = vpop.permute.xlu1 %3834 }
0x15ac   : > { %v3836_v28 = vsel %vm1447_vm10, %v3835_v12, %v3822_v36 }
0x15ad   : > { %5509 = vrot.lane.b32.xlu2 %v8214_v63, %s8211_s3  ;;  %3846 = vrot.lane.b32.xlu0 %v3836_v28, %s8198_s4 }
0x15b3   : > { %v7411_v42 = vpop.permute.xlu1 %5474 }
0x15b4   : > { %v5477_v19 = vunpack.i.h.bf16 %v7411_v42 }
0x15b5   : > { %3852 = vrot.lane.b32.xlu0 %v3845_v29, %s8198_s4  ;;  %s8232_s4 = smov 73  }
0x15bd   : > { %5479 = vrot.lane.b32.xlu0 %v5478_v16, %s8206_s18  ;;  %s8246_s18 = sld [smem:[#allocation21_spill]] }
0x15c5   : > { %5489 = vrot.lane.b32.xlu0 %v8220_v58, %s8217_s6 }
0x15cd   : > { %5499 = vrot.lane.b32.xlu0 %v8224_v40, %s8221_s9 }
0x15ef   : > { %v3849_v24 = vpop.permute.xlu1 %3848 }
0x15f0   : > { %v7414_v32 = vsel %vm1447_vm10, %v3849_v24, %v3825_v26 }
0x15f1   : > { %v3883_v7 = vmul.f32 %v7414_v32, %v8225_v3  ;;  %v3871_v61 = vmul.f32 %v7414_v32, %v8226_v15  ;;  %v3865_v43 = vmul.f32 %v7414_v32, %v8227_v52  ;;  %v3895_v17 = vmul.f32 %v7414_v32, %v8228_v47 }
0x15f2   : > { %v3901_v58 = vmul.f32 %v7414_v32, %v8235_v21 }
0x15f7   : > { %v3851_v54 = vpop.permute.xlu2 %3850 }
0x15f8   : > { %v7447_v48 = vsel %vm1447_vm10, %v3851_v54, %v3828_v20 }
0x15f9   : > { %v3896_v30 = vmul.f32 %v7447_v48, %v8228_v47  ;;  %v3872_v1 = vmul.f32 %v7447_v48, %v8226_v15  ;;  %v3902_v56 = vmul.f32 %v7447_v48, %v8235_v21  ;;  %v3884_v63 = vmul.f32 %v7447_v48, %v8225_v3 }
0x15fa   : > { %v3866_v16 = vmul.f32 %v7447_v48, %v8227_v52 }
0x15ff   : > { %v7500_v22 = vpop.permute.xlu2 %5494 }
0x1607   : > { %v7502_v40 = vpop.permute.xlu2 %5509 }
0x161f   : > { %v3847_v41 = vpop.permute.xlu0 %3846 }
0x1620   : > { %v7417_v55 = vsel %vm1447_vm10, %v3847_v41, %v3822_v36  ;;  %v8233_v36 = vld [vmem:[#allocation55_spill] sm:$0xff]  ;;  %v8236_v41 = vld [vmem:[#allocation60_spill] sm:$0xff] }
0x1621   : > { %v3882_v46 = vmul.f32 %v7417_v55, %v8225_v3  ;;  %v3870_v18 = vmul.f32 %v7417_v55, %v8226_v15  ;;  %v3864_v27 = vmul.f32 %v7417_v55, %v8227_v52  ;;  %v3894_v6 = vmul.f32 %v7417_v55, %v8228_v47 }
0x1622   : > { %v3888_v26 = vmul.f32 %v7417_v55, %v8233_v36  ;;  %v3889_v25 = vmul.f32 %v7414_v32, %v8233_v36  ;;  %v3890_v38 = vmul.f32 %v7447_v48, %v8233_v36  ;;  %v3900_v39 = vmul.f32 %v7417_v55, %v8235_v21 }
0x1623   : > { %v5523_v14 = vpack.i.bf16 %v3882_v46, %v3883_v7  ;;  %v5513_v0 = vpack.i.bf16 %v3870_v18, %v3871_v61  ;;  %v5518_v50 = vpack.i.bf16 %v3864_v27, %v3865_v43  ;;  %v5528_v4 = vpack.i.bf16 %v3894_v6, %v3895_v17  ;;  %v5485_v46 = vpop.permute.xlu1 %5484 }
0x1624   : > { %v5533_v35 = vpack.i.bf16 %v3888_v26, %v3889_v25  ;;  %v5553_v59 = vpack.i.bf16 %v3900_v39, %v3901_v58  ;;  %v5486_v6 = vunpack.i.l.bf16 %v5485_v46 }
0x1625   : > { %5524 = vrot.lane.b32.xlu2 %v5523_v14, %s8211_s3  ;;  %5514 = vrot.lane.b32.xlu1 %v5513_v0, %s8170_s5 }
0x1626   : > { %5519 = vrot.lane.b32.xlu0 %v5518_v50, %s8190_s8 }
0x1627   : > { %v3853_v49 = vpop.permute.xlu0 %3852 }
0x1628   : > { %v7439_v2 = vsel %vm1447_vm10, %v3853_v49, %v3831_v37  ;;  %v8234_v37 = vld [vmem:[#allocation57_spill] sm:$0xff]  ;;  %vm4238_vm10 = vcmask 392192  }
0x1629   : > { %v3897_v45 = vmul.f32 %v7439_v2, %v8228_v47  ;;  %v3879_v13 = vmul.f32 %v7439_v2, %v8234_v37  ;;  %v3878_v20 = vmul.f32 %v7447_v48, %v8234_v37  ;;  %v3873_v60 = vmul.f32 %v7439_v2, %v8226_v15 }
0x162a   : > { %v3891_v51 = vmul.f32 %v7439_v2, %v8233_v36  ;;  %v3903_v31 = vmul.f32 %v7439_v2, %v8235_v21  ;;  %v3876_v28 = vmul.f32 %v7417_v55, %v8234_v37  ;;  %v3885_v33 = vmul.f32 %v7439_v2, %v8225_v3  ;;  %v8237_v3 = vld [vmem:[#allocation68_spill] sm:$0xff] }
0x162b   : > { %v5568_v5 = vpack.i.bf16 %v3896_v30, %v3897_v45  ;;  %v5578_v9 = vpack.i.bf16 %v3878_v20, %v3879_v13  ;;  %v5538_v62 = vpack.i.bf16 %v3872_v1, %v3873_v60  ;;  %v3877_v11 = vmul.f32 %v7414_v32, %v8234_v37  ;;  %v7508_v50 = vpop.permute.xlu1 %5504 }
0x162c   : > { %v5573_v53 = vpack.i.bf16 %v3890_v38, %v3891_v51  ;;  %v5583_v12 = vpack.i.bf16 %v3902_v56, %v3903_v31  ;;  %v5588_v23 = vpack.i.bf16 %v3884_v63, %v3885_v33  ;;  %v3867_v34 = vmul.f32 %v7439_v2, %v8227_v52 }
0x162d   : > { %5529 = vrot.lane.b32.xlu2 %v5528_v4, %s8202_s7  ;;  %5559 = vrot.lane.b32.xlu1 %v8231_v44, %s8170_s5  ;;  %v5543_v29 = vpack.i.bf16 %v3876_v28, %v3877_v11  ;;  %v3863_v7 = vmul.f32 %v8237_v3, %v8236_v41  ;;  %v5476_v44 = vunpack.i.l.bf16 %v7411_v42  ;;  %v8238_v42 = vld [vmem:[#allocation63_spill] sm:$0xff]  ;;  %v3861_v60 = vmul.f32 %v7439_v2, %v8236_v41 }
0x162e   : > { %5564 = vrot.lane.b32.xlu0 %v5470_v8, %s8232_s4  ;;  %v5548_v57 = vpack.i.bf16 %v3866_v16, %v3867_v34  ;;  %v5487_v1 = vunpack.i.h.bf16 %v5485_v46  ;;  %v3860_v2 = vmul.f32 %v7447_v48, %v8236_v41  ;;  %v3858_v48 = vmul.f32 %v7417_v55, %v8236_v41 }
0x162f   : > { %v5480_v8 = vpop.permute.xlu0 %5479  ;;  %v5496_v3 = vunpack.i.l.bf16 %v7500_v22 }
0x1630   : > { %v5481_v27 = vunpack.i.l.bf16 %v5480_v8  ;;  %v5482_v30 = vunpack.i.h.bf16 %v5480_v8 }
0x1632   : > { %v5628_v21 = vpack.i.bf16 %v5482_v30, %v3861_v60 }
0x1635   : > { %5534 = vrot.lane.b32.xlu2 %v5533_v35, %s8217_s6  ;;  %5569 = vrot.lane.b32.xlu1 %v5568_v5, %s8202_s7  ;;  %v3862_v5 = vmul.f32 %v8238_v42, %v8236_v41  ;;  %v8242_v42 = vld [vmem:[#allocation45_spill] sm:$0xff]  ;;  %s8245_s7 = smov 17  }
0x1636   : > { %5579 = vrot.lane.b32.xlu0 %v5578_v9, %s8221_s9 }
0x1637   : > { %v5490_v18 = vpop.permute.xlu0 %5489 }
0x1638   : > { %v5491_v0 = vunpack.i.l.bf16 %v5490_v18 }
0x163a   : > { %v5638_v17 = vpack.i.bf16 %v5491_v0, %v5486_v6 }
0x163d   : > { %5539 = vrot.lane.b32.xlu2 %v5538_v62, %s8170_s5  ;;  %5574 = vrot.lane.b32.xlu1 %v5573_v53, %s8217_s6  ;;  %v3859_v53 = vmul.f32 %v7414_v32, %v8236_v41  ;;  %v5497_v32 = vunpack.i.h.bf16 %v7500_v22  ;;  %v5512_v22 = vunpack.i.h.bf16 %v7502_v40  ;;  %s8239_s5 = sld [smem:[#allocation22_spill]]  ;;  %s8244_s6 = smov 15  }
0x163e   : > { %5584 = vrot.lane.b32.xlu0 %v5583_v12, %s8207_s1 }
0x163f   : > { %v7512_v49 = vpop.permute.xlu0 %5499  ;;  %v5643_v28 = vpack.i.bf16 %v5487_v1, %v3859_v53 }
0x1640   : > { %v5502_v34 = vunpack.i.h.bf16 %v7512_v49  ;;  %v5501_v55 = vunpack.i.l.bf16 %v7512_v49 }
0x1643   : > { %v4058_v30 = vld [vmem:[%s8239_s5] sm:$0xff] }
0x1645   : > { %5544 = vrot.lane.b32.xlu2 %v5543_v29, %s8221_s9  ;;  %5589 = vrot.lane.b32.xlu1 %v5588_v23, %s8211_s3  ;;  %v5492_v29 = vunpack.i.h.bf16 %v5490_v18  ;;  %s8241_s9 = smov 1   ;;  %s8243_s3 = smov 113  }
0x1647   : > { %v5648_v39 = vpack.i.bf16 %v3858_v48, %v5492_v29 }
0x164d   : > { %5549 = vrot.lane.b32.xlu2 %v5548_v57, %s8190_s8 }
0x1655   : > { %5554 = vrot.lane.b32.xlu2 %v5553_v59, %s8207_s1  ;;  %s8249_s1 = smov 111  }
0x167f   : > { %v5525_v24 = vpop.permute.xlu2 %5524 }
0x1680   : > { %v5527_v15 = vunpack.i.h.bf16 %v5525_v24  ;;  %v5526_v56 = vunpack.i.l.bf16 %v5525_v24 }
0x1682   : > { %v5598_v61 = vpack.i.bf16 %v5527_v15, %v3863_v7  ;;  %v5506_v7 = vunpack.i.l.bf16 %v7508_v50 }
0x1684   : > { %5599 = vrot.lane.b32.xlu1 %v5598_v61, %s8232_s4 }
0x1687   : > { %v5530_v52 = vpop.permute.xlu2 %5529 }
0x1688   : > { %v5531_v43 = vunpack.i.l.bf16 %v5530_v52  ;;  %v5532_v38 = vunpack.i.h.bf16 %v5530_v52  ;;  %v5511_v52 = vunpack.i.l.bf16 %v7502_v40 }
0x168a   : > { %v5613_v14 = vpack.i.bf16 %v5531_v43, %v5481_v27  ;;  %v5633_v33 = vpack.i.bf16 %v3860_v2, %v5532_v38  ;;  %v5507_v43 = vunpack.i.h.bf16 %v7508_v50 }
0x168c   : > { %5614 = vrot.lane.b32.xlu2 %v5613_v14, %s8232_s4 }
0x168f   : > { %v7510_v47 = vpop.permute.xlu2 %5534 }
0x1690   : > { %v5537_v63 = vunpack.i.h.bf16 %v7510_v47  ;;  %v5536_v8 = vunpack.i.l.bf16 %v7510_v47  ;;  %v5678_v47 = vpack.i.bf16 %v5507_v43, %v5511_v52 }
0x1692   : > { %v5673_v16 = vpack.i.bf16 %v5537_v63, %v5502_v34  ;;  %v5658_v15 = vpack.i.bf16 %v5536_v8, %v5501_v55 }
0x1694   : > { %5639 = vrot.lane.b32.xlu2 %v5638_v17, %s8232_s4 }
0x1697   : > { %v5540_v54 = vpop.permute.xlu2 %5539  ;;  %v5515_v4 = vpop.permute.xlu1 %5514 }
0x1698   : > { %v5520_v10 = vpop.permute.xlu0 %5519 }
0x1699   : > { %v5522_v36 = vunpack.i.h.bf16 %v5520_v10  ;;  %v5521_v26 = vunpack.i.l.bf16 %v5520_v10 }
0x169b   : > { %v5593_v45 = vpack.i.bf16 %v5522_v36, %v5477_v19  ;;  %v5608_v37 = vpack.i.bf16 %v5521_v26, %v5476_v44 }
0x169d   : > { %5594 = vrot.lane.b32.xlu0 %v5593_v45, %s8232_s4  ;;  %5609 = vrot.lane.b32.xlu1 %v5608_v37, %s8232_s4 }
0x169f   : > { %v7519_v13 = vpop.permute.xlu2 %5544  ;;  %v7521_v25 = vpop.permute.xlu1 %5559 }
0x16a0   : > { %v7532_v62 = vpop.permute.xlu0 %5564  ;;  %v5546_v14 = vunpack.i.l.bf16 %v7519_v13  ;;  %v5547_v50 = vunpack.i.h.bf16 %v7519_v13  ;;  %v5561_v10 = vunpack.i.l.bf16 %v7521_v25  ;;  %v5562_v37 = vunpack.i.h.bf16 %v7521_v25  ;;  %v8240_v13 = vld [vmem:[#allocation46_spill] sm:$0xff] }
0x16a5   : > { %5604 = vrot.lane.b32.xlu0 %v5515_v4, %s8232_s4  ;;  %5624 = vrot.lane.b32.xlu1 %v5540_v54, %s8232_s4 }
0x16a7   : > { %v5550_v20 = vpop.permute.xlu2 %5549  ;;  %v5570_v35 = vpop.permute.xlu1 %5569 }
0x16a8   : > { %v5572_v9 = vunpack.i.h.bf16 %v5570_v35  ;;  %5664 = vrot.lane.b32.xlu2 %v5550_v20, %s8232_s4  ;;  %v5571_v31 = vunpack.i.l.bf16 %v5570_v35  ;;  %v5580_v57 = vpop.permute.xlu0 %5579  ;;  %v4059_v20 = vld [vmem:[%s8239_s5 + $0x8] sm:$0xff]  ;;  %s8251_s5 = sld [smem:[#allocation24_spill]] }
0x16a9   : > { %v5581_v24 = vunpack.i.l.bf16 %v5580_v57  ;;  %v5582_v18 = vunpack.i.h.bf16 %v5580_v57 }
0x16aa   : > { %v5618_v51 = vpack.i.bf16 %v3862_v5, %v5572_v9  ;;  %v5668_v12 = vpack.i.bf16 %v5571_v31, %v5526_v56 }
0x16ab   : > { %v5698_v61 = vpack.i.bf16 %v5581_v24, %v5506_v7  ;;  %v5688_v0 = vpack.i.bf16 %v5512_v22, %v5582_v18 }
0x16ad   : > { %5619 = vrot.lane.b32.xlu0 %v5618_v51, %s8232_s4  ;;  %5629 = vrot.lane.b32.xlu1 %v5628_v21, %s8232_s4 }
0x16af   : > { %v5575_v11 = vpop.permute.xlu1 %5574  ;;  %v5555_v17 = vpop.permute.xlu2 %5554 }
0x16b0   : > { %5669 = vrot.lane.b32.xlu2 %v5668_v12, %s8232_s4  ;;  %v5577_v23 = vunpack.i.h.bf16 %v5575_v11  ;;  %v5576_v59 = vunpack.i.l.bf16 %v5575_v11  ;;  %v5585_v46 = vpop.permute.xlu0 %5584  ;;  %v5556_v4 = vunpack.i.l.bf16 %v5555_v17  ;;  %v5557_v45 = vunpack.i.h.bf16 %v5555_v17 }
0x16b1   : > { %v5586_v27 = vunpack.i.l.bf16 %v5585_v46  ;;  %v5587_v19 = vunpack.i.h.bf16 %v5585_v46 }
0x16b2   : > { %v5653_v58 = vpack.i.bf16 %v5577_v23, %v5497_v32  ;;  %v5683_v41 = vpack.i.bf16 %v5576_v59, %v5496_v3  ;;  %v5708_v36 = vpack.i.bf16 %v5561_v10, %v5556_v4  ;;  %v5718_v35 = vpack.i.bf16 %v5562_v37, %v5557_v45  ;;  %v4050_v10 = vld [vmem:[%s8246_s18] sm:$0xff] }
0x16b3   : > { %v5703_v6 = vpack.i.bf16 %v5546_v14, %v5586_v27 }
0x16b5   : > { %5634 = vrot.lane.b32.xlu0 %v5633_v33, %s8232_s4  ;;  %5644 = vrot.lane.b32.xlu1 %v5643_v28, %s8232_s4 }
0x16b7   : > { %v5590_v49 = vpop.permute.xlu1 %5589 }
0x16b8   : > { %5674 = vrot.lane.b32.xlu2 %v5673_v16, %s8232_s4  ;;  %v5592_v54 = vunpack.i.h.bf16 %v5590_v49  ;;  %v5591_v40 = vunpack.i.l.bf16 %v5590_v49  ;;  %v5566_v16 = vunpack.i.l.bf16 %v7532_v62 }
0x16ba   : > { %v5693_v44 = vpack.i.bf16 %v5592_v54, %v5547_v50  ;;  %v5713_v26 = vpack.i.bf16 %v5587_v19, %v5591_v40 }
0x16bd   : > { %5649 = vrot.lane.b32.xlu0 %v5648_v39, %s8232_s4  ;;  %5654 = vrot.lane.b32.xlu1 %v5653_v58, %s8232_s4  ;;  %v5567_v58 = vunpack.i.h.bf16 %v7532_v62 }
0x16c0   : > { %5684 = vrot.lane.b32.xlu2 %v5683_v41, %s8232_s4 }
0x16c5   : > { %5659 = vrot.lane.b32.xlu0 %v5658_v15, %s8232_s4  ;;  %5699 = vrot.lane.b32.xlu1 %v5698_v61, %s8232_s4 }
0x16c8   : > { %5689 = vrot.lane.b32.xlu2 %v5688_v0, %s8232_s4 }
0x16cd   : > { %5679 = vrot.lane.b32.xlu0 %v5678_v47, %s8232_s4  ;;  %5704 = vrot.lane.b32.xlu1 %v5703_v6, %s8232_s4 }
0x16d0   : > { %5694 = vrot.lane.b32.xlu2 %v5693_v44, %s8232_s4 }
0x16d5   : > { %5714 = vrot.lane.b32.xlu0 %v5713_v26, %s8232_s4  ;;  %5709 = vrot.lane.b32.xlu1 %v5708_v36, %s8232_s4 }
0x16d8   : > { %4062 = vperm.xlu2 %5041, %v4058_v30  }
0x16dd   : > { %5719 = vrot.lane.b32.xlu0 %v5718_v35, %s8232_s4  ;;  %4067 = vperm.xlu1 %5020, %v4059_v20   ;;  %s8250_s4 = smov 112  }
0x16e0   : > { %4441 = vrot.lane.b32.xlu2 %v8240_v13, %s8163_s0 }
0x16e5   : > { %4489 = vrot.lane.b32.xlu0 %v8240_v13, %s8241_s9  ;;  %4483 = vrot.lane.b32.xlu1 %v8242_v42, %s8241_s9 }
0x16e6   : > { %v5615_v25 = vpop.permute.xlu2 %5614 }
0x16e7   : > { %v5616_v2 = vunpack.i.l.bf16 %v5615_v25  ;;  %v5617_v8 = vunpack.i.h.bf16 %v5615_v25 }
0x16e8   : > { %4525 = vrot.lane.b32.xlu2 %v8242_v42, %s8243_s3 }
0x16ed   : > { %4465 = vrot.lane.b32.xlu0 %v8240_v13, %s8244_s6  ;;  %4459 = vrot.lane.b32.xlu1 %v8242_v42, %s8244_s6 }
0x16ee   : > { %v5640_v5 = vpop.permute.xlu2 %5639 }
0x16ef   : > { %v5641_v59 = vunpack.i.l.bf16 %v5640_v5  ;;  %v5642_v52 = vunpack.i.h.bf16 %v5640_v5  ;;  %v4054_v5 = vld [vmem:[%s8246_s18 + $0x20] sm:$0xff] }
0x16f0   : > { %4417 = vrot.lane.b32.xlu2 %v8240_v13, %s8245_s7 }
0x16f5   : > { %4435 = vrot.lane.b32.xlu0 %v8242_v42, %s8163_s0  ;;  %4531 = vrot.lane.b32.xlu1 %v8240_v13, %s8243_s3 }
0x16f6   : > { %v5600_v60 = vpop.permute.xlu1 %5599 }
0x16f7   : > { %v5602_v56 = vunpack.i.h.bf16 %v5600_v60  ;;  %v5601_v27 = vunpack.i.l.bf16 %v5600_v60 }
0x16fd   : > { %4411 = vrot.lane.b32.xlu0 %v8242_v42, %s8245_s7 }
0x1702   : > { %v5665_v9 = vpop.permute.xlu2 %5664 }
0x1703   : > { %v5666_v24 = vunpack.i.l.bf16 %v5665_v9  ;;  %v5667_v3 = vunpack.i.h.bf16 %v5665_v9 }
0x170a   : > { %v5670_v51 = vpop.permute.xlu2 %5669 }
0x170b   : > { %v5671_v21 = vunpack.i.l.bf16 %v5670_v51  ;;  %v5672_v12 = vunpack.i.h.bf16 %v5670_v51 }
0x170d   : > { %4268 = vmatpush.msrb.mxu1 %v5671_v21 }
0x170f   : > { %v5595_v31 = vpop.permute.xlu0 %5594  ;;  %v5610_v1 = vpop.permute.xlu1 %5609  ;;  %4269 = vmatpush.msrb.mxu1 %v5602_v56 }
0x1710   : > { %v5611_v38 = vunpack.i.l.bf16 %v5610_v1  ;;  %v5596_v53 = vunpack.i.l.bf16 %v5595_v31  ;;  %v5612_v15 = vunpack.i.h.bf16 %v5610_v1  ;;  %v5597_v18 = vunpack.i.h.bf16 %v5595_v31 }
0x1711   : > { %4270 = vmatpush.msrb.mxu1 %v5616_v2 }
0x1712   : > { %4291 = vmatpush.msra.mxu2 %v5611_v38  ;;  %v7592_v29 = vpop.permute.xlu2 %5674 }
0x1713   : > { %v5677_v37 = vunpack.i.h.bf16 %v7592_v29  ;;  %v5676_v30 = vunpack.i.l.bf16 %v7592_v29 }
0x1714   : > { %4292 = vmatpush.msra.mxu2 %v5596_v53 }
0x1716   : > { %4293 = vmatpush.msra.mxu2 %v5672_v12 }
0x1717   : > { %v5605_v28 = vpop.permute.xlu0 %5604  ;;  %v5625_v33 = vpop.permute.xlu1 %5624 }
0x1718   : > { %v5626_v11 = vunpack.i.l.bf16 %v5625_v33  ;;  %v5627_v63 = vunpack.i.h.bf16 %v5625_v33  ;;  %v5606_v23 = vunpack.i.l.bf16 %v5605_v28  ;;  %v5607_v34 = vunpack.i.h.bf16 %v5605_v28 }
0x171a   : > { %4245 = vmatpush.msra.mxu3 %v5626_v11  ;;  %v5685_v7 = vpop.permute.xlu2 %5684 }
0x171b   : > { %v5686_v62 = vunpack.i.l.bf16 %v5685_v7  ;;  %v5687_v17 = vunpack.i.h.bf16 %v5685_v7 }
0x171c   : > { %4246 = vmatpush.msra.mxu3 %v5627_v63  ;;  %v4052_v63 = vld [vmem:[%s8246_s18 + $0x10] sm:$0xff] }
0x171e   : > { %4247 = vmatpush.msra.mxu3 %v5606_v23 }
0x171f   : > { %v5620_v32 = vpop.permute.xlu0 %5619  ;;  %v5630_v48 = vpop.permute.xlu1 %5629 }
0x1720   : > { %v5621_v57 = vunpack.i.l.bf16 %v5620_v32  ;;  %v5632_v39 = vunpack.i.h.bf16 %v5630_v48  ;;  %4248 = vmatpush.msra.mxu3 %v5607_v34  ;;  %v5622_v22 = vunpack.i.h.bf16 %v5620_v32  ;;  %v5631_v0 = vunpack.i.l.bf16 %v5630_v48 }
0x1722   : > { %4249 = vmatpush.msra.mxu3 %v5566_v16  ;;  %4271 = vmatpush.msrb.mxu1 %v5632_v39  ;;  %v5690_v54 = vpop.permute.xlu2 %5689  ;;  %v4051_v16 = vld [vmem:[%s8246_s18 + $0x8] sm:$0xff]  ;;  %v7604_v39 = vld [vmem:[%s6021_s20 + $0x10] ss:$0 sm:$0xff] }
0x1723   : > { %4294 = vmatpush.msra.mxu2 %v5621_v57  ;;  %v5691_v35 = vunpack.i.l.bf16 %v5690_v54  ;;  %v5692_v1 = vunpack.i.h.bf16 %v5690_v54  ;;  %v4053_v57 = vld [vmem:[%s8246_s18 + $0x18] sm:$0xff]  ;;  %v4345_v54 = vld [vmem:[%s6061_s30 + $0x30] sm:$0xff] }
0x1724   : > { %4250 = vmatpush.msra.mxu3 %v5567_v58  ;;  %4272 = vmatpush.msrb.mxu1 %v5641_v59  ;;  %v8247_v58 = vld [vmem:[#allocation51_spill] sm:$0xff] }
0x1725   : > { %4295 = vmatpush.msra.mxu2 %v5617_v8  ;;  %v4579_v59 = vmul.f32 %v7604_v39, %v8247_v58 }
0x1726   : > { %4251 = vmatpush.msra.mxu3 %v5666_v24  ;;  %v4056_v24 = vld [vmem:[%s8246_s18 + $0x30] sm:$0xff] }
0x1727   : > { %v5635_v55 = vpop.permute.xlu0 %5634  ;;  %v5645_v41 = vpop.permute.xlu1 %5644 }
0x1728   : > { %v5636_v61 = vunpack.i.l.bf16 %v5635_v55  ;;  %v5647_v46 = vunpack.i.h.bf16 %v5645_v41  ;;  %4252 = vmatpush.msra.mxu3 %v5667_v3  ;;  %v5637_v49 = vunpack.i.h.bf16 %v5635_v55  ;;  %v5646_v4 = vunpack.i.l.bf16 %v5645_v41  ;;  %v4055_v55 = vld [vmem:[%s8246_s18 + $0x28] sm:$0xff]  ;;  %v4057_v41 = vld [vmem:[%s8246_s18 + $0x38] sm:$0xff] }
0x172a   : > { %4253 = vmatpush.msra.mxu3 %v5612_v15  ;;  %4273 = vmatpush.msrb.mxu1 %v5647_v46  ;;  %v5695_v25 = vpop.permute.xlu2 %5694 }
0x172b   : > { %4296 = vmatpush.msra.mxu2 %v5636_v61  ;;  %v5696_v38 = vunpack.i.l.bf16 %v5695_v25  ;;  %v5697_v11 = vunpack.i.h.bf16 %v5695_v25 }
0x172c   : > { %4254 = vmatpush.msra.mxu3 %v5597_v18  ;;  %4274 = vmatpush.msrb.mxu1 %v5686_v62 }
0x172d   : > { %4297 = vmatpush.msra.mxu2 %v5642_v52 }
0x172e   : > { %4255 = vmatpush.msra.mxu3 %v5601_v27  ;;  %v8248_v27 = vld [vmem:[#allocation30_spill] sm:$0xff] }
0x172f   : > { %v5650_v43 = vpop.permute.xlu0 %5649  ;;  %v5655_v14 = vpop.permute.xlu1 %5654  ;;  %vm8273_vm0 = vcmp.lt.s32.totalorder %v8248_v27, 17 }
0x1730   : > { %v5651_v47 = vunpack.i.l.bf16 %v5650_v43  ;;  %v5656_v6 = vunpack.i.l.bf16 %v5655_v14  ;;  %4256 = vmatpush.msra.mxu3 %v5622_v22  ;;  %v5657_v40 = vunpack.i.h.bf16 %v5655_v14  ;;  %v5652_v50 = vunpack.i.h.bf16 %v5650_v43  ;;  %vm8283_vm5 = vmmov %vm8273_vm0 }
0x1731   : > { %vm8284_vm9 = vmmov %vm8273_vm0 }
0x1732   : > { %4257 = vmatpush.msra.mxu3 %v5631_v0  ;;  %4275 = vmatpush.msrb.mxu1 %v5656_v6  ;;  %v4063_v8 = vpop.permute.xlu2 %4062  ;;  %v4351_v6 = vld [vmem:[%s6061_s30 + $0x60] sm:$0xff] }
0x1733   : > { %4298 = vmatpush.msra.mxu2 %v5651_v47  ;;  %v4353_v47 = vld [vmem:[%s6061_s30 + $0x70] sm:$0xff] }
0x1734   : > { %4258 = vmatpush.msra.mxu3 %v5637_v49  ;;  %v4349_v49 = vld [vmem:[%s6061_s30 + $0x50] sm:$0xff] }
0x1735   : > { %4299 = vmatpush.msra.mxu2 %v5687_v17  ;;  %v4347_v17 = vld [vmem:[%s6061_s30 + $0x40] sm:$0xff] }
0x1736   : > { %4259 = vmatpush.msra.mxu3 %v5646_v4  ;;  %v4343_v4 = vld [vmem:[%s6061_s30 + $0x20] sm:$0xff] }
0x1737   : > { %4300 = vmatpush.msra.mxu2 %v5657_v40  ;;  %v5660_v19 = vpop.permute.xlu0 %5659  ;;  %v5700_v44 = vpop.permute.xlu1 %5699  ;;  %v4341_v40 = vld [vmem:[%s6061_s30 + $0x10] sm:$0xff] }
0x1738   : > { %v5662_v36 = vunpack.i.h.bf16 %v5660_v19  ;;  %v5661_v26 = vunpack.i.l.bf16 %v5660_v19  ;;  %v5701_v45 = vunpack.i.l.bf16 %v5700_v44  ;;  %4260 = vmatpush.msra.mxu3 %v5652_v50  ;;  %v5702_v20 = vunpack.i.h.bf16 %v5700_v44  ;;  %v4339_v50 = vld [vmem:[%s6061_s30] sm:$0xff] }
0x1739   : > { %4261 = vmatmul.f32.vlgmr.msra.gmra.mxu3 %v4050_v10 }
0x173a   : > { %4276 = vmatpush.msrb.mxu1 %v5661_v26  ;;  %4301 = vmatpush.msra.mxu2 %v5662_v36  ;;  %v4442_v15 = vpop.permute.xlu2 %4441 }
0x173b   : > { %4324 = vmatpush.msrb.mxu3 %v5701_v45 }
0x173c   : > { %4277 = vmatpush.msrb.mxu1 %v5676_v30  ;;  %4302 = vmatpush.msra.mxu2 %v5677_v37 }
0x173e   : > { %4278 = vmatpush.msrb.mxu1 %v5702_v20 }
0x173f   : > { %v5680_v9 = vpop.permute.xlu0 %5679  ;;  %v5705_v60 = vpop.permute.xlu1 %5704 }
0x1740   : > { %v5682_v51 = vunpack.i.h.bf16 %v5680_v9  ;;  %v5681_v21 = vunpack.i.l.bf16 %v5680_v9  ;;  %v5707_v31 = vunpack.i.h.bf16 %v5705_v60  ;;  %4279 = vmatpush.msrb.mxu1 %v5691_v35  ;;  %v5706_v56 = vunpack.i.l.bf16 %v5705_v60 }
0x1741   : > { %4264 = vmatmul.f32.gmra.mxu3 %v4054_v5 }
0x1742   : > { %4280 = vmatpush.msrb.mxu1 %v5707_v31  ;;  %4303 = vmatpush.msra.mxu2 %v5681_v21  ;;  %v4526_v18 = vpop.permute.xlu2 %4525 }
0x1743   : > { %4325 = vmatpush.msrb.mxu3 %v5682_v51 }
0x1744   : > { %4281 = vmatpush.msrb.mxu1 %v5696_v38  ;;  %4304 = vmatpush.msra.mxu2 %v5692_v1 }
0x1745   : > { %4326 = vmatpush.msrb.mxu3 %v5706_v56 }
0x1747   : > { %v5715_v53 = vpop.permute.xlu0 %5714  ;;  %v5710_v2 = vpop.permute.xlu1 %5709 }
0x1748   : > { %v5717_v12 = vunpack.i.h.bf16 %v5715_v53  ;;  %v5716_v28 = vunpack.i.l.bf16 %v5715_v53  ;;  %v5712_v33 = vunpack.i.h.bf16 %v5710_v2  ;;  %v5711_v29 = vunpack.i.l.bf16 %v5710_v2 }
0x174a   : > { %4282 = vmatpush.msrb.mxu1 %v5712_v33  ;;  %4305 = vmatpush.msra.mxu2 %v5716_v28  ;;  %v7702_v28 = vpop.permute.xlu2 %4417  ;;  %v4676_v33 = vld [vmem:[%s8252_s10] sm:$0x7]  ;;  %s8286_s10 = sld [smem:[#allocation25_spill]] }
0x174b   : > { %4327 = vmatpush.msrb.mxu3 %v5717_v12  ;;  %v4583_v12 = vld [vmem:[%s8251_s5] sm:$0xff] }
0x174c   : > { %4306 = vmatpush.msra.mxu2 %v5697_v11 }
0x174d   : > { %4328 = vmatpush.msrb.mxu3 %v5711_v29  ;;  %4307 = vmatmul.f32.vlgmr.msra.gmra.mxu2 %v4052_v63 }
0x174f   : > { %v5720_v23 = vpop.permute.xlu0 %5719  ;;  %v4068_v34 = vpop.permute.xlu1 %4067 }
0x1750   : > { %v5722_v32 = vunpack.i.h.bf16 %v5720_v23  ;;  %v5721_v48 = vunpack.i.l.bf16 %v5720_v23 }
0x1752   : > { %4283 = vmatpush.msrb.mxu1 %v5722_v32  ;;  %4329 = vmatpush.msrb.mxu3 %v5721_v48 }
0x1753   : > { %4284 = vmatmul.f32.vlgmr.msrb.gmra.mxu1 %v4051_v16  ;;  %4911 = vmatmul.msk.f32.vlgmr.msrb.gmra.mxu3 %vm4238_vm10, %v4053_v57  ;;  %v8253_v57 = vld [vmem:[#allocation35_spill] sm:$0xff] }
0x1754   : > { %4618 = vmatpush.msra.mxu3 %v4579_v59  ;;  %4369 = vmatpush.msra.mxu1 %v4353_v47  ;;  %v8254_v59 = vld [vmem:[#allocation36_spill] sm:$0xff]  ;;  %v8256_v47 = vld [vmem:[#allocation38_spill] sm:$0xff] }
0x1755   : > { %4310 = vmatmul.f32.gmra.mxu2 %v4056_v24 }
0x1756   : > { %4370 = vmatpush.msra.mxu1 %v4351_v6 }
0x1757   : > { %v7610_v3 = vpop.permute.xlu0 %4489  ;;  %v7612_v7 = vpop.permute.xlu1 %4483 }
0x1758   : > { %4371 = vmatpush.msra.mxu1 %v4349_v49 }
0x175a   : > { %4372 = vmatpush.msra.mxu1 %v4347_v17 }
0x175b   : > { %4287 = vmatmul.f32.gmra.mxu1 %v4055_v55  ;;  %4912 = vmatmul.msk.f32.gmra.mxu3 %vm4238_vm10, %v4057_v41  ;;  %v4493_v55 = vsel %vm1181_vm2, %v7612_v7, %v7610_v3  ;;  %v4496_v41 = vsel %vm1181_vm2, %v7610_v3, %v7612_v7  ;;  %vm8285_vm10 = vmmov %vm8273_vm0 }
0x175c   : > { %4373 = vmatpush.msra.mxu1 %v4345_v54 }
0x175e   : > { %4374 = vmatpush.msra.mxu1 %v4343_v4 }
0x175f   : > { %v7617_v61 = vpop.permute.xlu0 %4465  ;;  %v7619_v46 = vpop.permute.xlu1 %4459 }
0x1760   : > { %4375 = vmatpush.msra.mxu1 %v4341_v40 }
0x1762   : > { %4376 = vmatpush.msra.mxu1 %v4339_v50 }
0x1767   : > { %v4436_v62 = vpop.permute.xlu0 %4435  ;;  %v4532_v52 = vpop.permute.xlu1 %4531 }
0x1768   : > { %v7623_v22 = vsel %vm1149_vm4, %v4436_v62, %v4442_v15  ;;  %v7627_v43 = vsel %vm1149_vm4, %v4442_v15, %v4436_v62  ;;  %v7631_v14 = vsel %vm1213_vm3, %v4526_v18, %v4532_v52  ;;  %v7635_v0 = vsel %vm1213_vm3, %v4532_v52, %v4526_v18  ;;  %v8255_v62 = vld [vmem:[#allocation37_spill] sm:$0xff] }
0x1769   : > { %v4501_v52 = vmul.f32 %v4496_v41, %v8255_v62 }
0x176f   : > { %v7705_v29 = vpop.permute.xlu0 %4411 }
0x17bc   : > { %v4262_v10 = vpop.f32.mrf.mxu3 }
0x17bd   : > { %v4263_v44 = vadd.f32 %v4262_v10, %v4063_v8 }
0x17c4   : > { %v4265_v19 = vpop.f32.mrf.mxu3 }
0x17c5   : > { %v4266_v20 = vadd.f32 %v4265_v19, %v4068_v34 }
0x17d0   : > { %v4285_v36 = vpop.f32.mrf.mxu1  ;;  %v4308_v26 = vpop.f32.mrf.mxu2 }
0x17d1   : > { %v4286_v45 = vadd.f32 %v4285_v36, %v4263_v44 }
0x17d3   : > { %v4309_v37 = vadd.f32 %v4308_v26, %v4286_v45  ;;  %v4469_v26 = vsel %vm1165_vm8, %v7619_v46, %v7617_v61  ;;  %v4472_v45 = vsel %vm1165_vm8, %v7617_v61, %v7619_v46 }
0x17d6   : > { %v4331_v30 = vpop.f32.mrf.mxu3 }
0x17d7   : > { %v4332_v35 = vadd.f32 %v4331_v30, %v4309_v37 }
0x17d8   : > { %v4288_v25 = vpop.f32.mrf.mxu1  ;;  %v4311_v60 = vpop.f32.mrf.mxu2 }
0x17d9   : > { %v4337_v5 = vmax.f32 %v4332_v35, 0.0  ;;  %v4289_v9 = vadd.f32 %v4288_v25, %v4266_v20  ;;  %v8257_v35 = vld [vmem:[#allocation43_spill] sm:$0xff] }
0x17da   : > { %v4477_v25 = vmul.f32 %v4472_v45, %v8257_v35 }
0x17db   : > { %4913 = vmatmul.msk.f32.vlgmr.msra.gmra.mxu1 %vm1646_vm12, %v4337_v5  ;;  %4915 = vmatmul.msk.f32.vlgmr.msrb.gmra.mxu0 %vm1646_vm12, %v4337_v5  ;;  %v4312_v51 = vadd.f32 %v4311_v60, %v4289_v9  ;;  %v8258_v5 = vld [vmem:[#allocation44_spill] sm:$0xff] }
0x17dc   : > { %v4478_v9 = vmul.f32 %v4469_v26, %v8258_v5 }
0x17de   : > { %v4334_v21 = vpop.f32.mrf.mxu3 }
0x17df   : > { %v4335_v31 = vadd.f32 %v4334_v21, %v4312_v51 }
0x17e1   : > { %v4338_v1 = vmax.f32 %v4335_v31, 0.0 }
0x17e3   : > { %4914 = vmatmul.msk.f32.gmra.mxu1 %vm1646_vm12, %v4338_v1  ;;  %4916 = vmatmul.msk.f32.gmra.mxu0 %vm1646_vm12, %v4338_v1 }
0x1858   : > { %v7649_v38 = vpop.f32.mrf.mxu1  ;;  %v7651_v56 = vpop.f32.mrf.mxu0 }
0x1859   : > { %4507 = vrot.lane.b32.xlu2 %v7651_v56, %s8190_s8  ;;  %4563 = vrot.lane.b32.xlu1 %v7649_v38, %s8249_s1 }
0x185a   : > { %4503 = vrot.lane.b32.xlu0 %v7649_v38, %s8190_s8 }
0x1860   : > { %v4404_v53 = vpop.f32.mrf.mxu0  ;;  %v4381_v2 = vpop.f32.mrf.mxu1 }
0x1861   : > { %4485 = vrot.lane.b32.xlu2 %v7651_v56, %s8241_s9  ;;  %4461 = vrot.lane.b32.xlu1 %v7651_v56, %s8244_s6 }
0x1862   : > { %4479 = vrot.lane.b32.xlu0 %v7649_v38, %s8241_s9 }
0x1869   : > { %4455 = vrot.lane.b32.xlu2 %v7649_v38, %s8244_s6  ;;  %4431 = vrot.lane.b32.xlu1 %v7649_v38, %s8163_s0 }
0x186a   : > { %4567 = vrot.lane.b32.xlu0 %v7651_v56, %s8249_s1 }
0x1871   : > { %4549 = vrot.lane.b32.xlu2 %v7651_v56, %s8250_s4  ;;  %4407 = vrot.lane.b32.xlu1 %v7649_v38, %s8245_s7 }
0x1872   : > { %4545 = vrot.lane.b32.xlu0 %v7649_v38, %s8250_s4 }
0x1879   : > { %4527 = vrot.lane.b32.xlu2 %v7651_v56, %s8243_s3  ;;  %4487 = vrot.lane.b32.xlu1 %v4404_v53, %s8241_s9 }
0x187a   : > { %4437 = vrot.lane.b32.xlu0 %v7651_v56, %s8163_s0 }
0x1881   : > { %4569 = vrot.lane.b32.xlu1 %v4404_v53, %s8249_s1  ;;  %4481 = vrot.lane.b32.xlu2 %v4381_v2, %s8241_s9 }
0x1882   : > { %4521 = vrot.lane.b32.xlu0 %v7649_v38, %s8243_s3 }
0x1889   : > { %4547 = vrot.lane.b32.xlu1 %v4381_v2, %s8250_s4  ;;  %4565 = vrot.lane.b32.xlu2 %v4381_v2, %s8249_s1 }
0x188a   : > { %4457 = vrot.lane.b32.xlu0 %v4381_v2, %s8244_s6 }
0x1891   : > { %4439 = vrot.lane.b32.xlu1 %v4404_v53, %s8163_s0  ;;  %4463 = vrot.lane.b32.xlu2 %v4404_v53, %s8244_s6 }
0x1892   : > { %4551 = vrot.lane.b32.xlu0 %v4404_v53, %s8250_s4 }
0x1899   : > { %4523 = vrot.lane.b32.xlu1 %v4381_v2, %s8243_s3  ;;  %4433 = vrot.lane.b32.xlu2 %v4381_v2, %s8163_s0  ;;  %s8281_s0 = sld [smem:[#allocation23_spill]] }
0x189a   : > { %4529 = vrot.lane.b32.xlu0 %v4404_v53, %s8243_s3 }
0x18a1   : > { %4415 = vrot.lane.b32.xlu1 %v4404_v53, %s8245_s7  ;;  %4409 = vrot.lane.b32.xlu2 %v4381_v2, %s8245_s7 }
0x18a2   : > { %4413 = vrot.lane.b32.xlu0 %v7651_v56, %s8245_s7 }
0x18a9   : > { %4509 = vrot.lane.b32.xlu1 %v4404_v53, %s8190_s8  ;;  %4505 = vrot.lane.b32.xlu2 %v4381_v2, %s8190_s8  ;;  %s8287_s8 = sshll.u32 %s8289_s2, 3 }
0x18aa   : > { %4586 = vperm.xlu0 %5127, %v4583_v12   ;;  %s1115_s5 = scalar_lea.vmem %s6066_s27, %s8287_s8 }
0x18b1   : > { %4679 = vperm.xlu2 %5041, %v4676_v33   ;;  %v8263_v33 = vld [vmem:[#allocation31_spill] sm:$0xff] }
0x18b3   : > { %v4508_v11 = vpop.permute.xlu2 %4507 }
0x18bb   : > { %v4486_v63 = vpop.permute.xlu2 %4485 }
0x18c3   : > { %v7707_v23 = vpop.permute.xlu2 %4455 }
0x18cb   : > { %v4564_v34 = vpop.permute.xlu1 %4563  ;;  %v7715_v24 = vpop.permute.xlu2 %4549 }
0x18cc   : > { %v4504_v32 = vpop.permute.xlu0 %4503 }
0x18cd   : > { %v4511_v48 = vsel %vm1197_vm1, %v4504_v32, %v4508_v11  ;;  %v4513_v16 = vsel %vm1197_vm1, %v4508_v11, %v4504_v32  ;;  %v8264_v11 = vld [vmem:[#allocation49_spill] sm:$0xff]  ;;  %v8266_v32 = vld [vmem:[#allocation50_spill] sm:$0xff] }
0x18ce   : > { %v4515_v58 = vmul.f32 %v4511_v48, %v8253_v57  ;;  %v4516_v8 = vmul.f32 %v4513_v16, %v8254_v59 }
0x18d0   : > { %4593 = vmatpush.msrb.mxu2 %v4515_v58  ;;  %4633 = vmatpush.msrb.mxu1 %v4516_v8 }
0x18d2   : > { %4594 = vmatpush.msrb.mxu2 %v8242_v42  ;;  %4634 = vmatpush.msrb.mxu1 %v8240_v13  ;;  %v4502_v42 = vmul.f32 %v4493_v55, %v8256_v47 }
0x18d3   : > { %v4462_v15 = vpop.permute.xlu1 %4461  ;;  %v7731_v13 = vpop.permute.xlu2 %4527 }
0x18d4   : > { %4635 = vmatpush.msrb.mxu1 %v4404_v53  ;;  %v4480_v18 = vpop.permute.xlu0 %4479  ;;  %4595 = vmatpush.msrb.mxu2 %v4381_v2  ;;  %v4470_v8 = vsel %vm1165_vm8, %v4462_v15, %v7707_v23 }
0x18d5   : > { %v4491_v4 = vsel %vm1181_vm2, %v4480_v18, %v4486_v63  ;;  %v4494_v40 = vsel %vm1181_vm2, %v4486_v63, %v4480_v18  ;;  %v4561_v63 = vmul.f32 %v8264_v11, %v8263_v33 }
0x18d6   : > { %4596 = vmatpush.msrb.mxu2 %v7649_v38  ;;  %4636 = vmatpush.msrb.mxu1 %v7651_v56  ;;  %v4497_v37 = vmul.f32 %v4494_v40, %v8255_v62  ;;  %v4498_v30 = vmul.f32 %v4491_v4, %v8256_v47  ;;  %v5759_v38 = vld [vmem:[%s6021_s20 + $0x18] ss:$0 sm:$0xff] }
0x18d8   : > { %4597 = vmatpush.msrb.mxu2 %v4501_v52  ;;  %4637 = vmatpush.msrb.mxu1 %v4502_v42  ;;  %v4473_v52 = vmul.f32 %v4470_v8, %v8257_v35  ;;  %v8267_v42 = vld [vmem:[#allocation33_spill] sm:$0xff] }
0x18db   : > { %v7733_v6 = vpop.permute.xlu1 %4431  ;;  %v4482_v17 = vpop.permute.xlu2 %4481 }
0x18dc   : > { %v4568_v49 = vpop.permute.xlu0 %4567 }
0x18e3   : > { %v7735_v3 = vpop.permute.xlu1 %4407  ;;  %v4566_v20 = vpop.permute.xlu2 %4565 }
0x18e4   : > { %v4546_v7 = vpop.permute.xlu0 %4545 }
0x18eb   : > { %v4488_v54 = vpop.permute.xlu1 %4487  ;;  %v4464_v12 = vpop.permute.xlu2 %4463 }
0x18ec   : > { %v4492_v50 = vsel %vm1181_vm2, %v4482_v17, %v4488_v54  ;;  %v4495_v10 = vsel %vm1181_vm2, %v4488_v54, %v4482_v17  ;;  %v4438_v19 = vpop.permute.xlu0 %4437  ;;  %vm8259_vm2 = vcmp.lt.s32.totalorder %v8248_v27, 111 }
0x18ed   : > { %v4499_v44 = vmul.f32 %v4495_v10, %v8255_v62  ;;  %v4500_v36 = vmul.f32 %v4492_v50, %v8256_v47  ;;  %v4571_v61 = vsel %vm8259_vm2, %v4564_v34, %v4568_v49  ;;  %vm8260_vm12 = vmmov %vm8259_vm2  ;;  %v4443_v4 = vsel %vm1149_vm4, %v7733_v6, %v4438_v19 }
0x18ee   : > { %v4573_v46 = vsel %vm8260_vm12, %v4568_v49, %v4564_v34  ;;  %vm8261_vm13 = vmmov %vm8259_vm2  ;;  %v4575_v53 = vmul.f32 %v7604_v39, %v4571_v61  ;;  %v8265_v34 = vld [vmem:[#allocation32_spill] sm:$0xff]  ;;  %v4453_v49 = vmul.f32 %v7627_v43, %v8267_v42 }
0x18ef   : > { %4598 = vmatpush.msrb.mxu2 %v4499_v44  ;;  %4638 = vmatpush.msrb.mxu1 %v4500_v36  ;;  %vm8262_vm14 = vmmov %vm8259_vm2  ;;  %v4576_v2 = vmul.f32 %v5759_v38, %v4573_v46  ;;  %v4562_v48 = vmul.f32 %v8266_v32, %v8265_v34  ;;  %v8278_v46 = vld [vmem:[#allocation40_spill] sm:$0xff]  ;;  %vm4589_vm2 = vcmask 719872  }
0x18f1   : > { %4599 = vmatpush.msrb.mxu2 %v4497_v37  ;;  %4639 = vmatpush.msrb.mxu1 %v4498_v30 }
0x18f3   : > { %v4570_v60 = vpop.permute.xlu1 %4569  ;;  %4640 = vmatpush.msrb.mxu1 %v4478_v9  ;;  %4600 = vmatpush.msrb.mxu2 %v4477_v25  ;;  %v4434_v40 = vpop.permute.xlu2 %4433 }
0x18f4   : > { %v4572_v51 = vsel %vm8261_vm13, %v4566_v20, %v4570_v60  ;;  %v4574_v21 = vsel %vm8262_vm14, %v4570_v60, %v4566_v20  ;;  %v7767_v31 = vpop.permute.xlu0 %4521  ;;  %v8276_v60 = vld [vmem:[#allocation42_spill] sm:$0xff] }
0x18f5   : > { %v4577_v1 = vmul.f32 %v7604_v39, %v4572_v51  ;;  %v4578_v56 = vmul.f32 %v5759_v38, %v4574_v21  ;;  %v4467_v39 = vsel %vm1165_vm8, %v7707_v23, %v4462_v15  ;;  %v8268_v23 = vld [vmem:[#allocation34_spill] sm:$0xff]  ;;  %v4544_v51 = vmul.f32 %v7635_v0, %v8278_v46 }
0x18f6   : > { %v4474_v47 = vmul.f32 %v4467_v39, %v8258_v5  ;;  %v4454_v15 = vmul.f32 %v7623_v22, %v8268_v23  ;;  %v4446_v22 = vsel %vm1149_vm4, %v4438_v19, %v7733_v6  ;;  %v4421_v6 = vsel %vm8273_vm0, %v7705_v29, %v7702_v28 }
0x18f7   : > { %4619 = vmatpush.msra.mxu3 %v4577_v1  ;;  %4659 = vmatpush.msra.mxu0 %v4578_v56  ;;  %v4449_v30 = vmul.f32 %v4446_v22, %v8267_v42  ;;  %v4450_v20 = vmul.f32 %v4443_v4, %v8268_v23  ;;  %v4533_v38 = vsel %vm1213_vm3, %v7767_v31, %v7731_v13 }
0x18f9   : > { %4620 = vmatpush.msra.mxu3 %v4575_v53  ;;  %4660 = vmatpush.msra.mxu0 %v4576_v2 }
0x18fb   : > { %v4548_v16 = vpop.permute.xlu1 %4547  ;;  %4621 = vmatpush.msra.mxu3 %v4561_v63  ;;  %4661 = vmatpush.msra.mxu0 %v4562_v48  ;;  %v4410_v11 = vpop.permute.xlu2 %4409  ;;  %v8280_v63 = vld [vmem:[#allocation48_spill] sm:$0xff] }
0x18fc   : > { %v4458_v58 = vpop.permute.xlu0 %4457 }
0x18fd   : > { %v4468_v55 = vsel %vm1165_vm8, %v4458_v58, %v4464_v12  ;;  %v4471_v41 = vsel %vm1165_vm8, %v4464_v12, %v4458_v58  ;;  %vm8269_vm8 = vcmp.lt.s32.totalorder %v8248_v27, 112  ;;  %v4675_v27 = vld [vmem:[%s8286_s10] sm:$0x7] }
0x18fe   : > { %v4475_v18 = vmul.f32 %v4471_v41, %v8257_v35  ;;  %v4476_v62 = vmul.f32 %v4468_v55, %v8258_v5  ;;  %v4553_v17 = vsel %vm8269_vm8, %v4546_v7, %v7715_v24  ;;  %vm8270_vm15 = vmmov %vm8269_vm8  ;;  %v8275_v5 = vld [vmem:[#allocation41_spill] sm:$0xff] }
0x18ff   : > { %v4555_v54 = vsel %vm8270_vm15, %v7715_v24, %v4546_v7  ;;  %vm8271_vm6 = vmmov %vm8269_vm8  ;;  %v4557_v35 = vmul.f32 %v4553_v17, %v8263_v33  ;;  %v4582_v17 = vld [vmem:[%s8281_s0 + $0x8] sm:$0xff] }
0x1900   : > { %4601 = vmatpush.msrb.mxu2 %v4475_v18  ;;  %4641 = vmatpush.msrb.mxu1 %v4476_v62  ;;  %vm8272_vm11 = vmmov %vm8271_vm6  ;;  %v4558_v25 = vmul.f32 %v4555_v54, %v8265_v34 }
0x1902   : > { %4602 = vmatpush.msrb.mxu2 %v4473_v52  ;;  %4642 = vmatpush.msrb.mxu1 %v4474_v47  ;;  %v4581_v52 = vld [vmem:[%s8281_s0] sm:$0xff] }
0x1903   : > { %v4440_v50 = vpop.permute.xlu1 %4439  ;;  %v4506_v47 = vpop.permute.xlu2 %4505 }
0x1904   : > { %v4444_v43 = vsel %vm1149_vm4, %v4434_v40, %v4440_v50  ;;  %v4447_v10 = vsel %vm1149_vm4, %v4440_v50, %v4434_v40  ;;  %v4552_v44 = vpop.permute.xlu0 %4551  ;;  %4643 = vmatpush.msrb.mxu1 %v4454_v15  ;;  %4603 = vmatpush.msrb.mxu2 %v4453_v49  ;;  %vm8274_vm4 = vmmov %vm8273_vm0 }
0x1905   : > { %v4451_v24 = vmul.f32 %v4447_v10, %v8267_v42  ;;  %v4452_v7 = vmul.f32 %v4444_v43, %v8268_v23  ;;  %v4554_v36 = vsel %vm8271_vm6, %v4548_v16, %v4552_v44  ;;  %v4556_v26 = vsel %vm8272_vm11, %v4552_v44, %v4548_v16 }
0x1906   : > { %v4424_v19 = vsel %vm8274_vm4, %v7702_v28, %v7705_v29  ;;  %v4559_v45 = vmul.f32 %v4554_v36, %v8263_v33  ;;  %v4560_v37 = vmul.f32 %v4556_v26, %v8265_v34  ;;  %v4430_v28 = vmul.f32 %v4421_v6, %v8276_v60  ;;  %v8277_v29 = vld [vmem:[#allocation39_spill] sm:$0xff] }
0x1907   : > { %4604 = vmatpush.msrb.mxu2 %v4451_v24  ;;  %4644 = vmatpush.msrb.mxu1 %v4452_v7  ;;  %v4429_v9 = vmul.f32 %v4424_v19, %v8275_v5  ;;  %v4543_v61 = vmul.f32 %v7631_v14, %v8277_v29  ;;  %v4536_v14 = vsel %vm1213_vm3, %v7731_v13, %v7767_v31  ;;  %v8279_v13 = vld [vmem:[#allocation47_spill] sm:$0xff] }
0x1908   : > { %4622 = vmatpush.msra.mxu3 %v4559_v45  ;;  %4662 = vmatpush.msra.mxu0 %v4560_v37  ;;  %v4539_v12 = vmul.f32 %v4533_v38, %v8277_v29  ;;  %v4540_v33 = vmul.f32 %v4536_v14, %v8278_v46  ;;  %v4519_v31 = vmul.f32 %v8279_v13, %v8253_v57 }
0x1909   : > { %4605 = vmatpush.msrb.mxu2 %v4449_v30  ;;  %4645 = vmatpush.msrb.mxu1 %v4450_v20  ;;  %v4520_v34 = vmul.f32 %v8280_v63, %v8254_v59 }
0x190a   : > { %4623 = vmatpush.msra.mxu3 %v4557_v35  ;;  %4663 = vmatpush.msra.mxu0 %v4558_v25 }
0x190b   : > { %v4524_v21 = vpop.permute.xlu1 %4523  ;;  %4646 = vmatpush.msrb.mxu1 %v4430_v28  ;;  %4606 = vmatpush.msrb.mxu2 %v4429_v9  ;;  %v4680_v36 = vpop.permute.xlu2 %4679 }
0x190c   : > { %v4530_v1 = vpop.permute.xlu0 %4529  ;;  %4624 = vmatpush.msra.mxu3 %v4543_v61  ;;  %4664 = vmatpush.msra.mxu0 %v4544_v51 }
0x190d   : > { %v4534_v0 = vsel %vm1213_vm3, %v4524_v21, %v4530_v1  ;;  %v4537_v56 = vsel %vm1213_vm3, %v4530_v1, %v4524_v21  ;;  %vm8282_vm3 = vmmov %vm8273_vm0 }
0x190e   : > { %v4541_v53 = vmul.f32 %v4534_v0, %v8277_v29  ;;  %v4542_v2 = vmul.f32 %v4537_v56, %v8278_v46 }
0x1910   : > { %4625 = vmatpush.msra.mxu3 %v4541_v53  ;;  %4665 = vmatpush.msra.mxu0 %v4542_v2 }
0x1912   : > { %4626 = vmatpush.msra.mxu3 %v4539_v12  ;;  %4666 = vmatpush.msra.mxu0 %v4540_v33 }
0x1913   : > { %v4416_v32 = vpop.permute.xlu1 %4415 }
0x1914   : > { %v4420_v48 = vsel %vm8282_vm3, %v4410_v11, %v4416_v32  ;;  %v4423_v16 = vsel %vm8283_vm5, %v4416_v32, %v4410_v11  ;;  %v4414_v58 = vpop.permute.xlu0 %4413  ;;  %4627 = vmatpush.msra.mxu3 %v4519_v31  ;;  %4667 = vmatpush.msra.mxu0 %v4520_v34 }
0x1915   : > { %v4427_v39 = vmul.f32 %v4423_v16, %v8275_v5  ;;  %v4428_v8 = vmul.f32 %v4420_v48, %v8276_v60  ;;  %v4419_v55 = vsel %vm8284_vm9, %v7735_v3, %v4414_v58  ;;  %v4422_v41 = vsel %vm8285_vm10, %v4414_v58, %v7735_v3 }
0x1916   : > { %v4425_v18 = vmul.f32 %v4422_v41, %v8275_v5  ;;  %v4426_v62 = vmul.f32 %v4419_v55, %v8276_v60 }
0x1917   : > { %4607 = vmatpush.msrb.mxu2 %v4427_v39  ;;  %4647 = vmatpush.msrb.mxu1 %v4428_v8 }
0x1919   : > { %4608 = vmatpush.msrb.mxu2 %v4425_v18  ;;  %4648 = vmatpush.msrb.mxu1 %v4426_v62 }
0x191a   : > { %4609 = vmatmul.f32.vlgmr.msrb.gmra.mxu2 %v4581_v52  ;;  %4649 = vmatmul.f32.vlgmr.msrb.gmra.mxu1 %v4581_v52 }
0x191b   : > { %v4510_v42 = vpop.permute.xlu1 %4509 }
0x191c   : > { %v4512_v49 = vsel %vm1197_vm1, %v4506_v47, %v4510_v42  ;;  %v4514_v3 = vsel %vm1197_vm1, %v4510_v42, %v4506_v47  ;;  %v4587_v4 = vpop.permute.xlu0 %4586  ;;  %vm4682_vm1 = vcmask 64512  }
0x191d   : > { %v4517_v23 = vmul.f32 %v4512_v49, %v8253_v57  ;;  %v4518_v15 = vmul.f32 %v4514_v3, %v8254_v59 }
0x191f   : > { %4628 = vmatpush.msra.mxu3 %v4517_v23  ;;  %4668 = vmatpush.msra.mxu0 %v4518_v15 }
0x1920   : > { %4917 = vmatmul.msk.f32.vlgmr.msra.gmra.mxu3 %vm4589_vm2, %v4582_v17  ;;  %4918 = vmatmul.msk.f32.vlgmr.msra.gmra.mxu0 %vm4589_vm2, %v4582_v17 }
0x1997   : > { %v4650_v54 = vpop.f32.mrf.mxu1 }
0x1998   : > { %v4651_v40 = vadd.f32 %v4650_v54, %v4587_v4 }
0x199d   : > { %v4670_v50 = vpop.f32.mrf.mxu0  ;;  %v4610_v43 = vpop.f32.mrf.mxu2 }
0x199e   : > { %v4671_v22 = vadd.f32 %v4670_v50, %v4651_v40  ;;  %v4611_v57 = vadd.f32 %v4610_v43, %v4587_v4 }
0x19a0   : > { %v4674_v10 = vmax.f32 %v4671_v22, 0.0 }
0x19a2   : > { %4721 = vmatpush.msrb.mxu0 %v4674_v10 }
0x19a3   : > { %v4630_v59 = vpop.f32.mrf.mxu3  ;;  %4920 = vmatmul.msk.f32.vlgmr.msrb.gmra.mxu0 %vm4682_vm1, %v4675_v27 }
0x19a4   : > { %v4631_v44 = vadd.f32 %v4630_v59, %v4611_v57 }
0x19a6   : > { %v4673_v24 = vmax.f32 %v4631_v44, 0.0 }
0x19a8   : > { %4701 = vmatpush.msrb.mxu3 %v4673_v24 }
0x19a9   : > { %4919 = vmatmul.msk.f32.vlgmr.msrb.gmra.mxu3 %vm4682_vm1, %v4675_v27 }
0x1a20   : > { %v4723_v7 = vpop.f32.mrf.mxu0 }
0x1a21   : > { %v4724_v26 = vadd.f32 %v4723_v7, %v4680_v36 }
0x1a23   : > { %v4728_v19 = vrot.slane %v4724_v26, 4 }
0x1a2c   : > { %v4703_v6 = vpop.f32.mrf.mxu3 }
0x1a2d   : > { %v4704_v45 = vadd.f32 %v4703_v6, %v4680_v36 }
0x1a2f   : > { %v4729_v37 = vsel %vm1281_vm7, %v4704_v45, %v4728_v19 }
0x1a30   : > { %4731 = vst [vmem:[%s1115_s5] sm:$0x77] %v4729_v37 }
0x1a31 PF: > { %s84_s28 = sadd.s32 1, %s5800_s28  }
0x1a32   : > { %p81_p1 = scmp.ge.s32.totalorder %s84_s28, 4  }
0x1a34   :  { %83 = sbr.rel (!%p81_p1) target bundleno = 68 (0x44), region = 235 }
0x1a39   :  { %4753 = vsyncpa [#allocation3], 1 }
0x1a3a   :  { %4755 = vsyncpa [#allocation3 + $0x1], 1 }

</bundles_post_ra>
